<compile_context>
chip_gen: v7x
topology: tpu7x:2x2x1
jax: 0.10.0
libtpu: 0.0.40
codegen_flags: <defaults>
</compile_context>

<pallas_src>
import functools
import math

import jax
import jax.numpy as jnp
from jax.experimental import pallas as pl
from jax.experimental.pallas import tpu as pltpu

BN_EPS = 1e-5


# ---------------------------------------------------------------------------
# Pallas kernels: 9-tap shifted-window conv (bf16 MXU, f32 acc) + BN epilogue
# ---------------------------------------------------------------------------
def _tap_windows(x_ref, taps, stride, Ho, Wo):
    """Yield the (Ho*Wo, C) bf16 matmul lhs for every conv tap.

    x_ref is the phase-split padded input block (1, s, s, Hq, Wq, C); every
    tap is a static (unstrided) window slice.  The (Ho, Wo, C) -> (Ho*Wo, C)
    collapse is VMEM-local (no HBM traffic).
    """
    C = x_ref.shape[-1]
    for kh, kw in taps:
        ph, pw = kh % stride, kw % stride        # phase (stride handled host-side)
        rh, rw = kh // stride, kw // stride      # static window offset in phase
        v = x_ref[0, ph, pw, rh:rh + Ho, rw:rw + Wo, :]      # (Ho, Wo, C)
        yield v.reshape(Ho * Wo, C)


def _tap_conv_kernel(x_ref, w_ref, b_ref, o_ref, *, taps, stride, Ho, Wo, relu):
    # w_ref: (T, C, Npad) bf16 (BN scale folded);  b_ref: (1, Npad) f32
    n_pad = w_ref.shape[-1]
    acc = jnp.zeros((Ho * Wo, n_pad), jnp.float32)
    for t, vm in enumerate(_tap_windows(x_ref, taps, stride, Ho, Wo)):
        acc = acc + jnp.dot(vm, w_ref[t], preferred_element_type=jnp.float32)
    acc = acc + b_ref[...]
    if relu:
        acc = jnp.maximum(acc, 0.0)
    o_ref[0] = acc.astype(o_ref.dtype)


def _tap_conv_res_kernel(x_ref, w_ref, b_ref, r_ref, o_ref,
                         *, taps, stride, Ho, Wo, relu):
    # Same as above with a fused bf16 residual add (upcast to f32 in-kernel).
    n_pad = w_ref.shape[-1]
    acc = jnp.zeros((Ho * Wo, n_pad), jnp.float32)
    for t, vm in enumerate(_tap_windows(x_ref, taps, stride, Ho, Wo)):
        acc = acc + jnp.dot(vm, w_ref[t], preferred_element_type=jnp.float32)
    acc = acc + b_ref[...] + r_ref[0].astype(jnp.float32)
    if relu:
        acc = jnp.maximum(acc, 0.0)
    o_ref[0] = acc.astype(o_ref.dtype)


def _tap_conv_dual_kernel(x_ref, w_ref, b_ref, ws_ref, bs_ref, o_ref, sc_ref,
                          *, taps, stride, Ho, Wo, center):
    # conv1 + bn1 + relu (main output) AND the 1x1 projection shortcut + bn
    # (second output), computed from the centre-tap window of the SAME input
    # block so the shortcut never re-reads x from HBM.
    n_pad = w_ref.shape[-1]
    acc = jnp.zeros((Ho * Wo, n_pad), jnp.float32)
    for t, vm in enumerate(_tap_windows(x_ref, taps, stride, Ho, Wo)):
        acc = acc + jnp.dot(vm, w_ref[t], preferred_element_type=jnp.float32)
        if taps[t] == center:
            sc = jnp.dot(vm, ws_ref[...], preferred_element_type=jnp.float32)
            sc_ref[0] = (sc + bs_ref[...]).astype(sc_ref.dtype)
    acc = jnp.maximum(acc + b_ref[...], 0.0)      # relu(bn1(conv1))
    o_ref[0] = acc.astype(o_ref.dtype)


# ---------------------------------------------------------------------------
# pallas_call wrapper
# ---------------------------------------------------------------------------
def _round_up(x, m):
    return ((x + m - 1) // m) * m


def _vmem_cap_bytes():
    try:
        return int(pltpu.get_tpu_info().vmem_capacity_bytes)
    except Exception:                 # query unavailable -> conservative default
        return 64 * 1024 * 1024


def tap_conv(x_phase, w_stack, bias, *, out_hw, stride, residual=None,
             shortcut_w=None, shortcut_b=None, relu=True,
             out_dtype=jnp.bfloat16):
    """relu?(tap_conv(x)*scale + bias [+ residual]); optional fused 1x1
    projection shortcut as a second output.  One grid step per image."""
    N, s, _, Hq, Wq, C = x_phase.shape
    T, Cw, n_pad = w_stack.shape
    assert s == stride and Cw == C and n_pad % 128 == 0
    Ho, Wo = out_hw
    M = Ho * Wo
    ksize = int(round(math.sqrt(T)))
    taps = [(kh, kw) for kh in range(ksize) for kw in range(ksize)]

    x_spec = pl.BlockSpec((1, s, s, Hq, Wq, C), lambda n: (n, 0, 0, 0, 0, 0))
    w_spec = pl.BlockSpec((T, C, n_pad), lambda n: (0, 0, 0))
    b_spec = pl.BlockSpec((1, n_pad), lambda n: (0, 0))
    io_spec = pl.BlockSpec((1, M, n_pad), lambda n: (n, 0, 0))

    inputs = [x_phase.astype(jnp.bfloat16), w_stack, bias.astype(jnp.float32)]
    in_specs = [x_spec, w_spec, b_spec]

    if shortcut_w is not None:
        kernel = functools.partial(
            _tap_conv_dual_kernel, taps=taps, stride=stride, Ho=Ho, Wo=Wo,
            center=(ksize // 2, ksize // 2))
        inputs += [shortcut_w, shortcut_b.astype(jnp.float32)]
        in_specs += [pl.BlockSpec((C, n_pad), lambda n: (0, 0)), b_spec]
        out_shape = (jax.ShapeDtypeStruct((N, M, n_pad), out_dtype),
                     jax.ShapeDtypeStruct((N, M, n_pad), out_dtype))
        out_specs = [io_spec, io_spec]
        n_out = 2
    elif residual is not None:
        kernel = functools.partial(
            _tap_conv_res_kernel, taps=taps, stride=stride, Ho=Ho, Wo=Wo,
            relu=relu)
        inputs += [residual.astype(jnp.bfloat16)]
        in_specs += [io_spec]
        out_shape = jax.ShapeDtypeStruct((N, M, n_pad), out_dtype)
        out_specs = io_spec
        n_out = 1
    else:
        kernel = functools.partial(
            _tap_conv_kernel, taps=taps, stride=stride, Ho=Ho, Wo=Wo, relu=relu)
        out_shape = jax.ShapeDtypeStruct((N, M, n_pad), out_dtype)
        out_specs = io_spec
        n_out = 1

    # Generation-aware VMEM limit (double-buffered blocks + f32 accumulator).
    out_itemsize = jnp.dtype(out_dtype).itemsize
    est = (2 * s * s * Hq * Wq * C * 2          # bf16 input block, double buffered
           + 2 * T * C * n_pad * 2              # bf16 weight stack
           + 4 * n_pad * 4                      # biases
           + 2 * C * n_pad * 2                  # shortcut weights (worst case)
           + 2 * M * n_pad * 2                  # bf16 residual (worst case)
           + 2 * n_out * M * n_pad * out_itemsize
           + 2 * M * n_pad * 4)                 # f32 accumulator + dot temp
    vmem_limit = int(min(max(3 * est // 2, 32 * 1024 * 1024),
                         _vmem_cap_bytes() * 3 // 4))

    return pl.pallas_call(
        kernel,
        out_shape=out_shape,
        grid_spec=pltpu.PrefetchScalarGridSpec(
            num_scalar_prefetch=0,
            grid=(N,),
            in_specs=in_specs,
            out_specs=out_specs),
        compiler_params=pltpu.CompilerParams(
            dimension_semantics=("parallel",),
            vmem_limit_bytes=vmem_limit),
    )(*inputs)


# ---------------------------------------------------------------------------
# Host-side glue: phase split, weight stacking + BN folding (plain JAX)
# ---------------------------------------------------------------------------
def _phase_split(x_nhwc, ksize, stride, pad):
    """Zero-pad spatially and split into stride phases: (N, s, s, Hq, Wq, C).

    Tap (kh, kw) of a stride-s conv then reads the UNstrided static window
    [kh//s : kh//s+Ho, kw//s : kw//s+Wo] of phase (kh % s, kw % s).
    """
    N, H, W, C = x_nhwc.shape
    Ho = (H + 2 * pad - ksize) // stride + 1
    Wo = (W + 2 * pad - ksize) // stride + 1
    xp = jnp.pad(x_nhwc, ((0, 0), (pad, pad), (pad, pad), (0, 0)))
    if stride == 1:
        return xp[:, None, None], Ho, Wo
    Hp, Wp = H + 2 * pad, W + 2 * pad
    Hq, Wq = -(-Hp // stride), -(-Wp // stride)
    xp = jnp.pad(xp, ((0, 0), (0, Hq * stride - Hp), (0, Wq * stride - Wp),
                      (0, 0)))
    xp = xp.reshape(N, Hq, stride, Wq, stride, C)
    return jnp.transpose(xp, (0, 2, 4, 1, 3, 5)), Ho, Wo


def _weight_stack(w_oihw, scale, cin_pad, n_pad):
    """(Cout,Cin,KH,KW) -> (KH*KW, cin_pad, n_pad) bf16, BN scale folded in."""
    cout, cin, kh, kw = w_oihw.shape
    w = jnp.transpose(w_oihw, (2, 3, 1, 0)).reshape(kh * kw, cin, cout)
    w = w * scale[None, None, :]                               # fold BN scale (f32)
    w = jnp.pad(w, ((0, 0), (0, cin_pad - cin), (0, n_pad - cout)))
    return w.astype(jnp.bfloat16)


def _fold_bn(bn):
    scale = bn["gamma"] / jnp.sqrt(bn["var"] + BN_EPS)
    bias = bn["beta"] - bn["mean"] * scale
    return scale, bias


def _padded_bias(bias, n_pad):
    return jnp.pad(bias, (0, n_pad - bias.shape[0])).reshape(1, n_pad)


# ---------------------------------------------------------------------------
# BasicBlock forward
# ---------------------------------------------------------------------------
def basic_block_forward_nhwc(x, params, stride=1):
    """NHWC f32 in -> NHWC f32 out (no boundary transposes)."""
    N, H, W, cin = x.shape
    planes = params["w1"].shape[0]
    n_pad = _round_up(planes, 128)        # lane-dense output channel dim

    x_bf = x.astype(jnp.bfloat16)         # bf16 MXU inputs, f32 accumulation

    # conv1 (3x3, stride, pad 1) + bn1 + relu [+ fused 1x1 projection shortcut]
    x1, Ho, Wo = _phase_split(x_bf, 3, stride, 1)
    s1, b1 = _fold_bn(params["bn1"])
    w1 = _weight_stack(params["w1"], s1, cin, n_pad)
    bias1 = _padded_bias(b1, n_pad)

    if stride != 1 or cin != planes:      # projection shortcut, fused into conv1
        ss, bs = _fold_bn(params["bns"])
        ws = _weight_stack(params["ws"], ss, cin, n_pad)[0]    # (cin, n_pad)
        out1, short = tap_conv(x1, w1, bias1, out_hw=(Ho, Wo), stride=stride,
                               shortcut_w=ws,
                               shortcut_b=_padded_bias(bs, n_pad),
                               out_dtype=jnp.bfloat16)
    else:                                 # identity shortcut (stride == 1)
        out1 = tap_conv(x1, w1, bias1, out_hw=(Ho, Wo), stride=stride,
                        relu=True, out_dtype=jnp.bfloat16)
        short = jnp.pad(x_bf, ((0, 0), (0, 0), (0, 0), (0, n_pad - cin))
                        ).reshape(N, H * W, n_pad)

    # conv2 (3x3, stride 1, pad 1) + bn2 + residual add + relu (fully fused)
    x2, _, _ = _phase_split(out1.reshape(N, Ho, Wo, n_pad), 3, 1, 1)
    s2, b2 = _fold_bn(params["bn2"])
    w2 = _weight_stack(params["w2"], s2, n_pad, n_pad)
    out = tap_conv(x2, w2, _padded_bias(b2, n_pad), out_hw=(Ho, Wo), stride=1,
                   residual=short, relu=True, out_dtype=jnp.float32)
    return out.reshape(N, Ho, Wo, n_pad)[..., :planes]   # single boundary strip


def basic_block_forward(x_nchw, params, stride=1):
    """PyTorch-layout (NCHW) entry point; transposes only at the boundary."""
    x = jnp.transpose(x_nchw, (0, 2, 3, 1)).astype(jnp.float32)
    out = basic_block_forward_nhwc(x, params, stride=stride)
    return jnp.transpose(out, (0, 3, 1, 2))


# ---------------------------------------------------------------------------
# Pure-JAX reference (for correctness check)
# ---------------------------------------------------------------------------
def ref_forward(x_nchw, params, stride=1, matmul_dtype=jnp.float32):
    """lax.conv reference.  matmul_dtype=bfloat16 mirrors the kernel's bf16
    MXU inputs and bf16 intermediates (f32 accumulation everywhere)."""

    def conv_bn(x, w, bn, s, pad):
        scale = bn["gamma"] / jnp.sqrt(bn["var"] + BN_EPS)
        bias = bn["beta"] - bn["mean"] * scale
        ws = (w * scale[:, None, None, None]).astype(matmul_dtype)
        y = jax.lax.conv_general_dilated(
            x.astype(matmul_dtype), ws, (s, s), [(pad, pad), (pad, pad)],
            dimension_numbers=("NCHW", "OIHW", "NCHW"),
            preferred_element_type=jnp.float32)
        return y + bias[None, :, None, None]

    out1 = jax.nn.relu(conv_bn(x_nchw, params["w1"], params["bn1"], stride, 1))
    out2 = conv_bn(out1, params["w2"], params["bn2"], 1, 1)
    cin, planes = x_nchw.shape[1], params["w1"].shape[0]
    if stride != 1 or cin != planes:
        sc = conv_bn(x_nchw, params["ws"], params["bns"], stride, 0)
    else:
        sc = x_nchw
    # Mirror the kernel, which carries the residual in bf16.
    sc = sc.astype(matmul_dtype).astype(jnp.float32)
    return jax.nn.relu(out2 + sc)


# ---------------------------------------------------------------------------
# Deterministic parameter init
# ---------------------------------------------------------------------------
def init_params(key, in_planes, planes):
    ks = jax.random.split(key, 6)

    def bn_params(k):
        k1, k2, k3, k4 = jax.random.split(k, 4)
        return {
            "gamma": 1.0 + 0.1 * jax.random.normal(k1, (planes,), jnp.float32),
            "beta": 0.1 * jax.random.normal(k2, (planes,), jnp.float32),
            "mean": 0.1 * jax.random.normal(k3, (planes,), jnp.float32),
            "var": jax.random.uniform(k4, (planes,), jnp.float32, 0.5, 1.5),
        }

    return {
        "w1": 0.1 * jax.random.normal(ks[0], (planes, in_planes, 3, 3), jnp.float32),
        "bn1": bn_params(ks[1]),
        "w2": 0.1 * jax.random.normal(ks[2], (planes, planes, 3, 3), jnp.float32),
        "bn2": bn_params(ks[3]),
        "ws": 0.1 * jax.random.normal(ks[4], (planes, in_planes, 1, 1), jnp.float32),
        "bns": bn_params(ks[5]),
    }


if __name__ == "__main__":
    key = jax.random.PRNGKey(0)
    B, H, W = 2, 16, 16

    configs = [
        (4, 8, 1),   # channel change -> 1x1 conv + BN shortcut (fused in conv1)
        (8, 8, 1),   # identity shortcut
        (4, 8, 2),   # strided conv shortcut
    ]
    for idx, (in_planes, planes, stride) in enumerate(configs):
        kx, kp = jax.random.split(jax.random.fold_in(key, idx))
        x = jax.random.normal(kx, (B, in_planes, H, W), jnp.float32)
        params = init_params(kp, in_planes, planes)

        out = jax.block_until_ready(
            basic_block_forward(x, params, stride=stride))
        ref_match = ref_forward(x, params, stride=stride,
                                matmul_dtype=jnp.bfloat16)
        ref_f32 = ref_forward(x, params, stride=stride,
                              matmul_dtype=jnp.float32)

        assert out.shape == (B, planes, H // stride, W // stride), out.shape
        # Check vs a reference that mirrors the kernel's bf16 inputs /
        # intermediates.  Tolerance covers one bf16 ulp on the rounded
        # residual (accumulation-order rounding boundaries).
        assert jnp.allclose(out, ref_match, atol=2e-2, rtol=2e-2), (
            float(jnp.max(jnp.abs(out - ref_match))))
        # Loose check vs the pure-f32 reference (bf16 inputs cost ~1e-2 abs).
        assert jnp.allclose(out, ref_f32, atol=1e-1, rtol=1e-1), (
            float(jnp.max(jnp.abs(out - ref_f32))))

    print("KERNEL_OK")
</pallas_src>

<mosaic_0001>
module attributes {stable_mosaic.version = 11 : i64} {
  func.func @_tap_conv_dual_kernel(%arg0: i32, %arg1: memref<1x1x1x18x18x4xbf16, #tpu.memory_space<vmem>>, %arg2: memref<9x4x128xbf16, #tpu.memory_space<vmem>>, %arg3: memref<1x128xf32, #tpu.memory_space<vmem>>, %arg4: memref<4x128xbf16, #tpu.memory_space<vmem>>, %arg5: memref<1x128xf32, #tpu.memory_space<vmem>>, %arg6: memref<1x256x128xbf16, #tpu.memory_space<vmem>>, %arg7: memref<1x256x128xbf16, #tpu.memory_space<vmem>>) attributes {dimension_semantics = [#tpu.dimension_semantics<parallel>], iteration_bounds = array<i64: 2>, scalar_prefetch = 0 : i64, scratch_operands = 0 : i64, tpu.core_type = #tpu.core_type<tc>, window_params = [{transform_indices = @transform_0, window_bounds = array<i64: 1, 1, 1, 18, 18, 4>}, {pipeline_mode = #tpu.pipeline_mode<synchronous>, transform_indices = @transform_1, window_bounds = array<i64: 9, 4, 128>}, {pipeline_mode = #tpu.pipeline_mode<synchronous>, transform_indices = @transform_2, window_bounds = array<i64: 1, 128>}, {pipeline_mode = #tpu.pipeline_mode<synchronous>, transform_indices = @transform_3, window_bounds = array<i64: 4, 128>}, {pipeline_mode = #tpu.pipeline_mode<synchronous>, transform_indices = @transform_4, window_bounds = array<i64: 1, 128>}, {transform_indices = @transform_5, window_bounds = array<i64: 1, 256, 128>}, {transform_indices = @transform_6, window_bounds = array<i64: 1, 256, 128>}]} {
    %cst = arith.constant 0.000000e+00 : f32
    %0 = vector.broadcast %cst : f32 to vector<256x128xf32>
    %c0 = arith.constant 0 : index
    %c0_0 = arith.constant 0 : index
    %c0_1 = arith.constant 0 : index
    %c0_2 = arith.constant 0 : index
    %c0_3 = arith.constant 0 : index
    %c0_4 = arith.constant 0 : index
    %1 = vector.load %arg1[%c0, %c0_0, %c0_1, %c0_2, %c0_3, %c0_4] : memref<1x1x1x18x18x4xbf16, #tpu.memory_space<vmem>>, vector<1x1x1x16x16x4xbf16>
    %2 = vector.shape_cast %1 : vector<1x1x1x16x16x4xbf16> to vector<16x16x4xbf16>
    %3 = vector.shape_cast %2 : vector<16x16x4xbf16> to vector<256x4xbf16>
    %c0_5 = arith.constant 0 : index
    %c0_6 = arith.constant 0 : index
    %c0_7 = arith.constant 0 : index
    %4 = vector.load %arg2[%c0_5, %c0_6, %c0_7] : memref<9x4x128xbf16, #tpu.memory_space<vmem>>, vector<1x4x128xbf16>
    %5 = vector.shape_cast %4 : vector<1x4x128xbf16> to vector<4x128xbf16>
    %cst_8 = arith.constant dense<0.000000e+00> : vector<256x128xf32>
    %6 = tpu.matmul %3, %5, %cst_8 {dimension_numbers = #tpu.dot_dimension_numbers<[1], [0], [0], [1], [0, 0, 1, 1], [], []>} : vector<256x4xbf16>, vector<4x128xbf16>, vector<256x128xf32> -> vector<256x128xf32>
    %7 = arith.addf %0, %6 : vector<256x128xf32>
    %c0_9 = arith.constant 0 : index
    %c0_10 = arith.constant 0 : index
    %c0_11 = arith.constant 0 : index
    %c0_12 = arith.constant 0 : index
    %c1 = arith.constant 1 : index
    %c0_13 = arith.constant 0 : index
    %8 = vector.load %arg1[%c0_9, %c0_10, %c0_11, %c0_12, %c1, %c0_13] : memref<1x1x1x18x18x4xbf16, #tpu.memory_space<vmem>>, vector<1x1x1x16x16x4xbf16>
    %9 = vector.shape_cast %8 : vector<1x1x1x16x16x4xbf16> to vector<16x16x4xbf16>
    %10 = vector.shape_cast %9 : vector<16x16x4xbf16> to vector<256x4xbf16>
    %c1_14 = arith.constant 1 : index
    %c0_15 = arith.constant 0 : index
    %c0_16 = arith.constant 0 : index
    %11 = vector.load %arg2[%c1_14, %c0_15, %c0_16] : memref<9x4x128xbf16, #tpu.memory_space<vmem>>, vector<1x4x128xbf16>
    %12 = vector.shape_cast %11 : vector<1x4x128xbf16> to vector<4x128xbf16>
    %cst_17 = arith.constant dense<0.000000e+00> : vector<256x128xf32>
    %13 = tpu.matmul %10, %12, %cst_17 {dimension_numbers = #tpu.dot_dimension_numbers<[1], [0], [0], [1], [0, 0, 1, 1], [], []>} : vector<256x4xbf16>, vector<4x128xbf16>, vector<256x128xf32> -> vector<256x128xf32>
    %14 = arith.addf %7, %13 : vector<256x128xf32>
    %c0_18 = arith.constant 0 : index
    %c0_19 = arith.constant 0 : index
    %c0_20 = arith.constant 0 : index
    %c0_21 = arith.constant 0 : index
    %c2 = arith.constant 2 : index
    %c0_22 = arith.constant 0 : index
    %15 = vector.load %arg1[%c0_18, %c0_19, %c0_20, %c0_21, %c2, %c0_22] : memref<1x1x1x18x18x4xbf16, #tpu.memory_space<vmem>>, vector<1x1x1x16x16x4xbf16>
    %16 = vector.shape_cast %15 : vector<1x1x1x16x16x4xbf16> to vector<16x16x4xbf16>
    %17 = vector.shape_cast %16 : vector<16x16x4xbf16> to vector<256x4xbf16>
    %c2_23 = arith.constant 2 : index
    %c0_24 = arith.constant 0 : index
    %c0_25 = arith.constant 0 : index
    %18 = vector.load %arg2[%c2_23, %c0_24, %c0_25] : memref<9x4x128xbf16, #tpu.memory_space<vmem>>, vector<1x4x128xbf16>
    %19 = vector.shape_cast %18 : vector<1x4x128xbf16> to vector<4x128xbf16>
    %cst_26 = arith.constant dense<0.000000e+00> : vector<256x128xf32>
    %20 = tpu.matmul %17, %19, %cst_26 {dimension_numbers = #tpu.dot_dimension_numbers<[1], [0], [0], [1], [0, 0, 1, 1], [], []>} : vector<256x4xbf16>, vector<4x128xbf16>, vector<256x128xf32> -> vector<256x128xf32>
    %21 = arith.addf %14, %20 : vector<256x128xf32>
    %c0_27 = arith.constant 0 : index
    %c0_28 = arith.constant 0 : index
    %c0_29 = arith.constant 0 : index
    %c1_30 = arith.constant 1 : index
    %c0_31 = arith.constant 0 : index
    %c0_32 = arith.constant 0 : index
    %22 = vector.load %arg1[%c0_27, %c0_28, %c0_29, %c1_30, %c0_31, %c0_32] : memref<1x1x1x18x18x4xbf16, #tpu.memory_space<vmem>>, vector<1x1x1x16x16x4xbf16>
    %23 = vector.shape_cast %22 : vector<1x1x1x16x16x4xbf16> to vector<16x16x4xbf16>
    %24 = vector.shape_cast %23 : vector<16x16x4xbf16> to vector<256x4xbf16>
    %c3 = arith.constant 3 : index
    %c0_33 = arith.constant 0 : index
    %c0_34 = arith.constant 0 : index
    %25 = vector.load %arg2[%c3, %c0_33, %c0_34] : memref<9x4x128xbf16, #tpu.memory_space<vmem>>, vector<1x4x128xbf16>
    %26 = vector.shape_cast %25 : vector<1x4x128xbf16> to vector<4x128xbf16>
    %cst_35 = arith.constant dense<0.000000e+00> : vector<256x128xf32>
    %27 = tpu.matmul %24, %26, %cst_35 {dimension_numbers = #tpu.dot_dimension_numbers<[1], [0], [0], [1], [0, 0, 1, 1], [], []>} : vector<256x4xbf16>, vector<4x128xbf16>, vector<256x128xf32> -> vector<256x128xf32>
    %28 = arith.addf %21, %27 : vector<256x128xf32>
    %c0_36 = arith.constant 0 : index
    %c0_37 = arith.constant 0 : index
    %c0_38 = arith.constant 0 : index
    %c1_39 = arith.constant 1 : index
    %c1_40 = arith.constant 1 : index
    %c0_41 = arith.constant 0 : index
    %29 = vector.load %arg1[%c0_36, %c0_37, %c0_38, %c1_39, %c1_40, %c0_41] : memref<1x1x1x18x18x4xbf16, #tpu.memory_space<vmem>>, vector<1x1x1x16x16x4xbf16>
    %30 = vector.shape_cast %29 : vector<1x1x1x16x16x4xbf16> to vector<16x16x4xbf16>
    %31 = vector.shape_cast %30 : vector<16x16x4xbf16> to vector<256x4xbf16>
    %c4 = arith.constant 4 : index
    %c0_42 = arith.constant 0 : index
    %c0_43 = arith.constant 0 : index
    %32 = vector.load %arg2[%c4, %c0_42, %c0_43] : memref<9x4x128xbf16, #tpu.memory_space<vmem>>, vector<1x4x128xbf16>
    %33 = vector.shape_cast %32 : vector<1x4x128xbf16> to vector<4x128xbf16>
    %cst_44 = arith.constant dense<0.000000e+00> : vector<256x128xf32>
    %34 = tpu.matmul %31, %33, %cst_44 {dimension_numbers = #tpu.dot_dimension_numbers<[1], [0], [0], [1], [0, 0, 1, 1], [], []>} : vector<256x4xbf16>, vector<4x128xbf16>, vector<256x128xf32> -> vector<256x128xf32>
    %35 = arith.addf %28, %34 : vector<256x128xf32>
    %c0_45 = arith.constant 0 : index
    %c0_46 = arith.constant 0 : index
    %36 = vector.load %arg4[%c0_45, %c0_46] : memref<4x128xbf16, #tpu.memory_space<vmem>>, vector<4x128xbf16>
    %cst_47 = arith.constant dense<0.000000e+00> : vector<256x128xf32>
    %37 = tpu.matmul %31, %36, %cst_47 {dimension_numbers = #tpu.dot_dimension_numbers<[1], [0], [0], [1], [0, 0, 1, 1], [], []>} : vector<256x4xbf16>, vector<4x128xbf16>, vector<256x128xf32> -> vector<256x128xf32>
    %c0_48 = arith.constant 0 : index
    %c0_49 = arith.constant 0 : index
    %38 = vector.load %arg5[%c0_48, %c0_49] : memref<1x128xf32, #tpu.memory_space<vmem>>, vector<1x128xf32>
    %39 = vector.broadcast %38 : vector<1x128xf32> to vector<256x128xf32>
    %40 = arith.addf %37, %39 : vector<256x128xf32>
    %41 = arith.truncf %40 : vector<256x128xf32> to vector<256x128xbf16>
    %c0_50 = arith.constant 0 : index
    %c0_51 = arith.constant 0 : index
    %c0_52 = arith.constant 0 : index
    %42 = vector.load %arg7[%c0_50, %c0_51, %c0_52] : memref<1x256x128xbf16, #tpu.memory_space<vmem>>, vector<1x256x128xbf16>
    %43 = vector.shape_cast %42 : vector<1x256x128xbf16> to vector<256x128xbf16>
    %44 = vector.shape_cast %41 : vector<256x128xbf16> to vector<1x256x128xbf16>
    tpu.vector_store %arg7[%c0_50, %c0_51, %c0_52], %44 {strides = array<i32>} : memref<1x256x128xbf16, #tpu.memory_space<vmem>>, vector<1x256x128xbf16>,
    %c0_53 = arith.constant 0 : index
    %c0_54 = arith.constant 0 : index
    %c0_55 = arith.constant 0 : index
    %c1_56 = arith.constant 1 : index
    %c2_57 = arith.constant 2 : index
    %c0_58 = arith.constant 0 : index
    %45 = vector.load %arg1[%c0_53, %c0_54, %c0_55, %c1_56, %c2_57, %c0_58] : memref<1x1x1x18x18x4xbf16, #tpu.memory_space<vmem>>, vector<1x1x1x16x16x4xbf16>
    %46 = vector.shape_cast %45 : vector<1x1x1x16x16x4xbf16> to vector<16x16x4xbf16>
    %47 = vector.shape_cast %46 : vector<16x16x4xbf16> to vector<256x4xbf16>
    %c5 = arith.constant 5 : index
    %c0_59 = arith.constant 0 : index
    %c0_60 = arith.constant 0 : index
    %48 = vector.load %arg2[%c5, %c0_59, %c0_60] : memref<9x4x128xbf16, #tpu.memory_space<vmem>>, vector<1x4x128xbf16>
    %49 = vector.shape_cast %48 : vector<1x4x128xbf16> to vector<4x128xbf16>
    %cst_61 = arith.constant dense<0.000000e+00> : vector<256x128xf32>
    %50 = tpu.matmul %47, %49, %cst_61 {dimension_numbers = #tpu.dot_dimension_numbers<[1], [0], [0], [1], [0, 0, 1, 1], [], []>} : vector<256x4xbf16>, vector<4x128xbf16>, vector<256x128xf32> -> vector<256x128xf32>
    %51 = arith.addf %35, %50 : vector<256x128xf32>
    %c0_62 = arith.constant 0 : index
    %c0_63 = arith.constant 0 : index
    %c0_64 = arith.constant 0 : index
    %c2_65 = arith.constant 2 : index
    %c0_66 = arith.constant 0 : index
    %c0_67 = arith.constant 0 : index
    %52 = vector.load %arg1[%c0_62, %c0_63, %c0_64, %c2_65, %c0_66, %c0_67] : memref<1x1x1x18x18x4xbf16, #tpu.memory_space<vmem>>, vector<1x1x1x16x16x4xbf16>
    %53 = vector.shape_cast %52 : vector<1x1x1x16x16x4xbf16> to vector<16x16x4xbf16>
    %54 = vector.shape_cast %53 : vector<16x16x4xbf16> to vector<256x4xbf16>
    %c6 = arith.constant 6 : index
    %c0_68 = arith.constant 0 : index
    %c0_69 = arith.constant 0 : index
    %55 = vector.load %arg2[%c6, %c0_68, %c0_69] : memref<9x4x128xbf16, #tpu.memory_space<vmem>>, vector<1x4x128xbf16>
    %56 = vector.shape_cast %55 : vector<1x4x128xbf16> to vector<4x128xbf16>
    %cst_70 = arith.constant dense<0.000000e+00> : vector<256x128xf32>
    %57 = tpu.matmul %54, %56, %cst_70 {dimension_numbers = #tpu.dot_dimension_numbers<[1], [0], [0], [1], [0, 0, 1, 1], [], []>} : vector<256x4xbf16>, vector<4x128xbf16>, vector<256x128xf32> -> vector<256x128xf32>
    %58 = arith.addf %51, %57 : vector<256x128xf32>
    %c0_71 = arith.constant 0 : index
    %c0_72 = arith.constant 0 : index
    %c0_73 = arith.constant 0 : index
    %c2_74 = arith.constant 2 : index
    %c1_75 = arith.constant 1 : index
    %c0_76 = arith.constant 0 : index
    %59 = vector.load %arg1[%c0_71, %c0_72, %c0_73, %c2_74, %c1_75, %c0_76] : memref<1x1x1x18x18x4xbf16, #tpu.memory_space<vmem>>, vector<1x1x1x16x16x4xbf16>
    %60 = vector.shape_cast %59 : vector<1x1x1x16x16x4xbf16> to vector<16x16x4xbf16>
    %61 = vector.shape_cast %60 : vector<16x16x4xbf16> to vector<256x4xbf16>
    %c7 = arith.constant 7 : index
    %c0_77 = arith.constant 0 : index
    %c0_78 = arith.constant 0 : index
    %62 = vector.load %arg2[%c7, %c0_77, %c0_78] : memref<9x4x128xbf16, #tpu.memory_space<vmem>>, vector<1x4x128xbf16>
    %63 = vector.shape_cast %62 : vector<1x4x128xbf16> to vector<4x128xbf16>
    %cst_79 = arith.constant dense<0.000000e+00> : vector<256x128xf32>
    %64 = tpu.matmul %61, %63, %cst_79 {dimension_numbers = #tpu.dot_dimension_numbers<[1], [0], [0], [1], [0, 0, 1, 1], [], []>} : vector<256x4xbf16>, vector<4x128xbf16>, vector<256x128xf32> -> vector<256x128xf32>
    %65 = arith.addf %58, %64 : vector<256x128xf32>
    %c0_80 = arith.constant 0 : index
    %c0_81 = arith.constant 0 : index
    %c0_82 = arith.constant 0 : index
    %c2_83 = arith.constant 2 : index
    %c2_84 = arith.constant 2 : index
    %c0_85 = arith.constant 0 : index
    %66 = vector.load %arg1[%c0_80, %c0_81, %c0_82, %c2_83, %c2_84, %c0_85] : memref<1x1x1x18x18x4xbf16, #tpu.memory_space<vmem>>, vector<1x1x1x16x16x4xbf16>
    %67 = vector.shape_cast %66 : vector<1x1x1x16x16x4xbf16> to vector<16x16x4xbf16>
    %68 = vector.shape_cast %67 : vector<16x16x4xbf16> to vector<256x4xbf16>
    %c8 = arith.constant 8 : index
    %c0_86 = arith.constant 0 : index
    %c0_87 = arith.constant 0 : index
    %69 = vector.load %arg2[%c8, %c0_86, %c0_87] : memref<9x4x128xbf16, #tpu.memory_space<vmem>>, vector<1x4x128xbf16>
    %70 = vector.shape_cast %69 : vector<1x4x128xbf16> to vector<4x128xbf16>
    %cst_88 = arith.constant dense<0.000000e+00> : vector<256x128xf32>
    %71 = tpu.matmul %68, %70, %cst_88 {dimension_numbers = #tpu.dot_dimension_numbers<[1], [0], [0], [1], [0, 0, 1, 1], [], []>} : vector<256x4xbf16>, vector<4x128xbf16>, vector<256x128xf32> -> vector<256x128xf32>
    %72 = arith.addf %65, %71 : vector<256x128xf32>
    %c0_89 = arith.constant 0 : index
    %c0_90 = arith.constant 0 : index
    %73 = vector.load %arg3[%c0_89, %c0_90] : memref<1x128xf32, #tpu.memory_space<vmem>>, vector<1x128xf32>
    %74 = vector.broadcast %73 : vector<1x128xf32> to vector<256x128xf32>
    %75 = arith.addf %72, %74 : vector<256x128xf32>
    %cst_91 = arith.constant 0.000000e+00 : f32
    %76 = vector.broadcast %cst_91 : f32 to vector<256x128xf32>
    %77 = arith.maximumf %75, %76 : vector<256x128xf32>
    %78 = arith.truncf %77 : vector<256x128xf32> to vector<256x128xbf16>
    %c0_92 = arith.constant 0 : index
    %c0_93 = arith.constant 0 : index
    %c0_94 = arith.constant 0 : index
    %79 = vector.load %arg6[%c0_92, %c0_93, %c0_94] : memref<1x256x128xbf16, #tpu.memory_space<vmem>>, vector<1x256x128xbf16>
    %80 = vector.shape_cast %79 : vector<1x256x128xbf16> to vector<256x128xbf16>
    %81 = vector.shape_cast %78 : vector<256x128xbf16> to vector<1x256x128xbf16>
    tpu.vector_store %arg6[%c0_92, %c0_93, %c0_94], %81 {strides = array<i32>} : memref<1x256x128xbf16, #tpu.memory_space<vmem>>, vector<1x256x128xbf16>,
    return
  }
  func.func @transform_0(%arg0: i32) -> (i32, i32, i32, i32, i32, i32) {
    %c0_i32 = arith.constant 0 : i32
    %c0_i32_0 = arith.constant 0 : i32
    %c0_i32_1 = arith.constant 0 : i32
    %c0_i32_2 = arith.constant 0 : i32
    %c0_i32_3 = arith.constant 0 : i32
    %c0_i32_4 = arith.constant 0 : i32
    return %arg0, %c0_i32, %c0_i32_0, %c0_i32_1, %c0_i32_2, %c0_i32_3 : i32, i32, i32, i32, i32, i32
  }
  func.func @transform_1(%arg0: i32) -> (i32, i32, i32) {
    %c0_i32 = arith.constant 0 : i32
    %c0_i32_0 = arith.constant 0 : i32
    %c0_i32_1 = arith.constant 0 : i32
    %c0_i32_2 = arith.constant 0 : i32
    return %c0_i32, %c0_i32_0, %c0_i32_1 : i32, i32, i32
  }
  func.func @transform_2(%arg0: i32) -> (i32, i32) {
    %c0_i32 = arith.constant 0 : i32
    %c0_i32_0 = arith.constant 0 : i32
    %c0_i32_1 = arith.constant 0 : i32
    return %c0_i32, %c0_i32_0 : i32, i32
  }
  func.func @transform_3(%arg0: i32) -> (i32, i32) {
    %c0_i32 = arith.constant 0 : i32
    %c0_i32_0 = arith.constant 0 : i32
    %c0_i32_1 = arith.constant 0 : i32
    return %c0_i32, %c0_i32_0 : i32, i32
  }
  func.func @transform_4(%arg0: i32) -> (i32, i32) {
    %c0_i32 = arith.constant 0 : i32
    %c0_i32_0 = arith.constant 0 : i32
    %c0_i32_1 = arith.constant 0 : i32
    return %c0_i32, %c0_i32_0 : i32, i32
  }
  func.func @transform_5(%arg0: i32) -> (i32, i32, i32) {
    %c0_i32 = arith.constant 0 : i32
    %c0_i32_0 = arith.constant 0 : i32
    %c0_i32_1 = arith.constant 0 : i32
    return %arg0, %c0_i32, %c0_i32_0 : i32, i32, i32
  }
  func.func @transform_6(%arg0: i32) -> (i32, i32, i32) {
    %c0_i32 = arith.constant 0 : i32
    %c0_i32_0 = arith.constant 0 : i32
    %c0_i32_1 = arith.constant 0 : i32
    return %arg0, %c0_i32, %c0_i32_0 : i32, i32, i32
  }
}

</mosaic_0001>

<bundles_post_ra>
// kernel: tpu_custom_call.1
= control target key start
LH: loop header
LB: loop body
LE: loop exit
PB: predicated region body
PF: predicated region fallthrough
CT: control target
= control target key end

     0   :  { %12 = vsyncpa [#allocation3], 0  ;;  %s9489_s0 = inlined_call_operand.vmem [shape: bf16[2,1,1,18,18,4], index: 0, kind: input, shape index: {}]   ;;  %s9490_s1 = inlined_call_operand.vmem [shape: bf16[9,4,128], index: 1, kind: input, shape index: {}]   ;;  %s9491_s2 = inlined_call_operand.vmem [shape: f32[1,128], index: 2, kind: input, shape index: {}]   ;;  %s9492_s3 = inlined_call_operand.vmem [shape: bf16[4,128], index: 3, kind: input, shape index: {}]   ;;  %s9493_s4 = inlined_call_operand.vmem [shape: f32[1,128], index: 4, kind: input, shape index: {}]   ;;  %s9494_s5 = inlined_call_operand.hbm [shape: bf16[2,256,128], index: 5, kind: output, shape index: {0}]   ;;  %s9495_s6 = inlined_call_operand.hbm [shape: bf16[2,256,128], index: 6, kind: output, shape index: {1}]  }
   0x1   :  { %14 = vsyncpa [#allocation3 + $0x1], 0 }
   0x2   :  { %15 = vsyncpa [#allocation5], 0 }
   0x3   :  { %17 = vsyncpa [#allocation5 + $0x1], 0  ;;  %s7517_s21 = smov 0   ;;  %s7519_s22 = smov 0  }
   0x4   :  { %s7521_s23 = smov 0   ;;  %s7523_s24 = smov 0  }
   0x5 LB: > { %s7538_s25 = sadd.s32 4294967295, %s7476_s24   ;;  %s5545_s26 = sadd.s32 4294967294, %s7476_s24   ;;  %s7476_s24 = sphi %s7523_s24, %s9610_s24   ;;  %s7472_s23 = sphi %s7521_s23, %s9609_s23   ;;  %s7468_s22 = sphi %s7519_s22, %s9608_s22   ;;  %s7464_s21 = sphi %s7517_s21, %s9607_s21  }
   0x6   : > { %s7542_s27 = sadd.s32 1, %s7476_s24   ;;  %s140_s28 = sadd.s32 1, %s7472_s23 }
   0x7   : > { %s137_s29 = ssub.s32 %s7476_s24, %s7542_s27  ;;  %p150_p0 = scmp.ne.s32.totalorder %s7472_s23, %s7468_s22 }
   0x8   : > { %p138_p1 = scmp.eq.s32.totalorder %s137_s29, 0  ;;  %p151_p2 = scmp.eq.s32.totalorder %s7538_s25, 1 }
   0x9   : > { %p156_p3 = scmp.ne.s32.totalorder %s7468_s22, %s7464_s21  ;;  %p157_p4 = scmp.eq.s32.totalorder %s5545_s26, 1 }
   0xa   : > { %s7553_s30 = scalar_select %p138_p1, %s7472_s23, %s140_s28  }
   0xb   : > { %p7555_p5 = por %p151_p2, %p150_p0  ;;  %p7559_p6 = por %p157_p4, %p156_p3 }
   0xc   : > { %p5548_p7 = scmp.ge.s32.totalorder %s7476_s24, 1  ;;  %p221_p8 = scmp.lt.s32.totalorder %s7476_s24, 3 }
   0xe   : > { %p222_p9 = pnand %p5548_p7, %p221_p8 }
  0x10   : > { %225 = sbr.rel (%p222_p9) target bundleno = 684 (0x2ac), region = 40 }
  0x17   : > { %vm797_vm0 = vcmask 1041408   ;;  %v5779_v0 = vld [vmem:[%s9490_s1 + $0x8] sm:$0x3]  ;;  %v5552_v1 = vld [vmem:[%s9490_s1 + $0x2] sm:$0x3]  ;;  %p256_p10 = scmp.lt.s32.totalorder %s7538_s25, 1 }
  0x18   : > { %7236 = vmatprep.subr.msk.bf16.mxu0 %vm797_vm0, %v5779_v0  ;;  %7232 = vmatprep.subr.msk.bf16.mxu1 %vm797_vm0, %v5552_v1  ;;  %v2601_v2 = vsel %vm797_vm0, %v5779_v0, 0  ;;  %v799_v3 = vsel %vm797_vm0, %v5552_v1, 0  ;;  %v5925_v4 = vld [vmem:[%s9490_s1 + $0xa] sm:$0x3]  ;;  %v7583_v5 = vld [vmem:[%s9490_s1] sm:$0x3] }
  0x19   : > { %6773 = vmatpush3.bf16.msra.mxu0 %v2601_v2  ;;  %6637 = vmatpush3.bf16.msra.mxu1 %v799_v3  ;;  %s257_s13 = scalar_select %p256_p10, %s7538_s25, 1  ;;  %vm311_vm1 = vsmask.f32 3328  ;;  %vm312_vm2 = vsmask.f32 7440  ;;  %vm748_vm3 = vcmask 31744  }
  0x1a   : > { %7238 = vmatprep.subr.msk.bf16.mxu0 %vm797_vm0, %v5925_v4  ;;  %7233 = vmatprep.subr.msk.bf16.mxu1 %vm797_vm0, %v7583_v5  ;;  %vm7603_vm4 = vmor %vm311_vm1, %vm312_vm2  ;;  %v7615_v58 = vsel %vm797_vm0, %v5925_v4, 0  ;;  %v1091_v63 = vsel %vm797_vm0, %v7583_v5, 0  ;;  %vm1302_vm5 = vcmask 1042432   ;;  %vm1303_vm6 = vcmask 1046532   ;;  %s6274_s12 = sshll.u32 %s7538_s25, 11  ;;  %s7478_s19 = smov [#allocation4]  }
  0x1b   : > { %s7242_s18 = smul.u32 216, %s257_s13  ;;  %vm7976_vm7 = vmor %vm1302_vm5, %vm1303_vm6  ;;  %s9391_s16 = scalar_lea.hbm %s9495_s6, %s6274_s12 }
  0x1c   : > { %s7386_s20 = sshll.u32 %s7478_s19, 4  ;;  %s7387_s20 = int_to_ptr.vmem [resolvable:$false] %s7386_s20 }
  0x1d   : > { %s7591_s26 = scalar_lea.vmem %s9489_s0, %s7242_s18 }
  0x1e   : > { %v262_v6 = vld [vmem:[%s7591_s26] sm:$0xf]  ;;  %v263_v7 = vld [vmem:[%s7591_s26 + $0x4] sm:$0xf]  ;;  %v295_v8 = vld [vmem:[%s7591_s26 + $0x8] sm:$0x1] }
  0x1f   : > { %v315_v9 = vshrl.u32 %v262_v6, 16  ;;  %v318_v10 = vshll.u32 %v262_v6, 16  ;;  %v324_v11 = vshll.u32 %v263_v7, 16  ;;  %v328_v12 = vshrl.u32 %v263_v7, 16  ;;  %v5731_v13 = vld [vmem:[%s7591_s26 + $0xc] sm:$0xf] }
  0x20   : > { %v334_v14 = vshll.u32 %v295_v8, 16  ;;  %v5732_v15 = vld [vmem:[%s7591_s26 + $0x10] sm:$0xf]  ;;  %v5733_v16 = vld [vmem:[%s7591_s26 + $0x14] sm:$0x1]  ;;  %v2119_v23 = vshrl.u32 %v5731_v13, 16 }
  0x21   : > { %v317_v17 = vrot.slane %v315_v9, 4  ;;  %v320_v18 = vrot.slane %v318_v10, 5  ;;  %v326_v19 = vrot.slane %v324_v11, 5  ;;  %v330_v20 = vrot.slane %v328_v12, 4  ;;  %v264_v21 = vld [vmem:[%s7591_s26 + $0xc] sm:$0xf] }
  0x22   : > { %v336_v22 = vrot.slane %v334_v14, 5  ;;  %v2122_v24 = vshll.u32 %v5731_v13, 16  ;;  %v2128_v25 = vshll.u32 %v5732_v15, 16  ;;  %v2132_v28 = vshrl.u32 %v5732_v15, 16  ;;  %v265_v30 = vld [vmem:[%s7591_s26 + $0x10] sm:$0xf] }
  0x23   : > { %v321_v26 = vor.u32 %v320_v18, %v317_v17  ;;  %v331_v27 = vor.u32 %v330_v20, %v326_v19  ;;  %v2138_v29 = vshll.u32 %v5733_v16, 16  ;;  %v2121_v32 = vrot.slane %v2119_v23, 4  ;;  %v296_v41 = vld [vmem:[%s7591_s26 + $0x14] sm:$0x1]  ;;  %v5734_v49 = vld [vmem:[%s7591_s26 + $0x18] sm:$0xf] }
  0x24   : > { %v2124_v33 = vrot.slane %v2122_v24, 5  ;;  %v2130_v34 = vrot.slane %v2128_v25, 5  ;;  %v339_v35 = vshrl.u32 %v264_v21, 16  ;;  %v2134_v38 = vrot.slane %v2132_v28, 4  ;;  %v5735_v57 = vld [vmem:[%s7591_s26 + $0x1c] sm:$0xf] }
  0x25   : > { %v322_v36 = vrot.slane %v321_v26, 4  ;;  %v332_v37 = vrot.slane %v331_v27, 4  ;;  %v2140_v39 = vrot.slane %v2138_v29, 5  ;;  %v342_v43 = vshll.u32 %v264_v21, 16  ;;  %v5736_v61 = vld [vmem:[%s7591_s26 + $0x20] sm:$0x1] }
  0x26   : > { %v2125_v40 = vor.u32 %v2124_v33, %v2121_v32  ;;  %v341_v42 = vrot.slane %v339_v35, 4  ;;  %v348_v44 = vshll.u32 %v265_v30, 16  ;;  %v2135_v47 = vor.u32 %v2134_v38, %v2130_v34  ;;  %v266_v4 = vld [vmem:[%s7591_s26 + $0x18] sm:$0xf]  ;;  %v267_v14 = vld [vmem:[%s7591_s26 + $0x1c] sm:$0xf] }
  0x27   : > { %v327_v45 = vsel %vm7603_vm4, %v322_v36, %v326_v19  ;;  %v337_v46 = vsel %vm7603_vm4, %v332_v37, %v336_v22  ;;  %v352_v48 = vshrl.u32 %v265_v30, 16  ;;  %v344_v52 = vrot.slane %v342_v43, 5  ;;  %v297_v16 = vld [vmem:[%s7591_s26 + $0x20] sm:$0x1]  ;;  %v5737_v23 = vld [vmem:[%s7591_s26 + $0x24] sm:$0xf] }
  0x28   : > { %v5553_v50 = vcombine.low %v327_v45, %v337_v46  ;;  %v2126_v51 = vrot.slane %v2125_v40, 4  ;;  %v350_v53 = vrot.slane %v348_v44, 5  ;;  %v2136_v54 = vrot.slane %v2135_v47, 4  ;;  %v5738_v33 = vld [vmem:[%s7591_s26 + $0x28] sm:$0xf] }
  0x29   : > { %v354_v55 = vrot.slane %v352_v48, 4  ;;  %v358_v56 = vshll.u32 %v296_v41, 16  ;;  %v345_v60 = vor.u32 %v344_v52, %v341_v42  ;;  %v2143_v62 = vshrl.u32 %v5734_v49, 16  ;;  %v5739_v36 = vld [vmem:[%s7591_s26 + $0x2c] sm:$0x1] }
  0x2a   : > { %6638 = vmatprep.mubr.msk.bf16.mxu1 %vm748_vm3, %v5553_v50  ;;  %v2131_v59 = vsel %vm7603_vm4, %v2126_v51, %v2130_v34  ;;  %v2141_v0 = vsel %vm7603_vm4, %v2136_v54, %v2140_v39  ;;  %v2146_v3 = vshll.u32 %v5734_v49, 16  ;;  %v2152_v9 = vshll.u32 %v5735_v57, 16  ;;  %v268_v47 = vld [vmem:[%s7591_s26 + $0x24] sm:$0xf]  ;;  %v269_v52 = vld [vmem:[%s7591_s26 + $0x28] sm:$0xf] }
  0x2b   : > { %v355_v1 = vor.u32 %v354_v55, %v350_v53  ;;  %v360_v2 = vrot.slane %v358_v56, 5  ;;  %v7626_v6 = vcombine.low %v2131_v59, %v2141_v0  ;;  %v346_v7 = vrot.slane %v345_v60, 4  ;;  %v7381_v31 = vld [vmem:[%s7591_s26 + $0x2c] sm:$0x1] }
  0x2c   : > { %v2145_v8 = vrot.slane %v2143_v62, 4  ;;  %v2148_v11 = vrot.slane %v2146_v3, 5  ;;  %v2156_v12 = vshrl.u32 %v5735_v57, 16  ;;  %v2162_v13 = vshll.u32 %v5736_v61, 16  ;;  %v298_v57 = vld [vmem:[%s7591_s26 + $0x2c] sm:$0x1] }
  0x2d   : > { %9526 = vst [vmem:[#allocation8_spill] sm:$0xff] %v7626_v6  ;;  %v356_v10 = vrot.slane %v355_v1, 4  ;;  %6774 = vmatprep.mubr.msk.bf16.mxu0 %vm748_vm3, %v7626_v6  ;;  %v351_v5 = vsel %vm7603_vm4, %v346_v7, %v350_v53  ;;  %v2154_v15 = vrot.slane %v2152_v9, 5  ;;  %v363_v17 = vshrl.u32 %v266_v4, 16  ;;  %v5740_v3 = vld [vmem:[%s7591_s26 + $0x30] sm:$0xf] }
  0x2e   : > { %v366_v18 = vshll.u32 %v266_v4, 16  ;;  %v2149_v20 = vor.u32 %v2148_v11, %v2145_v8  ;;  %v2158_v21 = vrot.slane %v2156_v12, 4  ;;  %v2164_v22 = vrot.slane %v2162_v13, 5 }
  0x2f   : > { %v361_v19 = vsel %vm7603_vm4, %v356_v10, %v360_v2  ;;  %v365_v25 = vrot.slane %v363_v17, 4  ;;  %v372_v27 = vshll.u32 %v267_v14, 16  ;;  %v376_v30 = vshrl.u32 %v267_v14, 16  ;;  %v5741_v10 = vld [vmem:[%s7591_s26 + $0x34] sm:$0xf] }
  0x30   : > { %v5554_v24 = vcombine.low %v351_v5, %v361_v19  ;;  %v368_v26 = vrot.slane %v366_v18, 5  ;;  %v2150_v28 = vrot.slane %v2149_v20, 4  ;;  %v2159_v29 = vor.u32 %v2158_v21, %v2154_v15  ;;  %v5742_v5 = vld [vmem:[%s7591_s26 + $0x38] sm:$0x1] }
  0x31   : > { %v382_v32 = vshll.u32 %v297_v16, 16  ;;  %v374_v35 = vrot.slane %v372_v27, 5  ;;  %v2167_v37 = vshrl.u32 %v5737_v23, 16  ;;  %v2170_v38 = vshll.u32 %v5737_v23, 16  ;;  %v271_v27 = vld [vmem:[%s7591_s26 + $0x34] sm:$0xf] }
  0x32   : > { %6639 = vmatmul.mubr.msk.bf16.vlgmr.msra.gmra.mrb[0].mxu1 %vm748_vm3, %v5554_v24  ;;  %v369_v34 = vor.u32 %v368_v26, %v365_v25  ;;  %v2155_v39 = vsel %vm7603_vm4, %v2150_v28, %v2154_v15  ;;  %v2160_v40 = vrot.slane %v2159_v29, 4  ;;  %v378_v41 = vrot.slane %v376_v30, 4 }
  0x33   : > { %6671 = vmatpush3.bf16.msra.mxu1 %v1091_v63  ;;  %v384_v42 = vrot.slane %v382_v32, 5  ;;  %v2169_v44 = vrot.slane %v2167_v37, 4  ;;  %v2172_v45 = vrot.slane %v2170_v38, 5  ;;  %v2176_v46 = vshll.u32 %v5738_v33, 16 }
  0x34   : > { %v370_v43 = vrot.slane %v369_v34, 4  ;;  %v2165_v48 = vsel %vm7603_vm4, %v2160_v40, %v2164_v22  ;;  %v379_v49 = vor.u32 %v378_v41, %v374_v35  ;;  %v2180_v50 = vshrl.u32 %v5738_v33, 16  ;;  %v270_v22 = vld [vmem:[%s7591_s26 + $0x30] sm:$0xf] }
  0x35   : > { %v2186_v51 = vshll.u32 %v5739_v36, 16  ;;  %v7646_v53 = vcombine.low %v2155_v39, %v2165_v48  ;;  %v2173_v55 = vor.u32 %v2172_v45, %v2169_v44  ;;  %v2178_v56 = vrot.slane %v2176_v46, 5  ;;  %v299_v39 = vld [vmem:[%s7591_s26 + $0x38] sm:$0x1] }
  0x36   : > { %v375_v54 = vsel %vm7603_vm4, %v370_v43, %v374_v35  ;;  %v380_v59 = vrot.slane %v379_v49, 4  ;;  %v2182_v60 = vrot.slane %v2180_v50, 4  ;;  %v387_v62 = vshrl.u32 %v268_v47, 16 }
  0x37   : > { %9527 = vst [vmem:[#allocation9_spill] sm:$0xff] %v7646_v53  ;;  %v2188_v61 = vrot.slane %v2186_v51, 5  ;;  %6775 = vmatmul.mubr.msk.bf16.vlgmr.msra.gmra.mrb[0].mxu0 %vm748_vm3, %v7646_v53  ;;  %v2174_v63 = vrot.slane %v2173_v55, 4  ;;  %v390_v0 = vshll.u32 %v268_v47, 16  ;;  %v396_v1 = vshll.u32 %v269_v52, 16 }
  0x38   : > { %v400_v2 = vshrl.u32 %v269_v52, 16  ;;  %6841 = vmatpush3.bf16.msra.mxu0 %v7615_v58  ;;  %v385_v4 = vsel %vm7603_vm4, %v380_v59, %v384_v42  ;;  %v2183_v7 = vor.u32 %v2182_v60, %v2178_v56  ;;  %v389_v8 = vrot.slane %v387_v62, 4  ;;  %v5743_v42 = vld [vmem:[%s7591_s26 + $0x3c] sm:$0xf]  ;;  %v5744_v47 = vld [vmem:[%s7591_s26 + $0x40] sm:$0xf] }
  0x39   : > { %v406_v9 = vshll.u32 %v298_v57, 16  ;;  %v5555_v11 = vcombine.low %v375_v54, %v385_v4  ;;  %v2179_v12 = vsel %vm7603_vm4, %v2174_v63, %v2178_v56  ;;  %v392_v13 = vrot.slane %v390_v0, 5  ;;  %v5745_v60 = vld [vmem:[%s7591_s26 + $0x44] sm:$0x1]  ;;  %v272_v63 = vld [vmem:[%s7591_s26 + $0x3c] sm:$0xf] }
  0x3a   : > { %v398_v14 = vrot.slane %v396_v1, 5  ;;  %v2184_v15 = vrot.slane %v2183_v7, 4  ;;  %v402_v16 = vrot.slane %v400_v2, 4  ;;  %v2191_v58 = vshrl.u32 %v5740_v3, 16  ;;  %v273_v4 = vld [vmem:[%s7591_s26 + $0x40] sm:$0xf] }
  0x3b   : > { %v408_v17 = vrot.slane %v406_v9, 5  ;;  %6642 = vmatprep.mubr.msk.bf16.mxu1 %vm748_vm3, %v5555_v11  ;;  %v393_v18 = vor.u32 %v392_v13, %v389_v8  ;;  %v2194_v19 = vshll.u32 %v5740_v3, 16  ;;  %v2200_v20 = vshll.u32 %v5741_v10, 16 }
  0x3c   : > { %v2204_v21 = vshrl.u32 %v5741_v10, 16  ;;  %v2189_v23 = vsel %vm7603_vm4, %v2184_v15, %v2188_v61  ;;  %v403_v24 = vor.u32 %v402_v16, %v398_v14  ;;  %v2193_v25 = vrot.slane %v2191_v58, 4  ;;  %v300_v16 = vld [vmem:[%s7591_s26 + $0x44] sm:$0x1] }
  0x3d   : > { %v2210_v26 = vshll.u32 %v5742_v5, 16  ;;  %v7666_v28 = vcombine.low %v2179_v12, %v2189_v23  ;;  %v394_v29 = vrot.slane %v393_v18, 4  ;;  %v2196_v30 = vrot.slane %v2194_v19, 5  ;;  %v5746_v18 = vld [vmem:[%s7591_s26 + $0x48] sm:$0xf] }
  0x3e   : > { %v2202_v32 = vrot.slane %v2200_v20, 5  ;;  %v404_v33 = vrot.slane %v403_v24, 4  ;;  %v2206_v34 = vrot.slane %v2204_v21, 4  ;;  %v411_v36 = vshrl.u32 %v270_v22, 16  ;;  %v5747_v23 = vld [vmem:[%s7591_s26 + $0x4c] sm:$0xf] }
  0x3f   : > { %9528 = vst [vmem:[#allocation10_spill] sm:$0xff] %v7666_v28  ;;  %v2212_v35 = vrot.slane %v2210_v26, 5  ;;  %6778 = vmatprep.mubr.msk.bf16.mxu0 %vm748_vm3, %v7666_v28  ;;  %v399_v37 = vsel %vm7603_vm4, %v394_v29, %v398_v14  ;;  %v2197_v38 = vor.u32 %v2196_v30, %v2193_v25  ;;  %v414_v40 = vshll.u32 %v270_v22, 16  ;;  %v8615_v28 = vld [vmem:[%s7591_s26 + $0x74] sm:$0x1] }
  0x40   : > { %v420_v41 = vshll.u32 %v271_v27, 16  ;;  %v409_v43 = vsel %vm7603_vm4, %v404_v33, %v408_v17  ;;  %v2207_v44 = vor.u32 %v2206_v34, %v2202_v32  ;;  %v413_v45 = vrot.slane %v411_v36, 4  ;;  %v5748_v36 = vld [vmem:[%s7591_s26 + $0x50] sm:$0x1] }
  0x41   : > { %v424_v46 = vshrl.u32 %v271_v27, 16  ;;  %v5556_v48 = vcombine.low %v399_v37, %v409_v43  ;;  %v2198_v49 = vrot.slane %v2197_v38, 4  ;;  %v416_v50 = vrot.slane %v414_v40, 5 }
  0x42   : > { %v422_v51 = vrot.slane %v420_v41, 5  ;;  %v2208_v52 = vrot.slane %v2207_v44, 4  ;;  %v430_v55 = vshll.u32 %v299_v39, 16  ;;  %v2215_v56 = vshrl.u32 %v5743_v42, 16  ;;  %v274_v39 = vld [vmem:[%s7591_s26 + $0x48] sm:$0xf] }
  0x43   : > { %v426_v54 = vrot.slane %v424_v46, 4  ;;  %6643 = vmatmul.mubr.msk.bf16.gmra.mrb[4].mxu1 %vm748_vm3, %v5556_v48  ;;  %v2203_v57 = vsel %vm7603_vm4, %v2198_v49, %v2202_v32  ;;  %v417_v59 = vor.u32 %v416_v50, %v413_v45  ;;  %v2218_v61 = vshll.u32 %v5743_v42, 16 }
  0x44   : > { %v2224_v62 = vshll.u32 %v5744_v47, 16  ;;  %v2213_v0 = vsel %vm7603_vm4, %v2208_v52, %v2212_v35  ;;  %v432_v2 = vrot.slane %v430_v55, 5  ;;  %v2217_v3 = vrot.slane %v2215_v56, 4 }
  0x45   : > { %v427_v1 = vor.u32 %v426_v54, %v422_v51  ;;  %v7685_v7 = vcombine.low %v2203_v57, %v2213_v0  ;;  %v418_v8 = vrot.slane %v417_v59, 4  ;;  %v2220_v9 = vrot.slane %v2218_v61, 5  ;;  %v301_v59 = vld [vmem:[%s7591_s26 + $0x50] sm:$0x1] }
  0x46   : > { %v2226_v10 = vrot.slane %v2224_v62, 5  ;;  %v2228_v12 = vshrl.u32 %v5744_v47, 16  ;;  %v2234_v13 = vshll.u32 %v5745_v60, 16  ;;  %v435_v14 = vshrl.u32 %v272_v63, 16  ;;  %v5749_v60 = vld [vmem:[%s7591_s26 + $0x54] sm:$0xf] }
  0x47   : > { %9529 = vst [vmem:[#allocation11_spill] sm:$0xff] %v7685_v7  ;;  %v428_v11 = vrot.slane %v427_v1, 4  ;;  %6779 = vmatmul.mubr.msk.bf16.gmra.mrb[4].mxu0 %vm748_vm3, %v7685_v7  ;;  %v423_v5 = vsel %vm7603_vm4, %v418_v8, %v422_v51  ;;  %v2221_v15 = vor.u32 %v2220_v9, %v2217_v3  ;;  %v438_v17 = vshll.u32 %v272_v63, 16  ;;  %v275_v51 = vld [vmem:[%s7591_s26 + $0x4c] sm:$0xf] }
  0x48   : > { %v444_v58 = vshll.u32 %v273_v4, 16  ;;  %v2230_v20 = vrot.slane %v2228_v12, 4  ;;  %v2236_v21 = vrot.slane %v2234_v13, 5  ;;  %v437_v22 = vrot.slane %v435_v14, 4 }
  0x49   : > { %v433_v19 = vsel %vm7603_vm4, %v428_v11, %v432_v2  ;;  %v2222_v25 = vrot.slane %v2221_v15, 4  ;;  %v440_v26 = vrot.slane %v438_v17, 5  ;;  %v448_v30 = vshrl.u32 %v273_v4, 16  ;;  %v5750_v11 = vld [vmem:[%s7591_s26 + $0x58] sm:$0xf] }
  0x4a   : > { %v5557_v24 = vcombine.low %v423_v5, %v433_v19  ;;  %v446_v27 = vrot.slane %v444_v58, 5  ;;  %v2231_v29 = vor.u32 %v2230_v20, %v2226_v10  ;;  %v454_v32 = vshll.u32 %v300_v16, 16  ;;  %v5751_v16 = vld [vmem:[%s7591_s26 + $0x5c] sm:$0x1]  ;;  %v276_v20 = vld [vmem:[%s7591_s26 + $0x54] sm:$0xf] }
  0x4b   : > { %v2239_v33 = vshrl.u32 %v5746_v18, 16  ;;  %v2227_v34 = vsel %vm7603_vm4, %v2222_v25, %v2226_v10  ;;  %v441_v35 = vor.u32 %v440_v26, %v437_v22  ;;  %v2242_v37 = vshll.u32 %v5746_v18, 16 }
  0x4c   : > { %6646 = vmatprep.mubr.msk.bf16.mxu1 %vm748_vm3, %v5557_v24  ;;  %v2248_v38 = vshll.u32 %v5747_v23, 16  ;;  %v2232_v40 = vrot.slane %v2231_v29, 4  ;;  %v450_v41 = vrot.slane %v448_v30, 4  ;;  %v456_v42 = vrot.slane %v454_v32, 5  ;;  %v277_v30 = vld [vmem:[%s7591_s26 + $0x58] sm:$0xf] }
  0x4d   : > { %v2241_v43 = vrot.slane %v2239_v33, 4  ;;  %v442_v44 = vrot.slane %v441_v35, 4  ;;  %v2244_v45 = vrot.slane %v2242_v37, 5  ;;  %v2252_v47 = vshrl.u32 %v5747_v23, 16  ;;  %v302_v35 = vld [vmem:[%s7591_s26 + $0x5c] sm:$0x1] }
  0x4e   : > { %v2250_v46 = vrot.slane %v2248_v38, 5  ;;  %v2237_v48 = vsel %vm7603_vm4, %v2232_v40, %v2236_v21  ;;  %v451_v49 = vor.u32 %v450_v41, %v446_v27  ;;  %v2258_v50 = vshll.u32 %v5748_v36, 16 }
  0x4f   : > { %v459_v52 = vshrl.u32 %v274_v39, 16  ;;  %v7704_v54 = vcombine.low %v2227_v34, %v2237_v48  ;;  %v447_v55 = vsel %vm7603_vm4, %v442_v44, %v446_v27  ;;  %v2245_v56 = vor.u32 %v2244_v45, %v2241_v43  ;;  %v5752_v45 = vld [vmem:[%s7591_s26 + $0x60] sm:$0xf] }
  0x50   : > { %v2254_v57 = vrot.slane %v2252_v47, 4  ;;  %v452_v61 = vrot.slane %v451_v49, 4  ;;  %v2260_v62 = vrot.slane %v2258_v50, 5  ;;  %v462_v0 = vshll.u32 %v274_v39, 16  ;;  %v5753_v50 = vld [vmem:[%s7591_s26 + $0x64] sm:$0xf] }
  0x51   : > { %9530 = vst [vmem:[#allocation12_spill] sm:$0xff] %v7704_v54  ;;  %v461_v63 = vrot.slane %v459_v52, 4  ;;  %6782 = vmatprep.mubr.msk.bf16.mxu0 %vm748_vm3, %v7704_v54  ;;  %v2246_v1 = vrot.slane %v2245_v56, 4  ;;  %v468_v3 = vshll.u32 %v275_v51, 16  ;;  %v472_v4 = vshrl.u32 %v275_v51, 16 }
  0x52   : > { %v2255_v2 = vor.u32 %v2254_v57, %v2250_v46  ;;  %v457_v8 = vsel %vm7603_vm4, %v452_v61, %v456_v42  ;;  %v464_v9 = vrot.slane %v462_v0, 5  ;;  %v478_v10 = vshll.u32 %v301_v59, 16  ;;  %v5754_v61 = vld [vmem:[%s7591_s26 + $0x68] sm:$0x1] }
  0x53   : > { %v2263_v12 = vshrl.u32 %v5749_v60, 16  ;;  %v5558_v13 = vcombine.low %v447_v55, %v457_v8  ;;  %v2251_v14 = vsel %vm7603_vm4, %v2246_v1, %v2250_v46  ;;  %v470_v15 = vrot.slane %v468_v3, 5  ;;  %v278_v3 = vld [vmem:[%s7591_s26 + $0x60] sm:$0xf] }
  0x54   : > { %v2256_v5 = vrot.slane %v2255_v2, 4  ;;  %v465_v17 = vor.u32 %v464_v9, %v461_v63  ;;  %v474_v58 = vrot.slane %v472_v4, 4  ;;  %v480_v18 = vrot.slane %v478_v10, 5 }
  0x55   : > { %v2265_v19 = vrot.slane %v2263_v12, 4  ;;  %6647 = vmatmul.mubr.msk.bf16.gmra.mrb[8].mxu1 %vm748_vm3, %v5558_v13  ;;  %v2266_v22 = vshll.u32 %v5749_v60, 16  ;;  %v2272_v23 = vshll.u32 %v5750_v11, 16  ;;  %v2276_v24 = vshrl.u32 %v5750_v11, 16  ;;  %v279_v11 = vld [vmem:[%s7591_s26 + $0x64] sm:$0xf] }
  0x56   : > { %v2261_v21 = vsel %vm7603_vm4, %v2256_v5, %v2260_v62  ;;  %v466_v26 = vrot.slane %v465_v17, 4  ;;  %v475_v27 = vor.u32 %v474_v58, %v470_v15  ;;  %v2282_v29 = vshll.u32 %v5751_v16, 16  ;;  %v303_v17 = vld [vmem:[%s7591_s26 + $0x68] sm:$0x1] }
  0x57   : > { %v7722_v25 = vcombine.low %v2251_v14, %v2261_v21  ;;  %v2268_v32 = vrot.slane %v2266_v22, 5  ;;  %v2274_v33 = vrot.slane %v2272_v23, 5  ;;  %v2278_v34 = vrot.slane %v2276_v24, 4  ;;  %v5755_v23 = vld [vmem:[%s7591_s26 + $0x6c] sm:$0xf] }
  0x58   : > { %v483_v36 = vshrl.u32 %v276_v20, 16  ;;  %v471_v37 = vsel %vm7603_vm4, %v466_v26, %v470_v15  ;;  %v476_v38 = vrot.slane %v475_v27, 4  ;;  %v2284_v39 = vrot.slane %v2282_v29, 5 }
  0x59   : > { %9531 = vst [vmem:[#allocation13_spill] sm:$0xff] %v7722_v25  ;;  %6783 = vmatmul.mubr.msk.bf16.gmra.mrb[8].mxu0 %vm748_vm3, %v7722_v25  ;;  %v486_v40 = vshll.u32 %v276_v20, 16  ;;  %v2269_v41 = vor.u32 %v2268_v32, %v2265_v19  ;;  %v2279_v42 = vor.u32 %v2278_v34, %v2274_v33  ;;  %v492_v44 = vshll.u32 %v277_v30, 16 }
  0x5a   : > { %v485_v43 = vrot.slane %v483_v36, 4  ;;  %v481_v46 = vsel %vm7603_vm4, %v476_v38, %v480_v18  ;;  %v496_v48 = vshrl.u32 %v277_v30, 16  ;;  %v502_v49 = vshll.u32 %v302_v35, 16  ;;  %v5756_v30 = vld [vmem:[%s7591_s26 + $0x70] sm:$0xf] }
  0x5b   : > { %v488_v47 = vrot.slane %v486_v40, 5  ;;  %v5559_v51 = vcombine.low %v471_v37, %v481_v46  ;;  %v2270_v52 = vrot.slane %v2269_v41, 4  ;;  %v2280_v55 = vrot.slane %v2279_v42, 4 }
  0x5c   : > { %v494_v56 = vrot.slane %v492_v44, 5  ;;  %v498_v59 = vrot.slane %v496_v48, 4  ;;  %v504_v60 = vrot.slane %v502_v49, 5  ;;  %v2287_v62 = vshrl.u32 %v5752_v45, 16 }
  0x5d   : > { %v489_v57 = vor.u32 %v488_v47, %v485_v43  ;;  %6650 = vmatprep.mubr.msk.bf16.mxu1 %vm748_vm3, %v5559_v51  ;;  %v2275_v63 = vsel %vm7603_vm4, %v2270_v52, %v2274_v33  ;;  %v2285_v0 = vsel %vm7603_vm4, %v2280_v55, %v2284_v39  ;;  %v2290_v1 = vshll.u32 %v5752_v45, 16  ;;  %v5757_v39 = vld [vmem:[%s7591_s26 + $0x74] sm:$0x1]  ;;  %v7760_v45 = vld [vmem:[%s9490_s1 + $0xc] sm:$0x3] }
  0x5e   : > { %v2296_v2 = vshll.u32 %v5753_v50, 16  ;;  %v7741_v4 = vcombine.low %v2275_v63, %v2285_v0  ;;  %v499_v9 = vor.u32 %v498_v59, %v494_v56  ;;  %v2289_v10 = vrot.slane %v2287_v62, 4  ;;  %7239 = vmatprep.subr.msk.bf16.mxu0 %vm797_vm0, %v7760_v45  ;;  %v7777_v63 = vld [vmem:[%s9490_s1 + $0x4] sm:$0x3] }
  0x5f   : > { %v490_v8 = vrot.slane %v489_v57, 4  ;;  %v2292_v12 = vrot.slane %v2290_v1, 5  ;;  %v2300_v14 = vshrl.u32 %v5753_v50, 16  ;;  %v2306_v5 = vshll.u32 %v5754_v61, 16  ;;  %v280_v50 = vld [vmem:[%s7591_s26 + $0x6c] sm:$0xf]  ;;  %7234 = vmatprep.subr.msk.bf16.mxu1 %vm797_vm0, %v7777_v63 }
  0x60   : > { %9532 = vst [vmem:[#allocation14_spill] sm:$0xff] %v7741_v4  ;;  %v2298_v13 = vrot.slane %v2296_v2, 5  ;;  %6786 = vmatprep.mubr.msk.bf16.mxu0 %vm748_vm3, %v7741_v4  ;;  %v500_v16 = vrot.slane %v499_v9, 4  ;;  %v507_v58 = vshrl.u32 %v278_v3, 16  ;;  %v510_v18 = vshll.u32 %v278_v3, 16 }
  0x61   : > { %v495_v15 = vsel %vm7603_vm4, %v490_v8, %v494_v56  ;;  %v2293_v19 = vor.u32 %v2292_v12, %v2289_v10  ;;  %v2302_v20 = vrot.slane %v2300_v14, 4  ;;  %v2308_v21 = vrot.slane %v2306_v5, 5  ;;  %v7768_v57 = vld [vmem:[%s7591_s26 + $0x70] sm:$0xf]  ;;  %v304_v2 = vld [vmem:[%s7591_s26 + $0x74] sm:$0x1] }
  0x62   : > { %v516_v22 = vshll.u32 %v279_v11, 16  ;;  %v505_v24 = vsel %vm7603_vm4, %v500_v16, %v504_v60  ;;  %v509_v26 = vrot.slane %v507_v58, 4  ;;  %v512_v27 = vrot.slane %v510_v18, 5 }
  0x63   : > { %v520_v29 = vshrl.u32 %v279_v11, 16  ;;  %v5560_v32 = vcombine.low %v495_v15, %v505_v24  ;;  %v2294_v33 = vrot.slane %v2293_v19, 4  ;;  %v2303_v34 = vor.u32 %v2302_v20, %v2298_v13 }
  0x64   : > { %v518_v35 = vrot.slane %v516_v22, 5  ;;  %v513_v36 = vor.u32 %v512_v27, %v509_v26  ;;  %v526_v38 = vshll.u32 %v303_v17, 16  ;;  %v2311_v40 = vshrl.u32 %v5755_v23, 16  ;;  %v5759_v17 = vld [vmem:[%s7591_s26 + $0x7c] sm:$0xf] }
  0x65   : > { %v522_v37 = vrot.slane %v520_v29, 4  ;;  %6651 = vmatmul.mubr.msk.bf16.gmra.mrb[12].mxu1 %vm748_vm3, %v5560_v32  ;;  %v2299_v41 = vsel %vm7603_vm4, %v2294_v33, %v2298_v13  ;;  %v2304_v42 = vrot.slane %v2303_v34, 4  ;;  %v2314_v43 = vshll.u32 %v5755_v23, 16  ;;  %v5758_v13 = vld [vmem:[%s7591_s26 + $0x78] sm:$0xf] }
  0x66   : > { %v2320_v44 = vshll.u32 %v5756_v30, 16  ;;  %v514_v46 = vrot.slane %v513_v36, 4  ;;  %v528_v48 = vrot.slane %v526_v38, 5  ;;  %v2313_v49 = vrot.slane %v2311_v40, 4  ;;  %v7795_v33 = vld [vmem:[%s7591_s26 + $0x78] sm:$0xf] }
  0x67   : > { %v523_v47 = vor.u32 %v522_v37, %v518_v35  ;;  %v2309_v51 = vsel %vm7603_vm4, %v2304_v42, %v2308_v21  ;;  %v2316_v52 = vrot.slane %v2314_v43, 5  ;;  %v2324_v56 = vshrl.u32 %v5756_v30, 16  ;;  %v5760_v30 = vld [vmem:[%s7591_s26 + $0x80] sm:$0x1]  ;;  %v7800_v38 = vld [vmem:[%s7591_s26 + $0x7c] sm:$0xf] }
  0x68   : > { %v2322_v55 = vrot.slane %v2320_v44, 5  ;;  %v7770_v59 = vcombine.low %v2299_v41, %v2309_v51  ;;  %v519_v60 = vsel %vm7603_vm4, %v514_v46, %v518_v35  ;;  %v2330_v62 = vshll.u32 %v5757_v39, 16 }
  0x69   : > { %v524_v61 = vrot.slane %v523_v47, 4  ;;  %v2317_v0 = vor.u32 %v2316_v52, %v2313_v49  ;;  %v2326_v1 = vrot.slane %v2324_v56, 4  ;;  %v531_v3 = vshrl.u32 %v280_v50, 16 }
  0x6a   : > { %9533 = vst [vmem:[#allocation15_spill] sm:$0xff] %v7770_v59  ;;  %v534_v8 = vshll.u32 %v280_v50, 16  ;;  %6787 = vmatmul.mubr.msk.bf16.gmra.mrb[12].mxu0 %vm748_vm3, %v7770_v59  ;;  %v2332_v10 = vrot.slane %v2330_v62, 5  ;;  %v540_v11 = vshll.u32 %v7768_v57, 16  ;;  %v544_v12 = vshrl.u32 %v7768_v57, 16 }
  0x6b   : > { %v529_v9 = vsel %vm7603_vm4, %v524_v61, %v528_v48  ;;  %v2318_v5 = vrot.slane %v2317_v0, 4  ;;  %v2327_v15 = vor.u32 %v2326_v1, %v2322_v55  ;;  %v533_v16 = vrot.slane %v531_v3, 4  ;;  %v305_v50 = vld [vmem:[%s7591_s26 + $0x80] sm:$0x1]  ;;  %v5762_v0 = vld [vmem:[%s7591_s26 + $0x88] sm:$0xf] }
  0x6c   : > { %v5561_v14 = vcombine.low %v519_v60, %v529_v9  ;;  %v536_v58 = vrot.slane %v534_v8, 5  ;;  %v542_v18 = vrot.slane %v540_v11, 5  ;;  %v546_v19 = vrot.slane %v544_v12, 4  ;;  %v5763_v12 = vld [vmem:[%s7591_s26 + $0x8c] sm:$0x1] }
  0x6d   : > { %v550_v20 = vshll.u32 %v304_v2, 16  ;;  %v2323_v21 = vsel %vm7603_vm4, %v2318_v5, %v2322_v55  ;;  %v2328_v22 = vrot.slane %v2327_v15, 4  ;;  %v2335_v23 = vshrl.u32 %v5758_v13, 16  ;;  %v5761_v55 = vld [vmem:[%s7591_s26 + $0x84] sm:$0xf] }
  0x6e   : > { %6654 = vmatprep.mubr.msk.bf16.mxu1 %vm748_vm3, %v5561_v14  ;;  %v2338_v24 = vshll.u32 %v5758_v13, 16  ;;  %v537_v26 = vor.u32 %v536_v58, %v533_v16  ;;  %v547_v27 = vor.u32 %v546_v19, %v542_v18  ;;  %v2344_v32 = vshll.u32 %v5759_v17, 16  ;;  %v8586_v59 = vld [vmem:[%s7591_s26 + $0x7c] sm:$0xf] }
  0x6f   : > { %v552_v29 = vrot.slane %v550_v20, 5  ;;  %v2333_v34 = vsel %vm7603_vm4, %v2328_v22, %v2332_v10  ;;  %v2337_v35 = vrot.slane %v2335_v23, 4  ;;  %v2348_v37 = vshrl.u32 %v5759_v17, 16  ;;  %v7822_v17 = vld [vmem:[%s7591_s26 + $0x84] sm:$0xf] }
  0x70   : > { %v2340_v36 = vrot.slane %v2338_v24, 5  ;;  %v7802_v39 = vcombine.low %v2323_v21, %v2333_v34  ;;  %v538_v40 = vrot.slane %v537_v26, 4  ;;  %v548_v41 = vrot.slane %v547_v27, 4  ;;  %v7829_v26 = vld [vmem:[%s7591_s26 + $0x88] sm:$0xf] }
  0x71   : > { %v2346_v42 = vrot.slane %v2344_v32, 5  ;;  %v2350_v44 = vrot.slane %v2348_v37, 4  ;;  %v2354_v46 = vshll.u32 %v5760_v30, 16  ;;  %v555_v47 = vshrl.u32 %v7795_v33, 16  ;;  %v306_v37 = vld [vmem:[%s7591_s26 + $0x8c] sm:$0x1] }
  0x72   : > { %9534 = vst [vmem:[#allocation16_spill] sm:$0xff] %v7802_v39  ;;  %v2341_v43 = vor.u32 %v2340_v36, %v2337_v35  ;;  %6790 = vmatprep.mubr.msk.bf16.mxu0 %vm748_vm3, %v7802_v39  ;;  %v543_v48 = vsel %vm7603_vm4, %v538_v40, %v542_v18  ;;  %v553_v49 = vsel %vm7603_vm4, %v548_v41, %v552_v29  ;;  %v558_v51 = vshll.u32 %v7795_v33, 16 }
  0x73   : > { %v564_v52 = vshll.u32 %v7800_v38, 16  ;;  %v5562_v56 = vcombine.low %v543_v48, %v553_v49  ;;  %v2351_v61 = vor.u32 %v2350_v44, %v2346_v42  ;;  %v2356_v62 = vrot.slane %v2354_v46, 5  ;;  %v5764_v46 = vld [vmem:[%s7591_s26 + $0x90] sm:$0xf] }
  0x74   : > { %v2342_v60 = vrot.slane %v2341_v43, 4  ;;  %v557_v1 = vrot.slane %v555_v47, 4  ;;  %v560_v2 = vrot.slane %v558_v51, 5  ;;  %v568_v8 = vshrl.u32 %v7800_v38, 16  ;;  %v5765_v51 = vld [vmem:[%s7591_s26 + $0x94] sm:$0xf] }
  0x75   : > { %v566_v3 = vrot.slane %v564_v52, 5  ;;  %6655 = vmatmul.mubr.msk.bf16.gmra.mrb[16].mxu1 %vm748_vm3, %v5562_v56  ;;  %v2352_v10 = vrot.slane %v2351_v61, 4  ;;  %v574_v11 = vshll.u32 %v305_v50, 16  ;;  %v2359_v13 = vshrl.u32 %v5761_v55, 16 }
  0x76   : > { %v2347_v9 = vsel %vm7603_vm4, %v2342_v60, %v2346_v42  ;;  %v561_v14 = vor.u32 %v560_v2, %v557_v1  ;;  %v570_v5 = vrot.slane %v568_v8, 4  ;;  %v2362_v15 = vshll.u32 %v5761_v55, 16  ;;  %v5766_v1 = vld [vmem:[%s7591_s26 + $0x98] sm:$0x1] }
  0x77   : > { %v2368_v16 = vshll.u32 %v5762_v0, 16  ;;  %v2357_v58 = vsel %vm7603_vm4, %v2352_v10, %v2356_v62  ;;  %v576_v18 = vrot.slane %v574_v11, 5  ;;  %v2361_v19 = vrot.slane %v2359_v13, 4  ;;  %v7851_v11 = vld [vmem:[%s7591_s26 + $0x90] sm:$0xf] }
  0x78   : > { %v2372_v20 = vshrl.u32 %v5762_v0, 16  ;;  %v7826_v21 = vcombine.low %v2347_v9, %v2357_v58  ;;  %v562_v22 = vrot.slane %v561_v14, 4  ;;  %v571_v23 = vor.u32 %v570_v5, %v566_v3 }
  0x79   : > { %v2364_v24 = vrot.slane %v2362_v15, 5  ;;  %v2370_v27 = vrot.slane %v2368_v16, 5  ;;  %v2378_v30 = vshll.u32 %v5763_v12, 16  ;;  %v579_v32 = vshrl.u32 %v7822_v17, 16  ;;  %v7856_v15 = vld [vmem:[%s7591_s26 + $0x94] sm:$0xf] }
  0x7a   : > { %9535 = vst [vmem:[#allocation17_spill] sm:$0xff] %v7826_v21  ;;  %v2374_v29 = vrot.slane %v2372_v20, 4  ;;  %6791 = vmatmul.mubr.msk.bf16.gmra.mrb[16].mxu0 %vm748_vm3, %v7826_v21  ;;  %v567_v34 = vsel %vm7603_vm4, %v562_v22, %v566_v3  ;;  %v572_v35 = vrot.slane %v571_v23, 4  ;;  %v582_v40 = vshll.u32 %v7822_v17, 16  ;;  %v307_v23 = vld [vmem:[%s7591_s26 + $0x98] sm:$0x1] }
  0x7b   : > { %v2365_v36 = vor.u32 %v2364_v24, %v2361_v19  ;;  %v2380_v42 = vrot.slane %v2378_v30, 5  ;;  %v581_v43 = vrot.slane %v579_v32, 4  ;;  %v588_v44 = vshll.u32 %v7829_v26, 16 }
  0x7c   : > { %v2375_v41 = vor.u32 %v2374_v29, %v2370_v27  ;;  %v577_v47 = vsel %vm7603_vm4, %v572_v35, %v576_v18  ;;  %v584_v49 = vrot.slane %v582_v40, 5  ;;  %v592_v50 = vshrl.u32 %v7829_v26, 16  ;;  %v5767_v35 = vld [vmem:[%s7591_s26 + $0x9c] sm:$0xf] }
  0x7d   : > { %v2366_v48 = vrot.slane %v2365_v36, 4  ;;  %v5563_v52 = vcombine.low %v567_v34, %v577_v47  ;;  %v590_v56 = vrot.slane %v588_v44, 5  ;;  %v598_v60 = vshll.u32 %v306_v37, 16 }
  0x7e   : > { %v2376_v55 = vrot.slane %v2375_v41, 4  ;;  %v585_v62 = vor.u32 %v584_v49, %v581_v43  ;;  %v594_v0 = vrot.slane %v592_v50, 4  ;;  %v2383_v2 = vshrl.u32 %v5764_v46, 16 }
  0x7f   : > { %v2371_v61 = vsel %vm7603_vm4, %v2366_v48, %v2370_v27  ;;  %6658 = vmatprep.mubr.msk.bf16.mxu1 %vm748_vm3, %v5563_v52  ;;  %v600_v8 = vrot.slane %v598_v60, 5  ;;  %v2386_v9 = vshll.u32 %v5764_v46, 16  ;;  %v2392_v10 = vshll.u32 %v5765_v51, 16 }
  0x80   : > { %v2381_v3 = vsel %vm7603_vm4, %v2376_v55, %v2380_v42  ;;  %v586_v13 = vrot.slane %v585_v62, 4  ;;  %v595_v14 = vor.u32 %v594_v0, %v590_v56  ;;  %v2385_v5 = vrot.slane %v2383_v2, 4  ;;  %v5768_v42 = vld [vmem:[%s7591_s26 + $0xa0] sm:$0xf] }
  0x81   : > { %v7853_v12 = vcombine.low %v2371_v61, %v2381_v3  ;;  %v2388_v16 = vrot.slane %v2386_v9, 5  ;;  %v2394_v58 = vrot.slane %v2392_v10, 5  ;;  %v2396_v18 = vshrl.u32 %v5765_v51, 16  ;;  %v7876_v3 = vld [vmem:[%s7591_s26 + $0x9c] sm:$0xf] }
  0x82   : > { %v2402_v19 = vshll.u32 %v5766_v1, 16  ;;  %v591_v20 = vsel %vm7603_vm4, %v586_v13, %v590_v56  ;;  %v596_v22 = vrot.slane %v595_v14, 4  ;;  %v603_v24 = vshrl.u32 %v7851_v11, 16  ;;  %v5769_v56 = vld [vmem:[%s7591_s26 + $0xa4] sm:$0x1] }
  0x83   : > { %9536 = vst [vmem:[#allocation18_spill] sm:$0xff] %v7853_v12  ;;  %6794 = vmatprep.mubr.msk.bf16.mxu0 %vm748_vm3, %v7853_v12  ;;  %v606_v27 = vshll.u32 %v7851_v11, 16  ;;  %v2389_v29 = vor.u32 %v2388_v16, %v2385_v5  ;;  %v2398_v30 = vrot.slane %v2396_v18, 4  ;;  %v612_v34 = vshll.u32 %v7856_v15, 16  ;;  %v7881_v14 = vld [vmem:[%s7591_s26 + $0xa0] sm:$0xf] }
  0x84   : > { %v2404_v32 = vrot.slane %v2402_v19, 5  ;;  %v601_v36 = vsel %vm7603_vm4, %v596_v22, %v600_v8  ;;  %v605_v37 = vrot.slane %v603_v24, 4  ;;  %v616_v41 = vshrl.u32 %v7856_v15, 16  ;;  %v308_v19 = vld [vmem:[%s7591_s26 + $0xa4] sm:$0x1] }
  0x85   : > { %v608_v40 = vrot.slane %v606_v27, 5  ;;  %v5564_v43 = vcombine.low %v591_v20, %v601_v36  ;;  %v2390_v44 = vrot.slane %v2389_v29, 4  ;;  %v2399_v46 = vor.u32 %v2398_v30, %v2394_v58  ;;  %v8432_v12 = vld [vmem:[%s7591_s26 + $0x38] sm:$0x1] }
  0x86   : > { %v614_v47 = vrot.slane %v612_v34, 5  ;;  %v618_v49 = vrot.slane %v616_v41, 4  ;;  %v622_v50 = vshll.u32 %v307_v23, 16  ;;  %v2407_v51 = vshrl.u32 %v5767_v35, 16  ;;  %v5770_v34 = vld [vmem:[%s7591_s26 + $0xa8] sm:$0xf] }
  0x87   : > { %v609_v48 = vor.u32 %v608_v40, %v605_v37  ;;  %6659 = vmatmul.mubr.msk.bf16.gmra.mrb[20].mxu1 %vm748_vm3, %v5564_v43  ;;  %v2395_v52 = vsel %vm7603_vm4, %v2390_v44, %v2394_v58  ;;  %v2400_v55 = vrot.slane %v2399_v46, 4  ;;  %v2410_v60 = vshll.u32 %v5767_v35, 16  ;;  %v5771_v41 = vld [vmem:[%s7591_s26 + $0xac] sm:$0xf] }
  0x88   : > { %v2416_v61 = vshll.u32 %v5768_v42, 16  ;;  %v619_v0 = vor.u32 %v618_v49, %v614_v47  ;;  %v624_v1 = vrot.slane %v622_v50, 5  ;;  %v2409_v2 = vrot.slane %v2407_v51, 4 }
  0x89   : > { %v610_v62 = vrot.slane %v609_v48, 4  ;;  %v2405_v8 = vsel %vm7603_vm4, %v2400_v55, %v2404_v32  ;;  %v2412_v9 = vrot.slane %v2410_v60, 5  ;;  %v2420_v13 = vshrl.u32 %v5768_v42, 16 }
  0x8a   : > { %v2418_v10 = vrot.slane %v2416_v61, 5  ;;  %v7883_v5 = vcombine.low %v2395_v52, %v2405_v8  ;;  %v620_v58 = vrot.slane %v619_v0, 4  ;;  %v2426_v18 = vshll.u32 %v5769_v56, 16  ;;  %v7903_v52 = vld [vmem:[%s7591_s26 + $0xa8] sm:$0xf] }
  0x8b   : > { %v615_v16 = vsel %vm7603_vm4, %v610_v62, %v614_v47  ;;  %v2413_v20 = vor.u32 %v2412_v9, %v2409_v2  ;;  %v2422_v22 = vrot.slane %v2420_v13, 4  ;;  %v627_v23 = vshrl.u32 %v7876_v3, 16  ;;  %v5772_v47 = vld [vmem:[%s7591_s26 + $0xb0] sm:$0x1]  ;;  %v7906_v62 = vld [vmem:[%s7591_s26 + $0xac] sm:$0xf] }
  0x8c   : > { %9537 = vst [vmem:[#allocation19_spill] sm:$0xff] %v7883_v5  ;;  %v630_v24 = vshll.u32 %v7876_v3, 16  ;;  %6795 = vmatmul.mubr.msk.bf16.gmra.mrb[20].mxu0 %vm748_vm3, %v7883_v5  ;;  %v625_v27 = vsel %vm7603_vm4, %v620_v58, %v624_v1  ;;  %v2428_v29 = vrot.slane %v2426_v18, 5  ;;  %v636_v30 = vshll.u32 %v7881_v14, 16  ;;  %v309_v58 = vld [vmem:[%s7591_s26 + $0xb0] sm:$0x1] }
  0x8d   : > { %v640_v32 = vshrl.u32 %v7881_v14, 16  ;;  %v5565_v35 = vcombine.low %v615_v16, %v625_v27  ;;  %v2414_v36 = vrot.slane %v2413_v20, 4  ;;  %v2423_v37 = vor.u32 %v2422_v22, %v2418_v10  ;;  %v5773_v18 = vld [vmem:[%s7591_s26 + $0xb4] sm:$0xf] }
  0x8e   : > { %v629_v40 = vrot.slane %v627_v23, 4  ;;  %v632_v42 = vrot.slane %v630_v24, 5  ;;  %v638_v43 = vrot.slane %v636_v30, 5  ;;  %v646_v46 = vshll.u32 %v308_v19, 16 }
  0x8f   : > { %v642_v44 = vrot.slane %v640_v32, 4  ;;  %6662 = vmatprep.mubr.msk.bf16.mxu1 %vm748_vm3, %v5565_v35  ;;  %v2419_v48 = vsel %vm7603_vm4, %v2414_v36, %v2418_v10  ;;  %v2424_v49 = vrot.slane %v2423_v37, 4  ;;  %v2431_v50 = vshrl.u32 %v5770_v34, 16  ;;  %v5774_v32 = vld [vmem:[%s7591_s26 + $0xb8] sm:$0xf] }
  0x90   : > { %v2434_v51 = vshll.u32 %v5770_v34, 16  ;;  %v633_v55 = vor.u32 %v632_v42, %v629_v40  ;;  %v648_v60 = vrot.slane %v646_v46, 5  ;;  %v2440_v61 = vshll.u32 %v5771_v41, 16  ;;  %v5775_v46 = vld [vmem:[%s7591_s26 + $0xbc] sm:$0x1] }
  0x91   : > { %v643_v56 = vor.u32 %v642_v44, %v638_v43  ;;  %v2429_v0 = vsel %vm7603_vm4, %v2424_v49, %v2428_v29  ;;  %v2433_v1 = vrot.slane %v2431_v50, 4  ;;  %v2444_v8 = vshrl.u32 %v5771_v41, 16 }
  0x92   : > { %v2436_v2 = vrot.slane %v2434_v51, 5  ;;  %v7910_v9 = vcombine.low %v2419_v48, %v2429_v0  ;;  %v634_v10 = vrot.slane %v633_v55, 4  ;;  %v2442_v16 = vrot.slane %v2440_v61, 5 }
  0x93   : > { %v644_v13 = vrot.slane %v643_v56, 4  ;;  %v2446_v20 = vrot.slane %v2444_v8, 4  ;;  %v2450_v22 = vshll.u32 %v5772_v47, 16  ;;  %v651_v23 = vshrl.u32 %v7903_v52, 16  ;;  %v7935_v8 = vld [vmem:[%s7591_s26 + $0xb8] sm:$0xf] }
  0x94   : > { %9538 = vst [vmem:[#allocation20_spill] sm:$0xff] %v7910_v9  ;;  %v2437_v19 = vor.u32 %v2436_v2, %v2433_v1  ;;  %6798 = vmatprep.mubr.msk.bf16.mxu0 %vm748_vm3, %v7910_v9  ;;  %v639_v24 = vsel %vm7603_vm4, %v634_v10, %v638_v43  ;;  %v654_v29 = vshll.u32 %v7903_v52, 16  ;;  %v660_v30 = vshll.u32 %v7906_v62, 16  ;;  %v7927_v43 = vld [vmem:[%s7591_s26 + $0xb4] sm:$0xf] }
  0x95   : > { %v649_v27 = vsel %vm7603_vm4, %v644_v13, %v648_v60  ;;  %v2447_v36 = vor.u32 %v2446_v20, %v2442_v16  ;;  %v2452_v37 = vrot.slane %v2450_v22, 5  ;;  %v653_v40 = vrot.slane %v651_v23, 4 }
  0x96   : > { %v5566_v34 = vcombine.low %v639_v24, %v649_v27  ;;  %v2438_v35 = vrot.slane %v2437_v19, 4  ;;  %v656_v41 = vrot.slane %v654_v29, 5  ;;  %v662_v42 = vrot.slane %v660_v30, 5  ;;  %v5776_v24 = vld [vmem:[%s7591_s26 + $0xc0] sm:$0xf] }
  0x97   : > { %v664_v44 = vshrl.u32 %v7906_v62, 16  ;;  %v2448_v48 = vrot.slane %v2447_v36, 4  ;;  %v670_v49 = vshll.u32 %v309_v58, 16  ;;  %v2455_v50 = vshrl.u32 %v5773_v18, 16  ;;  %v310_v58 = vld [vmem:[%s7591_s26 + $0xbc] sm:$0x1] }
  0x98   : > { %6663 = vmatmul.mubr.msk.bf16.gmra.mrb[24].mxu1 %vm748_vm3, %v5566_v34  ;;  %v2443_v47 = vsel %vm7603_vm4, %v2438_v35, %v2442_v16  ;;  %v657_v51 = vor.u32 %v656_v41, %v653_v40  ;;  %v2458_v56 = vshll.u32 %v5773_v18, 16  ;;  %v2464_v60 = vshll.u32 %v5774_v32, 16  ;;  %v5777_v40 = vld [vmem:[%s7591_s26 + $0xc4] sm:$0xf] }
  0x99   : > { %v666_v55 = vrot.slane %v664_v44, 4  ;;  %v2453_v61 = vsel %vm7603_vm4, %v2448_v48, %v2452_v37  ;;  %v672_v0 = vrot.slane %v670_v49, 5  ;;  %v2457_v1 = vrot.slane %v2455_v50, 4 }
  0x9a   : > { %v2468_v2 = vshrl.u32 %v5774_v32, 16  ;;  %v7937_v10 = vcombine.low %v2443_v47, %v2453_v61  ;;  %v658_v13 = vrot.slane %v657_v51, 4  ;;  %v2460_v19 = vrot.slane %v2458_v56, 5 }
  0x9b   : > { %v667_v16 = vor.u32 %v666_v55, %v662_v42  ;;  %v2466_v20 = vrot.slane %v2464_v60, 5  ;;  %v2474_v18 = vshll.u32 %v5775_v46, 16  ;;  %v675_v23 = vshrl.u32 %v7927_v43, 16  ;;  %v5778_v60 = vld [vmem:[%s7591_s26 + $0xc8] sm:$0x1] }
  0x9c   : > { %9539 = vst [vmem:[#allocation21_spill] sm:$0xff] %v7937_v10  ;;  %v2470_v22 = vrot.slane %v2468_v2, 4  ;;  %6799 = vmatmul.mubr.msk.bf16.gmra.mrb[24].mxu0 %vm748_vm3, %v7937_v10  ;;  %v663_v27 = vsel %vm7603_vm4, %v658_v13, %v662_v42  ;;  %v2461_v30 = vor.u32 %v2460_v19, %v2457_v1  ;;  %v678_v32 = vshll.u32 %v7927_v43, 16  ;;  %v5862_v19 = vld [vmem:[%s7591_s26 + $0x10] sm:$0xf] }
  0x9d   : > { %v668_v29 = vrot.slane %v667_v16, 4  ;;  %v2476_v35 = vrot.slane %v2474_v18, 5  ;;  %v677_v36 = vrot.slane %v675_v23, 4  ;;  %v684_v37 = vshll.u32 %v7935_v8, 16  ;;  %v5861_v16 = vld [vmem:[%s7591_s26 + $0xc] sm:$0xe] }
  0x9e   : > { %v2471_v34 = vor.u32 %v2470_v22, %v2466_v20  ;;  %v2462_v44 = vrot.slane %v2461_v30, 4  ;;  %v680_v46 = vrot.slane %v678_v32, 5  ;;  %v688_v47 = vshrl.u32 %v7935_v8, 16  ;;  %v5863_v23 = vld [vmem:[%s7591_s26 + $0x14] sm:$0x1] }
  0x9f   : > { %v673_v41 = vsel %vm7603_vm4, %v668_v29, %v672_v0  ;;  %v686_v49 = vrot.slane %v684_v37, 5  ;;  %v694_v50 = vshll.u32 %v310_v58, 16  ;;  %v2479_v61 = vshrl.u32 %v5776_v24, 16  ;;  %v7337_v37 = vld [vmem:[%s7591_s26] sm:$0xf] }
  0xa0   : > { %v5567_v42 = vcombine.low %v663_v27, %v673_v41  ;;  %v2472_v48 = vrot.slane %v2471_v34, 4  ;;  %v2467_v51 = vsel %vm7603_vm4, %v2462_v44, %v2466_v20  ;;  %v681_v55 = vor.u32 %v680_v46, %v677_v36  ;;  %v7969_v41 = vld [vmem:[%s7591_s26 + $0x4] sm:$0xf]  ;;  %v5865_v46 = vld [vmem:[%s7591_s26 + $0x1c] sm:$0xf] }
  0xa1   : > { %v690_v56 = vrot.slane %v688_v47, 4  ;;  %v696_v1 = vrot.slane %v694_v50, 5  ;;  %v2482_v2 = vshll.u32 %v5776_v24, 16  ;;  %v2488_v13 = vshll.u32 %v5777_v40, 16  ;;  %v6032_v10 = vld [vmem:[%s7591_s26 + $0x3c] sm:$0xf] }
  0xa2   : > { %6666 = vmatprep.mubr.msk.bf16.mxu1 %vm748_vm3, %v5567_v42  ;;  %v2477_v0 = vsel %vm7603_vm4, %v2472_v48, %v2476_v35  ;;  %v682_v20 = vrot.slane %v681_v55, 4  ;;  %v2481_v18 = vrot.slane %v2479_v61, 4  ;;  %v2492_v30 = vshrl.u32 %v5777_v40, 16  ;;  %v5864_v40 = vld [vmem:[%s7591_s26 + $0x18] sm:$0xe] }
  0xa3   : > { %v7960_v58 = vcombine.low %v2467_v51, %v2477_v0  ;;  %v691_v22 = vor.u32 %v690_v56, %v686_v49  ;;  %v2484_v27 = vrot.slane %v2482_v2, 5  ;;  %v2490_v29 = vrot.slane %v2488_v13, 5  ;;  %v5866_v51 = vld [vmem:[%s7591_s26 + $0x20] sm:$0x1] }
  0xa4   : > { %v2498_v32 = vshll.u32 %v5778_v60, 16  ;;  %v687_v24 = vsel %vm7603_vm4, %v682_v20, %v686_v49  ;;  %v2494_v36 = vrot.slane %v2492_v30, 4  ;;  %v5585_v44 = vcombine.low %v7337_v37, %v7969_v41  ;;  %v5868_v20 = vld [vmem:[%s7591_s26 + $0x28] sm:$0xf] }
  0xa5   : > { %9540 = vst [vmem:[#allocation22_spill] sm:$0xff] %v7960_v58  ;;  %6802 = vmatprep.mubr.msk.bf16.mxu0 %vm748_vm3, %v7960_v58  ;;  %v692_v34 = vrot.slane %v691_v22, 4  ;;  %v2485_v35 = vor.u32 %v2484_v27, %v2481_v18  ;;  %v5909_v48 = vrot.slane %v5861_v16, 9  ;;  %v3226_v49 = vrot.slane %v5862_v19, 5  ;;  %v5869_v22 = vld [vmem:[%s7591_s26 + $0x2c] sm:$0x1] }
  0xa6   : > { %v3229_v50 = vrot.slane %v5863_v23, 5  ;;  %v2495_v60 = vor.u32 %v2494_v36, %v2490_v29  ;;  %v2500_v61 = vrot.slane %v2498_v32, 5  ;;  %v3233_v13 = vrot.slane %v5865_v46, 5  ;;  %v5871_v27 = vld [vmem:[%s7591_s26 + $0x34] sm:$0xf] }
  0xa7   : > { %v697_v47 = vsel %vm7603_vm4, %v692_v34, %v696_v1  ;;  %v2486_v56 = vrot.slane %v2485_v35, 4  ;;  %v3227_v0 = vsel %vm7976_vm7, %v5909_v48, %v3226_v49  ;;  %v3228_v2 = vrot.slane %v3226_v49, 4  ;;  %v5867_v1 = vld [vmem:[%s7591_s26 + $0x24] sm:$0xe]  ;;  %v7999_v46 = vld [vmem:[%s7591_s26 + $0x10] sm:$0xf] }
  0xa8   : > { %v5568_v55 = vcombine.low %v687_v24, %v697_v47  ;;  %v2496_v19 = vrot.slane %v2495_v60, 4  ;;  %v5910_v23 = vrot.slane %v5864_v40, 9  ;;  %v3235_v24 = vrot.slane %v3233_v13, 4  ;;  %v5874_v47 = vld [vmem:[%s7591_s26 + $0x40] sm:$0xf] }
  0xa9   : > { %v2491_v16 = vsel %vm7603_vm4, %v2486_v56, %v2490_v29  ;;  %v3230_v18 = vsel %vm7976_vm7, %v3228_v2, %v3229_v50  ;;  %v3236_v34 = vrot.slane %v5866_v51, 5  ;;  %v5911_v35 = vrot.slane %v5867_v1, 9  ;;  %v7341_v48 = vld [vmem:[%s7591_s26 + $0x18] sm:$0xf]  ;;  %v8007_v49 = vld [vmem:[%s7591_s26 + $0x1c] sm:$0xf] }
  0xaa   : > { %6667 = vmatmul.mubr.msk.bf16.gmra.mrb[28].mxu1 %vm748_vm3, %v5568_v55  ;;  %v2501_v30 = vsel %vm7603_vm4, %v2496_v19, %v2500_v61  ;;  %v5926_v32 = vcombine.low %v3227_v0, %v3230_v18  ;;  %v3240_v36 = vrot.slane %v5868_v20, 5  ;;  %v3243_v37 = vrot.slane %v5869_v22, 5  ;;  %v5870_v61 = vld [vmem:[%s7591_s26 + $0x30] sm:$0xe]  ;;  %v5872_v20 = vld [vmem:[%s7591_s26 + $0x38] sm:$0x1] }
  0xab   : > { %6672 = vmatprep.mubr.msk.bf16.mxu1 %vm748_vm3, %v5585_v44  ;;  %v7995_v29 = vcombine.low %v2491_v16, %v2501_v30  ;;  %v7339_v44 = vld [vmem:[%s7591_s26 + $0xc] sm:$0xf]  ;;  %v5587_v50 = vcombine.low %v7341_v48, %v8007_v49  ;;  %v3234_v55 = vsel %vm7976_vm7, %v5910_v23, %v3233_v13  ;;  %v3237_v56 = vsel %vm7976_vm7, %v3235_v24, %v3236_v34  ;;  %v8026_v13 = vld [vmem:[%s9490_s1 + $0x6] sm:$0x3]  ;;  %v5875_v19 = vld [vmem:[%s7591_s26 + $0x44] sm:$0x1] }
  0xac   : > { %v5586_v40 = vcombine.low %v7339_v44, %v7999_v46  ;;  %v3242_v51 = vrot.slane %v3240_v36, 4  ;;  %v1516_v60 = vsel %vm797_vm0, %v7777_v63, 0  ;;  %v3247_v0 = vrot.slane %v5871_v27, 5  ;;  %v5873_v63 = vld [vmem:[%s7591_s26 + $0x3c] sm:$0xe] }
  0xad   : > { %9543 = vst [vmem:[#allocation23_spill] sm:$0xff] %v7995_v29  ;;  %6803 = vmatmul.mubr.msk.bf16.gmra.mrb[28].mxu0 %vm748_vm3, %v7995_v29  ;;  %v3241_v2 = vsel %vm7976_vm7, %v5911_v35, %v3240_v36  ;;  %v3254_v16 = vrot.slane %v5874_v47, 5  ;;  %v5927_v22 = vcombine.low %v3234_v55, %v3237_v56  ;;  %v5912_v23 = vrot.slane %v5870_v61, 9  ;;  %v8039_v44 = vld [vmem:[%s7591_s26 + $0x28] sm:$0xf] }
  0xae   : > { %6842 = vmatprep.mubr.msk.bf16.mxu0 %vm748_vm3, %v5926_v32  ;;  %v3244_v1 = vsel %vm7976_vm7, %v3242_v51, %v3243_v37  ;;  %v3249_v27 = vrot.slane %v3247_v0, 4  ;;  %v3250_v30 = vrot.slane %v5872_v20, 5  ;;  %v5877_v32 = vld [vmem:[%s7591_s26 + $0x4c] sm:$0xf]  ;;  %v3794_v24 = vsel %vm797_vm0, %v7760_v45, 0 }
  0xaf   : > { %v5928_v18 = vcombine.low %v3241_v2, %v3244_v1  ;;  %v5913_v34 = vrot.slane %v5873_v63, 9  ;;  %v3256_v35 = vrot.slane %v3254_v16, 4  ;;  %v3257_v36 = vrot.slane %v5875_v19, 5  ;;  %v7343_v37 = vld [vmem:[%s7591_s26 + $0x24] sm:$0xf] }
  0xb0   : > { %v5880_v47 = vld [vmem:[%s7591_s26 + $0x58] sm:$0xf]  ;;  %v8046_v48 = vld [vmem:[%s9490_s1 + $0xe] sm:$0x3]  ;;  %v7345_v45 = vld [vmem:[%s7591_s26 + $0x30] sm:$0xf]  ;;  %v3248_v55 = vsel %vm7976_vm7, %v5912_v23, %v3247_v0  ;;  %v3251_v56 = vsel %vm7976_vm7, %v3249_v27, %v3250_v30 }
  0xb1   : > { %v5878_v61 = vld [vmem:[%s7591_s26 + $0x50] sm:$0x1]  ;;  %v3261_v2 = vrot.slane %v5877_v32, 5  ;;  %v3255_v1 = vsel %vm7976_vm7, %v5913_v34, %v3254_v16  ;;  %v3258_v20 = vsel %vm7976_vm7, %v3256_v35, %v3257_v36  ;;  %v3268_v63 = vrot.slane %v5880_v47, 5  ;;  %v5879_v0 = vld [vmem:[%s7591_s26 + $0x54] sm:$0xe] }
  0xb2   : > { %6673 = vmatmul.mubr.msk.bf16.vlgmr.msra.gmra.mrb[0].mxu1 %vm748_vm3, %v5586_v40  ;;  %v5588_v40 = vcombine.low %v7343_v37, %v8039_v44  ;;  %v5881_v19 = vld [vmem:[%s7591_s26 + $0x5c] sm:$0x1]  ;;  %v5883_v16 = vld [vmem:[%s7591_s26 + $0x64] sm:$0xf]  ;;  %v3264_v30 = vrot.slane %v5878_v61, 5  ;;  %v5915_v32 = vrot.slane %v5879_v0, 9 }
  0xb3   : > { %6705 = vmatpush3.bf16.msra.mxu1 %v1516_v60  ;;  %6676 = vmatprep.mubr.msk.bf16.mxu1 %vm748_vm3, %v5587_v50  ;;  %v8051_v50 = vld [vmem:[%s7591_s26 + $0x34] sm:$0xf]  ;;  %v5876_v60 = vld [vmem:[%s7591_s26 + $0x48] sm:$0xe]  ;;  %v3263_v27 = vrot.slane %v3261_v2, 4  ;;  %v3271_v34 = vrot.slane %v5881_v19, 5 }
  0xb4   : > { %7235 = vmatprep.subr.msk.bf16.mxu1 %vm797_vm0, %v8026_v13  ;;  %v5589_v51 = vcombine.low %v7345_v45, %v8051_v50  ;;  %v5914_v23 = vrot.slane %v5876_v60, 9  ;;  %v7347_v35 = vld [vmem:[%s7591_s26 + $0x3c] sm:$0xf]  ;;  %v8074_v36 = vld [vmem:[%s7591_s26 + $0x40] sm:$0xf]  ;;  %v3275_v61 = vrot.slane %v5883_v16, 5 }
  0xb5   : > { %6843 = vmatmul.mubr.msk.bf16.vlgmr.msra.gmra.mrb[0].mxu0 %vm748_vm3, %v5927_v22  ;;  %v5929_v22 = vcombine.low %v3248_v55, %v3251_v56  ;;  %v5590_v37 = vcombine.low %v7347_v35, %v8074_v36  ;;  %v7349_v47 = vld [vmem:[%s7591_s26 + $0x48] sm:$0xf]  ;;  %v8081_v45 = vld [vmem:[%s7591_s26 + $0x4c] sm:$0xf]  ;;  %v3265_v56 = vsel %vm7976_vm7, %v3263_v27, %v3264_v30  ;;  %v5882_v60 = vld [vmem:[%s7591_s26 + $0x60] sm:$0xe] }
  0xb6   : > { %6875 = vmatpush3.bf16.msra.mxu0 %v3794_v24  ;;  %6846 = vmatprep.mubr.msk.bf16.mxu0 %vm748_vm3, %v5928_v18  ;;  %v5930_v18 = vcombine.low %v3255_v1, %v3258_v20  ;;  %v3270_v24 = vrot.slane %v3268_v63, 4  ;;  %v3262_v55 = vsel %vm7976_vm7, %v5914_v23, %v3261_v2  ;;  %v3269_v1 = vsel %vm7976_vm7, %v5915_v32, %v3268_v63  ;;  %v5884_v0 = vld [vmem:[%s7591_s26 + $0x68] sm:$0x1]  ;;  %v5885_v19 = vld [vmem:[%s7591_s26 + $0x6c] sm:$0xe] }
  0xb7   : > { %7240 = vmatprep.subr.msk.bf16.mxu0 %vm797_vm0, %v8046_v48  ;;  %v5887_v2 = vld [vmem:[%s7591_s26 + $0x74] sm:$0x1]  ;;  %v5916_v16 = vrot.slane %v5882_v60, 9  ;;  %v3277_v63 = vrot.slane %v3275_v61, 4  ;;  %v3278_v27 = vrot.slane %v5884_v0, 5  ;;  %v5917_v30 = vrot.slane %v5885_v19, 9 }
  0xb8   : > { %v3272_v20 = vsel %vm7976_vm7, %v3270_v24, %v3271_v34  ;;  %v5889_v32 = vld [vmem:[%s7591_s26 + $0x7c] sm:$0xf]  ;;  %v3285_v34 = vrot.slane %v5887_v2, 5  ;;  %v7351_v35 = vld [vmem:[%s7591_s26 + $0x54] sm:$0xf]  ;;  %v4239_v4 = vshll.u32 %v8586_v59, 16 }
  0xb9   : > { %v5932_v23 = vcombine.low %v3269_v1, %v3272_v20  ;;  %v3276_v60 = vsel %vm7976_vm7, %v5916_v16, %v3275_v61  ;;  %v3279_v1 = vsel %vm7976_vm7, %v3277_v63, %v3278_v27  ;;  %v5888_v20 = vld [vmem:[%s7591_s26 + $0x78] sm:$0xe]  ;;  %v3289_v0 = vrot.slane %v5889_v32, 5  ;;  %v5893_v61 = vld [vmem:[%s7591_s26 + $0x8c] sm:$0x1] }
  0xba   : > { %6677 = vmatmul.mubr.msk.bf16.gmra.mrb[4].mxu1 %vm748_vm3, %v5588_v40  ;;  %v5886_v40 = vld [vmem:[%s7591_s26 + $0x70] sm:$0xf]  ;;  %v5933_v16 = vcombine.low %v3276_v60, %v3279_v1  ;;  %v5918_v63 = vrot.slane %v5888_v20, 9  ;;  %v7355_v29 = vld [vmem:[%s7591_s26 + $0x6c] sm:$0xf] }
  0xbb   : > { %6680 = vmatprep.mubr.msk.bf16.mxu1 %vm748_vm3, %v5589_v51  ;;  %v5591_v51 = vcombine.low %v7349_v47, %v8081_v45  ;;  %v5892_v47 = vld [vmem:[%s7591_s26 + $0x88] sm:$0xf]  ;;  %v5894_v20 = vld [vmem:[%s7591_s26 + $0x90] sm:$0xe] }
  0xbc   : > { %v3290_v60 = vsel %vm7976_vm7, %v5918_v63, %v3289_v0 }
  0xbd   : > { %6847 = vmatmul.mubr.msk.bf16.gmra.mrb[4].mxu0 %vm748_vm3, %v5929_v22  ;;  %v3282_v22 = vrot.slane %v5886_v40, 5  ;;  %v8102_v40 = vld [vmem:[%s7591_s26 + $0x58] sm:$0xf] }
  0xbe   : > { %6850 = vmatprep.mubr.msk.bf16.mxu0 %vm748_vm3, %v5930_v18  ;;  %v5931_v18 = vcombine.low %v3262_v55, %v3265_v56  ;;  %v8109_v55 = vld [vmem:[%s7591_s26 + $0x64] sm:$0xf] }
  0xbf   : > { %v3284_v24 = vrot.slane %v3282_v22, 4  ;;  %v3283_v19 = vsel %vm7976_vm7, %v5917_v30, %v3282_v22  ;;  %v3291_v22 = vrot.slane %v3289_v0, 4  ;;  %v5899_v0 = vld [vmem:[%s7591_s26 + $0xa4] sm:$0x1] }
  0xc1   : > { %v3286_v2 = vsel %vm7976_vm7, %v3284_v24, %v3285_v34  ;;  %v3299_v24 = vrot.slane %v5893_v61, 5  ;;  %v5895_v34 = vld [vmem:[%s7591_s26 + $0x94] sm:$0xf]  ;;  %v5920_v61 = vrot.slane %v5894_v20, 9 }
  0xc2   : > { %6681 = vmatmul.mubr.msk.bf16.gmra.mrb[8].mxu1 %vm748_vm3, %v5590_v37  ;;  %v5592_v37 = vcombine.low %v7351_v35, %v8102_v40  ;;  %v5891_v35 = vld [vmem:[%s7591_s26 + $0x84] sm:$0xe]  ;;  %v5934_v27 = vcombine.low %v3283_v19, %v3286_v2  ;;  %v5896_v19 = vld [vmem:[%s7591_s26 + $0x98] sm:$0x1]  ;;  %v3303_v2 = vrot.slane %v5895_v34, 5 }
  0xc3   : > { %6684 = vmatprep.mubr.msk.bf16.mxu1 %vm748_vm3, %v5591_v51  ;;  %v7353_v51 = vld [vmem:[%s7591_s26 + $0x60] sm:$0xf]  ;;  %v5919_v32 = vrot.slane %v5891_v35, 9  ;;  %v3306_v63 = vrot.slane %v5896_v19, 5  ;;  %v5900_v34 = vld [vmem:[%s7591_s26 + $0xa8] sm:$0xe] }
  0xc4   : > { %v5593_v56 = vcombine.low %v7353_v51, %v8109_v55  ;;  %v5922_v19 = vrot.slane %v5900_v34, 9 }
  0xc5   : > { %6851 = vmatmul.mubr.msk.bf16.gmra.mrb[8].mxu0 %vm748_vm3, %v5931_v18  ;;  %v5890_v18 = vld [vmem:[%s7591_s26 + $0x80] sm:$0x1] }
  0xc6   : > { %6854 = vmatprep.mubr.msk.bf16.mxu0 %vm748_vm3, %v5932_v23  ;;  %v3296_v23 = vrot.slane %v5892_v47, 5  ;;  %v3292_v30 = vrot.slane %v5890_v18, 5  ;;  %v5594_v47 = vcombine.low %v7355_v29, %v7768_v57 }
  0xc8   : > { %v3298_v51 = vrot.slane %v3296_v23, 4  ;;  %v3293_v1 = vsel %vm7976_vm7, %v3291_v22, %v3292_v30  ;;  %v3297_v57 = vsel %vm7976_vm7, %v5919_v32, %v3296_v23  ;;  %v3313_v22 = vrot.slane %v5899_v0, 5  ;;  %v5901_v30 = vld [vmem:[%s7591_s26 + $0xac] sm:$0xf] }
  0xc9   : > { %v5935_v18 = vcombine.low %v3290_v60, %v3293_v1  ;;  %v5596_v32 = vcombine.low %v7822_v17, %v7829_v26  ;;  %v3317_v60 = vrot.slane %v5901_v30, 5  ;;  %v5905_v1 = vld [vmem:[%s7591_s26 + $0xbc] sm:$0x1]  ;;  %v1314_v30 = vrot.slane %v7999_v46, 5 }
  0xca   : > { %6685 = vmatmul.mubr.msk.bf16.gmra.mrb[12].mxu1 %vm748_vm3, %v5592_v37  ;;  %v5898_v37 = vld [vmem:[%s7591_s26 + $0xa0] sm:$0xf]  ;;  %v3300_v29 = vsel %vm7976_vm7, %v3298_v51, %v3299_v24  ;;  %v5904_v51 = vld [vmem:[%s7591_s26 + $0xb8] sm:$0xf]  ;;  %v5597_v24 = vcombine.low %v7851_v11, %v7856_v15  ;;  %v5903_v15 = vld [vmem:[%s7591_s26 + $0xb4] sm:$0xe] }
  0xcb   : > { %6688 = vmatprep.mubr.msk.bf16.mxu1 %vm748_vm3, %v5593_v56  ;;  %v5595_v56 = vcombine.low %v7795_v33, %v7800_v38  ;;  %v3310_v33 = vrot.slane %v5898_v37, 5  ;;  %v5897_v38 = vld [vmem:[%s7591_s26 + $0x9c] sm:$0xe]  ;;  %v5936_v35 = vcombine.low %v3297_v57, %v3300_v29  ;;  %v3324_v11 = vrot.slane %v5904_v51, 5  ;;  %v1255_v51 = vld [vmem:[%s7591_s26 + $0xc] sm:$0xe] }
  0xcc   : > { %v3319_v29 = vrot.slane %v3317_v60, 4  ;;  %v5923_v0 = vrot.slane %v5903_v15, 9  ;;  %v5618_v15 = vrot.slane %v1255_v51, 9 }
  0xcd   : > { %6855 = vmatmul.mubr.msk.bf16.gmra.mrb[12].mxu0 %vm748_vm3, %v5933_v16  ;;  %v3305_v16 = vrot.slane %v3303_v2, 4  ;;  %v3312_v23 = vrot.slane %v3310_v33, 4 }
  0xce   : > { %6858 = vmatprep.mubr.msk.bf16.mxu0 %vm748_vm3, %v5934_v27  ;;  %v5921_v27 = vrot.slane %v5897_v38, 9  ;;  %v1307_v38 = vrot.slane %v7969_v41, 5  ;;  %v5908_v41 = vld [vmem:[%s7591_s26 + $0xc8] sm:$0x1]  ;;  %v3325_v46 = vsel %vm7976_vm7, %v5923_v0, %v3324_v11 }
  0xcf   : > { %v3307_v37 = vsel %vm7976_vm7, %v3305_v16, %v3306_v63  ;;  %v3314_v26 = vsel %vm7976_vm7, %v3312_v23, %v3313_v22  ;;  %v5598_v16 = vcombine.low %v7876_v3, %v7881_v14  ;;  %v5906_v63 = vld [vmem:[%s7591_s26 + $0xc0] sm:$0xe]  ;;  %v7356_v23 = vld [vmem:[%s7591_s26 + $0x8] sm:$0x1] }
  0xd0   : > { %v3311_v17 = vsel %vm7976_vm7, %v5921_v27, %v3310_v33  ;;  %v1310_v22 = vrot.slane %v7356_v23, 5  ;;  %v1309_v34 = vrot.slane %v1307_v38, 4 }
  0xd1   : > { %v5938_v57 = vcombine.low %v3311_v17, %v3314_v26 }
  0xd2   : > { %6689 = vmatmul.mubr.msk.bf16.gmra.mrb[16].mxu1 %vm748_vm3, %v5594_v47  ;;  %v3304_v47 = vsel %vm7976_vm7, %v5920_v61, %v3303_v2  ;;  %v5907_v2 = vld [vmem:[%s7591_s26 + $0xc4] sm:$0xf]  ;;  %v1254_v61 = vld [vmem:[%s7591_s26] sm:$0xe] }
  0xd3   : > { %6692 = vmatprep.mubr.msk.bf16.mxu1 %vm748_vm3, %v5595_v56  ;;  %v5902_v56 = vld [vmem:[%s7591_s26 + $0xb0] sm:$0x1]  ;;  %v5937_v20 = vcombine.low %v3304_v47, %v3307_v37  ;;  %v3331_v27 = vrot.slane %v5907_v2, 5  ;;  %v5617_v14 = vrot.slane %v1254_v61, 9  ;;  %v3334_v37 = vrot.slane %v5908_v41, 5 }
  0xd4   : > { %v3320_v33 = vrot.slane %v5902_v56, 5  ;;  %v1321_v56 = vrot.slane %v8007_v49, 5  ;;  %v1311_v2 = vsel %vm7976_vm7, %v1309_v34, %v1310_v22  ;;  %v1316_v49 = vrot.slane %v1314_v30, 4  ;;  %v1258_v61 = vld [vmem:[%s7591_s26 + $0x30] sm:$0xe] }
  0xd5   : > { %6859 = vmatmul.mubr.msk.bf16.gmra.mrb[16].mxu0 %vm748_vm3, %v5935_v18  ;;  %v3326_v18 = vrot.slane %v3324_v11, 4  ;;  %v1256_v11 = vld [vmem:[%s7591_s26 + $0x18] sm:$0xe]  ;;  %v7359_v22 = vld [vmem:[%s7591_s26 + $0x2c] sm:$0x1]  ;;  %v8221_v41 = vsel %vm797_vm0, %v8026_v13, 0 }
  0xd6   : > { %6862 = vmatprep.mubr.msk.bf16.mxu0 %vm748_vm3, %v5936_v35  ;;  %v3327_v35 = vrot.slane %v5905_v1, 5  ;;  %v3321_v3 = vsel %vm7976_vm7, %v3319_v29, %v3320_v33  ;;  %v1328_v1 = vrot.slane %v8039_v44, 5  ;;  %v5600_v29 = vcombine.low %v7927_v43, %v7935_v8  ;;  %v7305_v13 = vld [vmem:[%s7591_s26 + $0x18] sm:$0xff]  }
  0xd7   : > { %v5619_v44 = vrot.slane %v1256_v11, 9  ;;  %v1331_v43 = vrot.slane %v7359_v22, 5  ;;  %v5621_v51 = vrot.slane %v1258_v61, 9  ;;  %v7365_v22 = vld [vmem:[%s7591_s26 + $0x68] sm:$0x1] }
  0xd8   : > { %v3328_v47 = vsel %vm7976_vm7, %v3326_v18, %v3327_v35  ;;  %v1323_v18 = vrot.slane %v1321_v56, 4  ;;  %v7358_v35 = vld [vmem:[%s7591_s26 + $0x20] sm:$0x1]  ;;  %v1330_v23 = vrot.slane %v1328_v1, 4 }
  0xda   : > { %6693 = vmatmul.mubr.msk.bf16.gmra.mrb[20].mxu1 %vm748_vm3, %v5596_v32  ;;  %v5599_v32 = vcombine.low %v7903_v52, %v7906_v62  ;;  %v5924_v52 = vrot.slane %v5906_v63, 9  ;;  %v3333_v62 = vrot.slane %v3331_v27, 4 }
  0xdb   : > { %6696 = vmatprep.mubr.msk.bf16.mxu1 %vm748_vm3, %v5597_v24  ;;  %v3318_v24 = vsel %vm7976_vm7, %v5922_v19, %v3317_v60  ;;  %v7357_v60 = vld [vmem:[%s7591_s26 + $0x14] sm:$0x1]  ;;  %v1308_v19 = vsel %vm7976_vm7, %v5617_v14, %v1307_v38  ;;  %v1324_v38 = vrot.slane %v7358_v35, 5 }
  0xdc   : > { %v1317_v17 = vrot.slane %v7357_v60, 5  ;;  %v5939_v26 = vcombine.low %v3318_v24, %v3321_v3  ;;  %v3332_v33 = vsel %vm7976_vm7, %v5924_v52, %v3331_v27  ;;  %v3335_v0 = vsel %vm7976_vm7, %v3333_v62, %v3334_v37  ;;  %v1259_v3 = vld [vmem:[%s7591_s26 + $0x3c] sm:$0xe]  ;;  %v1260_v62 = vld [vmem:[%s7591_s26 + $0x48] sm:$0xe] }
  0xdd   : > { %6863 = vmatmul.mubr.msk.bf16.gmra.mrb[20].mxu0 %vm748_vm3, %v5937_v20  ;;  %v5940_v20 = vcombine.low %v3325_v46, %v3328_v47  ;;  %v1315_v27 = vsel %vm7976_vm7, %v5618_v15, %v1314_v30  ;;  %v1335_v24 = vrot.slane %v8051_v50, 5  ;;  %v5941_v14 = vcombine.low %v3332_v33, %v3335_v0 }
  0xde   : > { %6866 = vmatprep.mubr.msk.bf16.mxu0 %vm748_vm3, %v5938_v57  ;;  %v1257_v57 = vld [vmem:[%s7591_s26 + $0x24] sm:$0xe]  ;;  %v1322_v30 = vsel %vm7976_vm7, %v5619_v44, %v1321_v56  ;;  %v1325_v34 = vsel %vm7976_vm7, %v1323_v18, %v1324_v38  ;;  %v1342_v46 = vrot.slane %v8074_v36, 5  ;;  %v8239_v52 = vsel %vm7976_vm7, %v1330_v23, %v1331_v43  ;;  %v7360_v56 = vld [vmem:[%s7591_s26 + $0x38] sm:$0x1] }
  0xdf   : > { %v5620_v63 = vrot.slane %v1257_v57, 9  ;;  %v1349_v37 = vrot.slane %v8081_v45, 5  ;;  %v1338_v36 = vrot.slane %v7360_v56, 5  ;;  %v5622_v60 = vrot.slane %v1259_v3, 9  ;;  %v7363_v44 = vld [vmem:[%s7591_s26 + $0x50] sm:$0x1] }
  0xe0   : > { %v1363_v15 = vrot.slane %v8109_v55, 5  ;;  %v5636_v11 = vcombine.low %v1322_v30, %v1325_v34  ;;  %v1344_v57 = vrot.slane %v1342_v46, 4  ;;  %v5623_v33 = vrot.slane %v1260_v62, 9  ;;  %v1263_v55 = vld [vmem:[%s7591_s26 + $0x6c] sm:$0xe] }
  0xe1   : > { %v8235_v50 = vsel %vm7976_vm7, %v5620_v63, %v1328_v1  ;;  %v8249_v1 = vsel %vm7976_vm7, %v5621_v51, %v1335_v24  ;;  %v1351_v0 = vrot.slane %v1349_v37, 4  ;;  %v1352_v18 = vrot.slane %v7363_v44, 5  ;;  %v7364_v38 = vld [vmem:[%s7591_s26 + $0x5c] sm:$0x1]  ;;  %v7366_v3 = vld [vmem:[%s7591_s26 + $0x74] sm:$0x1] }
  0xe2   : > { %6697 = vmatmul.mubr.msk.bf16.gmra.mrb[24].mxu1 %vm748_vm3, %v5598_v16  ;;  %v5634_v16 = vcombine.low %v1308_v19, %v1311_v2  ;;  %v1262_v19 = vld [vmem:[%s7591_s26 + $0x60] sm:$0xe]  ;;  %v7361_v2 = vld [vmem:[%s7591_s26 + $0x70] sm:$0xf]  ;;  %v1359_v61 = vrot.slane %v7364_v38, 5  ;;  %v1365_v23 = vrot.slane %v1363_v15, 4  ;;  %v8276_v34 = vsel %vm7976_vm7, %v5622_v60, %v1342_v46 }
  0xe3   : > { %6700 = vmatprep.mubr.msk.bf16.mxu1 %vm748_vm3, %v5599_v32  ;;  %v1318_v32 = vsel %vm7976_vm7, %v1316_v49, %v1317_v17  ;;  %v1261_v17 = vld [vmem:[%s7591_s26 + $0x54] sm:$0xe]  ;;  %v1370_v45 = vrot.slane %v7361_v2, 5  ;;  %v5637_v49 = vcombine.low %v8235_v50, %v8239_v52  ;;  %v5625_v63 = vrot.slane %v1262_v19, 9  ;;  %v8271_v30 = vld [vmem:[%s9492_s3] sm:$0x3] }
  0xe4   : > { %v5635_v47 = vcombine.low %v1315_v27, %v1318_v32  ;;  %v5624_v35 = vrot.slane %v1261_v17, 9  ;;  %v1366_v43 = vrot.slane %v7365_v22, 5  ;;  %v1264_v27 = vld [vmem:[%s7591_s26 + $0x78] sm:$0xe]  ;;  %v5626_v51 = vrot.slane %v1263_v55, 9  ;;  %v7306_v19 = vld [vmem:[%s7591_s26 + $0x24] sm:$0xff]  }
  0xe5   : > { %6867 = vmatmul.mubr.msk.bf16.gmra.mrb[24].mxu0 %vm748_vm3, %v5939_v26  ;;  %v1356_v26 = vrot.slane %v8102_v40, 5  ;;  %v7367_v62 = vld [vmem:[%s7591_s26 + $0x7c] sm:$0xf]  ;;  %v7368_v17 = vld [vmem:[%s7591_s26 + $0x88] sm:$0xf]  ;;  %v4520_v2 = vsel %vm797_vm0, %v8046_v48, 0  ;;  %v8292_v46 = vsel %vm7976_vm7, %v5623_v33, %v1349_v37 }
  0xe6   : > { %6870 = vmatprep.mubr.msk.bf16.mxu0 %vm748_vm3, %v5940_v20  ;;  %v1337_v20 = vrot.slane %v1335_v24, 4  ;;  %v1372_v24 = vrot.slane %v1370_v45, 4  ;;  %v1377_v56 = vrot.slane %v7367_v62, 5  ;;  %v8313_v37 = vsel %vm7976_vm7, %v1365_v23, %v1366_v43  ;;  %v1266_v55 = vld [vmem:[%s7591_s26 + $0x90] sm:$0xe] }
  0xe7   : > { %v8300_v60 = vsel %vm7976_vm7, %v5624_v35, %v1356_v26  ;;  %v7371_v38 = vld [vmem:[%s7591_s26 + $0x94] sm:$0xf]  ;;  %v1412_v22 = vrot.slane %v7935_v8, 5 }
  0xe8   : > { %v8265_v32 = vsel %vm7976_vm7, %v1337_v20, %v1338_v36  ;;  %v1265_v36 = vld [vmem:[%s7591_s26 + $0x84] sm:$0xe]  ;;  %v1384_v20 = vrot.slane %v7368_v17, 5  ;;  %v7372_v17 = vld [vmem:[%s7591_s26 + $0x98] sm:$0x1] }
  0xea   : > { %6701 = vmatmul.mubr.msk.bf16.gmra.mrb[28].mxu1 %vm748_vm3, %v5600_v29  ;;  %v7362_v29 = vld [vmem:[%s7591_s26 + $0x44] sm:$0x1]  ;;  %v1386_v44 = vrot.slane %v1384_v20, 4 }
  0xeb   : > { %6706 = vmatprep.mubr.msk.bf16.mxu1 %vm748_vm3, %v5634_v16  ;;  %v1345_v40 = vrot.slane %v7362_v29, 5  ;;  %v1358_v16 = vrot.slane %v1356_v26, 4  ;;  %v8319_v26 = vsel %vm7976_vm7, %v5626_v51, %v1370_v45  ;;  %v8332_v45 = vld [vmem:[%s9490_s1 + $0x10] sm:$0x3] }
  0xed   : > { %6871 = vmatmul.mubr.msk.bf16.gmra.mrb[28].mxu0 %vm748_vm3, %v5941_v14  ;;  %v1373_v14 = vrot.slane %v7366_v3, 5  ;;  %v8305_v48 = vsel %vm7976_vm7, %v1358_v16, %v1359_v61  ;;  %v1391_v61 = vrot.slane %v7371_v38, 5  ;;  %v5638_v16 = vcombine.low %v8249_v1, %v8265_v32  ;;  %v6024_v1 = vld [vmem:[%s7591_s26 + $0x1c] sm:$0xf] }
  0xee   : > { %6876 = vmatprep.mubr.msk.bf16.mxu0 %vm748_vm3, %v7305_v13  ;;  %v8280_v13 = vsel %vm7976_vm7, %v1344_v57, %v1345_v40  ;;  %v7307_v57 = vld [vmem:[%s7591_s26 + $0x30] sm:$0xff]   ;;  %v7369_v40 = vld [vmem:[%s7591_s26 + $0x80] sm:$0x1]  ;;  %v5629_v3 = vrot.slane %v1266_v55, 9 }
  0xef   : > { %v8323_v29 = vsel %vm7976_vm7, %v1372_v24, %v1373_v14  ;;  %v1380_v33 = vrot.slane %v7369_v40, 5  ;;  %v6026_v14 = vld [vmem:[%s7591_s26 + $0x24] sm:$0xf] }
  0xf0   : > { %v4062_v40 = vshrl.u32 %v6026_v14, 16 }
  0xf2   : > { %6707 = vmatmul.mubr.msk.bf16.vlgmr.msra.gmra.mrb[0].mxu1 %vm748_vm3, %v5635_v47  ;;  %v8296_v47 = vsel %vm7976_vm7, %v1351_v0, %v1352_v18  ;;  %v1379_v0 = vrot.slane %v1377_v56, 4  ;;  %v7370_v18 = vld [vmem:[%s7591_s26 + $0x8c] sm:$0x1] }
  0xf3   : > { %6739 = vmatpush3.bf16.msra.mxu1 %v8221_v41  ;;  %6710 = vmatprep.mubr.msk.bf16.mxu1 %vm748_vm3, %v5636_v11  ;;  %v8309_v41 = vsel %vm7976_vm7, %v5625_v63, %v1363_v15  ;;  %v5627_v11 = vrot.slane %v1264_v27, 9  ;;  %v5628_v15 = vrot.slane %v1265_v36, 9  ;;  %v1387_v35 = vrot.slane %v7370_v18, 5  ;;  %v6023_v27 = vld [vmem:[%s7591_s26 + $0x18] sm:$0xf] }
  0xf4   : > { %7237 = vmatprep.subr.msk.bf16.mxu1 %vm797_vm0, %v8271_v30  ;;  %v5639_v63 = vcombine.low %v8276_v34, %v8280_v13  ;;  %v5640_v23 = vcombine.low %v8292_v46, %v8296_v47  ;;  %v6027_v34 = vld [vmem:[%s7591_s26 + $0x28] sm:$0xf]  ;;  %v7308_v13 = vld [vmem:[%s7591_s26 + $0x3c] sm:$0xff]   ;;  %v8369_v62 = vsel %vm7976_vm7, %v1379_v0, %v1380_v33  ;;  %v1393_v36 = vrot.slane %v1391_v61, 4  ;;  %v8399_v0 = vld [vmem:[%s7591_s26 + $0x34] sm:$0xf] }
  0xf5   : > { %6877 = vmatmul.mubr.msk.bf16.vlgmr.msra.gmra.mrb[0].mxu0 %vm748_vm3, %v7306_v19  ;;  %v8352_v51 = vsel %vm7976_vm7, %v5627_v11, %v1377_v56  ;;  %v8356_v24 = vsel %vm7976_vm7, %v5628_v15, %v1384_v20  ;;  %v8373_v56 = vsel %vm7976_vm7, %v1386_v44, %v1387_v35  ;;  %v1394_v20 = vrot.slane %v7372_v17, 5  ;;  %v1267_v19 = vld [vmem:[%s7591_s26 + $0x9c] sm:$0xe]  ;;  %v7309_v11 = vld [vmem:[%s7591_s26 + $0x48] sm:$0xff]   ;;  %v7373_v35 = vld [vmem:[%s7591_s26 + $0xa0] sm:$0xf] }
  0xf6   : > { %6909 = vmatpush3.bf16.msra.mxu0 %v4520_v2  ;;  %6880 = vmatprep.mubr.msk.bf16.mxu0 %vm748_vm3, %v7307_v57  ;;  %v8379_v2 = vld [vmem:[%s7591_s26 + $0xa8] sm:$0xe]  ;;  %v4038_v50 = vshrl.u32 %v6023_v27, 16  ;;  %v4041_v52 = vshll.u32 %v6023_v27, 16  ;;  %v4051_v57 = vshrl.u32 %v6024_v1, 16  ;;  %v4065_v33 = vshll.u32 %v6026_v14, 16 }
  0xf7   : > { %7241 = vmatprep.subr.msk.bf16.mxu0 %vm797_vm0, %v8332_v45  ;;  %v4071_v15 = vshll.u32 %v6027_v34, 16  ;;  %v4075_v55 = vshrl.u32 %v6027_v34, 16  ;;  %v8386_v44 = vsel %vm7976_vm7, %v5629_v3, %v1391_v61  ;;  %v5630_v18 = vrot.slane %v1267_v19, 9  ;;  %v6029_v17 = vld [vmem:[%s7591_s26 + $0x30] sm:$0xf] }
  0xf8   : > { %v1398_v38 = vrot.slane %v7373_v35, 5  ;;  %v8393_v27 = vsel %vm7976_vm7, %v1393_v36, %v1394_v20  ;;  %v4040_v61 = vrot.slane %v4038_v50, 4  ;;  %v4043_v3 = vrot.slane %v4041_v52, 5  ;;  %v6025_v36 = vld [vmem:[%s7591_s26 + $0x20] sm:$0x1] }
  0xf9   : > { %v4053_v35 = vrot.slane %v4051_v57, 4  ;;  %v4064_v20 = vrot.slane %v4062_v40, 4  ;;  %v4077_v32 = vrot.slane %v4075_v55, 4  ;;  %v6028_v34 = vld [vmem:[%s7591_s26 + $0x2c] sm:$0x1]  ;;  %v4086_v43 = vshrl.u32 %v6029_v17, 16 }
  0xfa   : > { %6711 = vmatmul.mubr.msk.bf16.gmra.mrb[4].mxu1 %vm748_vm3, %v5637_v49  ;;  %v4047_v49 = vshll.u32 %v6024_v1, 16  ;;  %v7374_v1 = vld [vmem:[%s7591_s26 + $0xa4] sm:$0x1]  ;;  %v4095_v50 = vshll.u32 %v8399_v0, 16  ;;  %v4099_v52 = vshrl.u32 %v8399_v0, 16  ;;  %v8416_v57 = vsel %vm7976_vm7, %v5630_v18, %v1398_v38  ;;  %v7310_v55 = vld [vmem:[%s7591_s26 + $0x54] sm:$0xff]  }
  0xfb   : > { %6714 = vmatprep.mubr.msk.bf16.mxu1 %vm748_vm3, %v5638_v16  ;;  %v1401_v14 = vrot.slane %v7374_v1, 5  ;;  %v4067_v1 = vrot.slane %v4065_v33, 5  ;;  %v8406_v16 = vrot.slane %v4071_v15, 5  ;;  %v7375_v40 = vld [vmem:[%s7591_s26 + $0xac] sm:$0xf]  ;;  %v4057_v58 = vshll.u32 %v6025_v36, 16 }
  0xfc   : > { %v8402_v19 = vrot.slane %v4047_v49, 5  ;;  %v1405_v33 = vrot.slane %v7375_v40, 5  ;;  %v1269_v15 = vld [vmem:[%s7591_s26 + $0xb4] sm:$0xe]  ;;  %v4044_v49 = vor.u32 %v4043_v3, %v4040_v61  ;;  %v7311_v18 = vld [vmem:[%s7591_s26 + $0x60] sm:$0xff]   ;;  %v4081_v5 = vshll.u32 %v6028_v34, 16 }
  0xfd   : > { %6881 = vmatmul.mubr.msk.bf16.gmra.mrb[4].mxu0 %vm748_vm3, %v7308_v13  ;;  %v4089_v13 = vshll.u32 %v6029_v17, 16  ;;  %v7376_v17 = vld [vmem:[%s7591_s26 + $0xb0] sm:$0x1]  ;;  %v4068_v9 = vor.u32 %v4067_v1, %v4064_v20  ;;  %v4078_v40 = vor.u32 %v4077_v32, %v8406_v16  ;;  %v4088_v46 = vrot.slane %v4086_v43, 4  ;;  %v7377_v36 = vld [vmem:[%s7591_s26 + $0xbc] sm:$0x1] }
  0xfe   : > { %6884 = vmatprep.mubr.msk.bf16.mxu0 %vm748_vm3, %v7309_v11  ;;  %v1400_v11 = vrot.slane %v1398_v38, 4  ;;  %v4054_v38 = vor.u32 %v4053_v35, %v8402_v19  ;;  %v5632_v61 = vrot.slane %v1269_v15, 9  ;;  %v4110_v3 = vshrl.u32 %v6032_v10, 16  ;;  %v8443_v43 = vld [vmem:[%s7591_s26 + $0x40] sm:$0xf] }
  0xff   : > { %v4091_v47 = vrot.slane %v4089_v13, 5  ;;  %v4113_v35 = vshll.u32 %v6032_v10, 16  ;;  %v1407_v32 = vrot.slane %v1405_v33, 4  ;;  %v1414_v34 = vrot.slane %v1412_v22, 4 }
 0x100   : > { %v8438_v8 = vsel %vm7976_vm7, %v1400_v11, %v1401_v14  ;;  %v1415_v20 = vrot.slane %v7377_v36, 5  ;;  %v4059_v1 = vrot.slane %v4057_v58, 5  ;;  %v4045_v13 = vrot.slane %v4044_v49, 4  ;;  %v6035_v11 = vld [vmem:[%s7591_s26 + $0x48] sm:$0xf] }
 0x101   : > { %v4083_v14 = vrot.slane %v4081_v5, 5  ;;  %v4069_v10 = vrot.slane %v4068_v9, 4  ;;  %v4079_v15 = vrot.slane %v4078_v40, 4  ;;  %v9544_v58 = vcombine.low %v8300_v60, %v8305_v48 }
 0x102   : > { %6715 = vmatmul.mubr.msk.bf16.gmra.mrb[8].mxu1 %vm748_vm3, %v5639_v63  ;;  %v1408_v63 = vrot.slane %v7376_v17, 5  ;;  %v4101_v17 = vrot.slane %v4099_v52, 4  ;;  %v4105_v52 = vshll.u32 %v8432_v12, 16  ;;  %v4112_v36 = vrot.slane %v4110_v3, 4 }
 0x103   : > { %6718 = vmatprep.mubr.msk.bf16.mxu1 %vm748_vm3, %v5640_v23  ;;  %v8434_v23 = vrot.slane %v4095_v50, 5  ;;  %v4055_v50 = vrot.slane %v4054_v38, 4  ;;  %v4115_v39 = vrot.slane %v4113_v35, 5  ;;  %v4119_v49 = vshll.u32 %v8443_v43, 16  ;;  %v8490_v35 = vld [vmem:[%s7591_s26 + $0x44] sm:$0x1] }
 0x104   : > { %v4123_v5 = vshrl.u32 %v8443_v43, 16  ;;  %v9545_v38 = vcombine.low %v8309_v41, %v8313_v37  ;;  %v9546_v9 = vrot.slane %v8379_v2, 9  ;;  %v8468_v48 = vsel %vm7976_vm7, %v5632_v61, %v1412_v22 }
 0x105   : > { %6885 = vmatmul.mubr.msk.bf16.gmra.mrb[8].mxu0 %vm748_vm3, %v7310_v55  ;;  %v4092_v55 = vor.u32 %v4091_v47, %v4088_v46  ;;  %v4102_v21 = vor.u32 %v4101_v17, %v8434_v23  ;;  %v4134_v40 = vshrl.u32 %v6035_v11, 16  ;;  %v4137_v46 = vshll.u32 %v6035_v11, 16  ;;  %v7313_v47 = vld [vmem:[%s7591_s26 + $0x78] sm:$0xff]   ;;  %v8516_v11 = vld [vmem:[%s7591_s26 + $0x50] sm:$0x1] }
 0x106   : > { %6888 = vmatprep.mubr.msk.bf16.mxu0 %vm748_vm3, %v7311_v18  ;;  %v7312_v18 = vld [vmem:[%s7591_s26 + $0x6c] sm:$0xff]   ;;  %v8464_v60 = vsel %vm7976_vm7, %v9546_v9, %v1405_v33  ;;  %v8473_v17 = vsel %vm7976_vm7, %v1407_v32, %v1408_v63  ;;  %v8477_v41 = vsel %vm7976_vm7, %v1414_v34, %v1415_v20  ;;  %v4050_v37 = vsel %vm7603_vm4, %v4045_v13, %v8402_v19  ;;  %v8541_v9 = vld [vmem:[%s7591_s26 + $0x64] sm:$0xf] }
 0x107   : > { %v4060_v22 = vsel %vm7603_vm4, %v4055_v50, %v4059_v1  ;;  %v4074_v2 = vsel %vm7603_vm4, %v4069_v10, %v8406_v16  ;;  %v4093_v33 = vrot.slane %v4092_v55, 4  ;;  %v4103_v61 = vrot.slane %v4102_v21, 4  ;;  %v8500_v16 = vld [vmem:[%s7591_s26 + $0x4c] sm:$0xf]  ;;  %v6038_v10 = vld [vmem:[%s7591_s26 + $0x54] sm:$0xf] }
 0x108   : > { %v4107_v63 = vrot.slane %v4105_v52, 5  ;;  %v4084_v3 = vsel %vm7603_vm4, %v4079_v15, %v4083_v14  ;;  %v4116_v32 = vor.u32 %v4115_v39, %v4112_v36  ;;  %v8492_v34 = vrot.slane %v4119_v49, 5  ;;  %v8528_v36 = vld [vmem:[%s7591_s26 + $0x58] sm:$0xf]  ;;  %v6041_v49 = vld [vmem:[%s7591_s26 + $0x60] sm:$0xf] }
 0x109   : > { %v4125_v19 = vrot.slane %v4123_v5, 4  ;;  %v4136_v1 = vrot.slane %v4134_v40, 4  ;;  %v4139_v13 = vrot.slane %v4137_v46, 5  ;;  %v8505_v50 = vcombine.low %v4050_v37, %v4060_v22  ;;  %v7314_v40 = vld [vmem:[%s7591_s26 + $0x84] sm:$0xff]   ;;  %v7315_v22 = vld [vmem:[%s7591_s26 + $0x90] sm:$0xff]  }
 0x10a   : > { %6719 = vmatmul.mubr.msk.bf16.gmra.mrb[12].mxu1 %vm748_vm3, %v9544_v58  ;;  %v8509_v14 = vsel %vm797_vm0, %v8332_v45, 0  ;;  %v8513_v52 = vsel %vm797_vm0, %v8271_v30, 0  ;;  %v8519_v15 = vcombine.low %v4074_v2, %v4084_v3  ;;  %v4098_v55 = vsel %vm7603_vm4, %v4093_v33, %v8434_v23  ;;  %v6047_v21 = vld [vmem:[%s7591_s26 + $0x78] sm:$0xf] }
 0x10b   : > { %6722 = vmatprep.mubr.msk.bf16.mxu1 %vm748_vm3, %v9545_v38  ;;  %v4108_v58 = vsel %vm7603_vm4, %v4103_v61, %v4107_v63  ;;  %v4129_v45 = vshll.u32 %v8490_v35, 16  ;;  %v9547_v30 = vcombine.low %v8319_v26, %v8323_v29  ;;  %v8535_v5 = vrot.slane %v4116_v32, 4 }
 0x10c   : > { %v4143_v23 = vshll.u32 %v8500_v16, 16  ;;  %v4147_v38 = vshrl.u32 %v8500_v16, 16  ;;  %v9548_v46 = vcombine.low %v8352_v51, %v8369_v62  ;;  %v4140_v26 = vor.u32 %v4139_v13, %v4136_v1 }
 0x10d   : > { %6889 = vmatmul.mubr.msk.bf16.gmra.mrb[12].mxu0 %vm748_vm3, %v7312_v18  ;;  %v4126_v18 = vor.u32 %v4125_v19, %v8492_v34  ;;  %v4153_v29 = vshll.u32 %v8516_v11, 16  ;;  %v4161_v37 = vshll.u32 %v6038_v10, 16  ;;  %v4167_v2 = vshll.u32 %v8528_v36, 16  ;;  %v6044_v19 = vld [vmem:[%s7591_s26 + $0x6c] sm:$0xf] }
 0x10e   : > { %6892 = vmatprep.mubr.msk.bf16.mxu0 %vm748_vm3, %v7313_v47  ;;  %v4158_v47 = vshrl.u32 %v6038_v10, 16  ;;  %v4171_v33 = vshrl.u32 %v8528_v36, 16  ;;  %v4182_v61 = vshrl.u32 %v6041_v49, 16  ;;  %v4185_v63 = vshll.u32 %v6041_v49, 16 }
 0x10f   : > { %v8552_v3 = vcombine.low %v4098_v55, %v4108_v58  ;;  %v8554_v51 = vrot.slane %v4129_v45, 5  ;;  %v4191_v62 = vshll.u32 %v8541_v9, 16  ;;  %v4195_v32 = vshrl.u32 %v8541_v9, 16  ;;  %v8566_v55 = vld [vmem:[%s7591_s26 + $0x5c] sm:$0x1] }
 0x110   : > { %v4122_v1 = vsel %vm7603_vm4, %v8535_v5, %v8492_v34  ;;  %v4127_v13 = vrot.slane %v4126_v18, 4  ;;  %v8563_v10 = vrot.slane %v4143_v23, 5  ;;  %v4149_v49 = vrot.slane %v4147_v38, 4  ;;  %v8569_v58 = vld [vmem:[%s7591_s26 + $0x70] sm:$0xf] }
 0x111   : > { %v8572_v45 = vrot.slane %v4140_v26, 4  ;;  %v4163_v39 = vrot.slane %v4161_v37, 5  ;;  %v8578_v34 = vrot.slane %v4167_v2, 5  ;;  %v4173_v5 = vrot.slane %v4171_v33, 4  ;;  %v8581_v18 = vld [vmem:[%s7591_s26 + $0x68] sm:$0x1] }
 0x112   : > { %6723 = vmatmul.mubr.msk.bf16.gmra.mrb[16].mxu1 %vm748_vm3, %v9547_v30  ;;  %v8574_v30 = vrot.slane %v4153_v29, 5  ;;  %v4184_v23 = vrot.slane %v4182_v61, 4  ;;  %v4187_v38 = vrot.slane %v4185_v63, 5  ;;  %v8583_v20 = vrot.slane %v4191_v62, 5  ;;  %v7316_v61 = vld [vmem:[%s7591_s26 + $0x9c] sm:$0xff]  }
 0x113   : > { %6726 = vmatprep.mubr.msk.bf16.mxu1 %vm748_vm3, %v9548_v46  ;;  %v4160_v46 = vrot.slane %v4158_v47, 4  ;;  %v4206_v26 = vshrl.u32 %v6044_v19, 16  ;;  %v4209_v29 = vshll.u32 %v6044_v19, 16  ;;  %v9549_v47 = vcombine.low %v8356_v24, %v8373_v56  ;;  %v7317_v19 = vld [vmem:[%s7591_s26 + $0xa8] sm:$0xff]  }
 0x114   : > { %v4215_v37 = vshll.u32 %v8569_v58, 16  ;;  %v4230_v2 = vshrl.u32 %v6047_v21, 16  ;;  %v4233_v33 = vshll.u32 %v6047_v21, 16  ;;  %v9550_v63 = vcombine.low %v8386_v44, %v8393_v27  ;;  %v6050_v27 = vld [vmem:[%s7591_s26 + $0x84] sm:$0xf] }
 0x115   : > { %6893 = vmatmul.mubr.msk.bf16.gmra.mrb[16].mxu0 %vm748_vm3, %v7314_v40  ;;  %v4197_v40 = vrot.slane %v4195_v32, 4  ;;  %v4132_v62 = vsel %vm7603_vm4, %v4127_v13, %v8554_v51  ;;  %v4150_v24 = vor.u32 %v4149_v49, %v8563_v10  ;;  %v4164_v56 = vor.u32 %v4163_v39, %v4160_v46 }
 0x116   : > { %6896 = vmatprep.mubr.msk.bf16.mxu0 %vm748_vm3, %v7315_v22  ;;  %v4219_v22 = vshrl.u32 %v8569_v58, 16  ;;  %v4177_v32 = vshll.u32 %v8566_v55, 16  ;;  %v4201_v21 = vshll.u32 %v8581_v18, 16  ;;  %v4243_v44 = vshrl.u32 %v8586_v59, 16 }
 0x117   : > { %v4198_v25 = vor.u32 %v4197_v40, %v8583_v20  ;;  %v4208_v51 = vrot.slane %v4206_v26, 4  ;;  %v4211_v13 = vrot.slane %v4209_v29, 5  ;;  %v8611_v49 = vrot.slane %v4215_v37, 5 }
 0x118   : > { %v4221_v39 = vrot.slane %v4219_v22, 4  ;;  %v4232_v46 = vrot.slane %v4230_v2, 4  ;;  %v4235_v54 = vrot.slane %v4233_v33, 5  ;;  %v4179_v7 = vrot.slane %v4177_v32, 5  ;;  %v8623_v33 = vld [vmem:[%s7591_s26 + $0x80] sm:$0x1] }
 0x119   : > { %v4254_v53 = vshrl.u32 %v6050_v27, 16  ;;  %v4257_v6 = vshll.u32 %v6050_v27, 16  ;;  %v8618_v40 = vrot.slane %v4239_v4, 5  ;;  %v4245_v26 = vrot.slane %v4243_v44, 4  ;;  %v7318_v32 = vld [vmem:[%s7591_s26 + $0xb4] sm:$0xff]  }
 0x11a   : > { %6727 = vmatmul.mubr.msk.bf16.gmra.mrb[20].mxu1 %vm748_vm3, %v9549_v47  ;;  %v4174_v47 = vor.u32 %v4173_v5, %v8578_v34  ;;  %v4151_v5 = vrot.slane %v4150_v24, 4  ;;  %v8620_v29 = vcombine.low %v4122_v1, %v4132_v62  ;;  %v4199_v22 = vrot.slane %v4198_v25, 4  ;;  %v8632_v62 = vld [vmem:[%s7591_s26 + $0x88] sm:$0xf]  ;;  %v6053_v44 = vld [vmem:[%s7591_s26 + $0x90] sm:$0xf] }
 0x11b   : > { %6730 = vmatprep.mubr.msk.bf16.mxu1 %vm748_vm3, %v9550_v63  ;;  %v4188_v63 = vor.u32 %v4187_v38, %v4184_v23  ;;  %v4165_v23 = vrot.slane %v4164_v56, 4  ;;  %v4203_v2 = vrot.slane %v4201_v21, 5  ;;  %v4212_v24 = vor.u32 %v4211_v13, %v4208_v51  ;;  %v8674_v13 = vld [vmem:[%s7591_s26 + $0x94] sm:$0xf] }
 0x11c   : > { %v4175_v38 = vrot.slane %v4174_v47, 4  ;;  %v4222_v56 = vor.u32 %v4221_v39, %v8611_v49  ;;  %v4225_v4 = vshll.u32 %v8615_v28, 16  ;;  %v4236_v1 = vor.u32 %v4235_v54, %v4232_v46  ;;  %v7319_v54 = vld [vmem:[%s7591_s26 + $0xc0] sm:$0xff]  }
 0x11d   : > { %6897 = vmatmul.mubr.msk.bf16.gmra.mrb[20].mxu0 %vm748_vm3, %v7316_v61  ;;  %v4189_v37 = vrot.slane %v4188_v63, 4  ;;  %v9551_v61 = vcombine.low %v8416_v57, %v8438_v8  ;;  %v9552_v25 = vcombine.low %v8464_v60, %v8473_v17  ;;  %v4146_v57 = vsel %vm7603_vm4, %v8572_v45, %v8563_v10  ;;  %v8655_v45 = vld [vmem:[%s7591_s26 + $0x8c] sm:$0x1] }
 0x11e   : > { %6900 = vmatprep.mubr.msk.bf16.mxu0 %vm748_vm3, %v7317_v19  ;;  %v4156_v8 = vsel %vm7603_vm4, %v4151_v5, %v8574_v30  ;;  %v4256_v19 = vrot.slane %v4254_v53, 4  ;;  %v4259_v47 = vrot.slane %v4257_v6, 5  ;;  %v4170_v21 = vsel %vm7603_vm4, %v4165_v23, %v8578_v34 }
 0x11f   : > { %v4180_v60 = vsel %vm7603_vm4, %v4175_v38, %v4179_v7  ;;  %v4246_v17 = vor.u32 %v4245_v26, %v8618_v40  ;;  %v4249_v10 = vshll.u32 %v8623_v33, 16  ;;  %v4194_v6 = vsel %vm7603_vm4, %v4189_v37, %v8583_v20  ;;  %v7321_v20 = vld [vmem:[%s7591_s26 + $0xc] sm:$0xff]  }
 0x120   : > { %v4204_v53 = vsel %vm7603_vm4, %v4199_v22, %v4203_v2  ;;  %v4263_v30 = vshll.u32 %v8632_v62, 16  ;;  %v4267_v34 = vshrl.u32 %v8632_v62, 16  ;;  %v8665_v27 = vrot.slane %v4212_v24, 4  ;;  %v6106_v2 = vld [vmem:[%s7591_s26 + $0x30] sm:$0xe] }
 0x121   : > { %v8667_v7 = vrot.slane %v4222_v56, 4  ;;  %v8669_v63 = vrot.slane %v4225_v4, 5  ;;  %v8671_v51 = vrot.slane %v4236_v1, 4  ;;  %v8678_v39 = vcombine.low %v4146_v57, %v4156_v8  ;;  %v7320_v8 = vld [vmem:[%s7591_s26 + $0xcc] sm:$0xff]  }
 0x122   : > { %6731 = vmatmul.mubr.msk.bf16.gmra.mrb[24].mxu1 %vm748_vm3, %v9551_v61  ;;  %v4260_v46 = vor.u32 %v4259_v47, %v4256_v19  ;;  %v4273_v5 = vshll.u32 %v8655_v45, 16  ;;  %v4278_v23 = vshrl.u32 %v6053_v44, 16  ;;  %v8682_v38 = vcombine.low %v4170_v21, %v4180_v60 }
 0x123   : > { %6734 = vmatprep.mubr.msk.bf16.mxu1 %vm748_vm3, %v9552_v25  ;;  %v8684_v26 = vrot.slane %v4246_v17, 4  ;;  %v8686_v37 = vrot.slane %v4249_v10, 5  ;;  %v4281_v22 = vshll.u32 %v6053_v44, 16  ;;  %v8689_v61 = vcombine.low %v4194_v6, %v4204_v53  ;;  %v6108_v6 = vld [vmem:[%s7591_s26 + $0x48] sm:$0xe] }
 0x124   : > { %v8691_v24 = vrot.slane %v4263_v30, 5  ;;  %v8693_v56 = vrot.slane %v4267_v34, 4  ;;  %v4287_v4 = vshll.u32 %v8674_v13, 16  ;;  %v9553_v1 = vcombine.low %v8468_v48, %v8477_v41  ;;  %v6107_v41 = vld [vmem:[%s7591_s26 + $0x3c] sm:$0xe] }
 0x125   : > { %6901 = vmatmul.mubr.msk.bf16.gmra.mrb[24].mxu0 %vm748_vm3, %v7318_v32  ;;  %v4291_v48 = vshrl.u32 %v8674_v13, 16  ;;  %v8716_v19 = vrot.slane %v4260_v46, 4  ;;  %v8718_v47 = vrot.slane %v4273_v5, 5  ;;  %v6122_v21 = vrot.slane %v6106_v2, 9  ;;  %v6109_v46 = vld [vmem:[%s7591_s26 + $0x54] sm:$0xe] }
 0x126   : > { %6904 = vmatprep.mubr.msk.bf16.mxu0 %vm748_vm3, %v7319_v54  ;;  %v8720_v54 = vrot.slane %v4278_v23, 4  ;;  %v8726_v17 = vrot.slane %v4281_v22, 5  ;;  %v4795_v10 = vrot.slane %v8399_v0, 5  ;;  %v4798_v44 = vrot.slane %v8432_v12, 5  ;;  %v7322_v5 = vld [vmem:[%s7591_s26 + $0x18] sm:$0xff]   ;;  %v7323_v2 = vld [vmem:[%s7591_s26 + $0x24] sm:$0xff]  }
 0x127   : > { %v8733_v30 = vrot.slane %v4287_v4, 5  ;;  %v6123_v34 = vrot.slane %v6107_v41, 9  ;;  %v8738_v23 = vrot.slane %v4291_v48, 4  ;;  %v4805_v12 = vrot.slane %v8490_v35, 5  ;;  %v6118_v32 = vld [vmem:[%s7591_s26 + $0xc0] sm:$0xe] }
 0x128   : > { %v8742_v22 = vsel %vm7976_vm7, %v6122_v21, %v4795_v10  ;;  %v4797_v0 = vrot.slane %v4795_v10, 4  ;;  %v4809_v48 = vrot.slane %v8500_v16, 5  ;;  %v4812_v35 = vrot.slane %v8516_v11, 5  ;;  %v6110_v10 = vld [vmem:[%s7591_s26 + $0x60] sm:$0xe] }
 0x129   : > { %v4816_v21 = vrot.slane %v8528_v36, 5  ;;  %v6119_v53 = vld [vmem:[%s7591_s26 + $0xcc] sm:$0xe]  ;;  %v8940_v25 = vld [vmem:[%s7591_s26 + $0xd4] sm:$0x1] }
 0x12a   : > { %6735 = vmatmul.mubr.msk.bf16.gmra.mrb[28].mxu1 %vm748_vm3, %v9553_v1  ;;  %v6124_v1 = vrot.slane %v6108_v6, 9  ;;  %v8756_v41 = vsel %vm7976_vm7, %v4797_v0, %v4798_v44  ;;  %v4811_v44 = vrot.slane %v4809_v48, 4  ;;  %v6111_v6 = vld [vmem:[%s7591_s26 + $0x6c] sm:$0xe] }
 0x12b   : > { %6740 = vmatprep.mubr.msk.bf16.mxu1 %vm748_vm3, %v7321_v20  ;;  %v4802_v20 = vrot.slane %v8443_v43, 5 }
 0x12c   : > { %v8784_v0 = vsel %vm7976_vm7, %v4811_v44, %v4812_v35 }
 0x12d   : > { %6905 = vmatmul.mubr.msk.bf16.gmra.mrb[28].mxu0 %vm748_vm3, %v7320_v8  ;;  %v8749_v4 = vsel %vm7976_vm7, %v6123_v34, %v4802_v20  ;;  %v4804_v43 = vrot.slane %v4802_v20, 4  ;;  %v6125_v8 = vrot.slane %v6109_v46, 9  ;;  %v4818_v20 = vrot.slane %v4816_v21, 4  ;;  %v7326_v34 = vld [vmem:[%s7591_s26 + $0x48] sm:$0xff]  }
 0x12e   : > { %6910 = vmatprep.mubr.msk.bf16.mxu0 %vm748_vm3, %v8505_v50  ;;  %v8769_v50 = vsel %vm7976_vm7, %v6124_v1, %v4809_v48  ;;  %v4819_v46 = vrot.slane %v8566_v55, 5  ;;  %v6112_v1 = vld [vmem:[%s7591_s26 + $0x78] sm:$0xe]  ;;  %v6127_v55 = vrot.slane %v6111_v6, 9 }
 0x12f   : > { %v8765_v16 = vsel %vm7976_vm7, %v4804_v43, %v4805_v12  ;;  %v8777_v36 = vsel %vm7976_vm7, %v6125_v8, %v4816_v21  ;;  %v4823_v12 = vrot.slane %v8541_v9, 5  ;;  %v4826_v43 = vrot.slane %v8581_v18, 5  ;;  %v6113_v8 = vld [vmem:[%s7591_s26 + $0x84] sm:$0xe] }
 0x130   : > { %v4833_v21 = vrot.slane %v8615_v28, 5  ;;  %v4840_v28 = vrot.slane %v8623_v33, 5  ;;  %v9575_v42 = vcombine.low %v8749_v4, %v8765_v16  ;;  %v9581_v16 = vld [vmem:[#allocation15_spill] sm:$0xff] }
 0x131   : > { %v4825_v18 = vrot.slane %v4823_v12, 4 }
 0x132   : > { %6741 = vmatmul.mubr.msk.bf16.vlgmr.msra.gmra.mrb[0].mxu1 %vm748_vm3, %v7322_v5  ;;  %v6126_v5 = vrot.slane %v6110_v10, 9  ;;  %v7324_v10 = vld [vmem:[%s7591_s26 + $0x30] sm:$0xff]  }
 0x133   : > { %6807 = vmatpush3.bf16.msra.mxu1 %v8513_v52  ;;  %6744 = vmatprep.mubr.msk.bf16.mxu1 %vm748_vm3, %v7323_v2  ;;  %v8793_v52 = vsel %vm7976_vm7, %v4818_v20, %v4819_v46  ;;  %v4830_v2 = vrot.slane %v8569_v58, 5  ;;  %v6128_v58 = vrot.slane %v6112_v1, 9  ;;  %v4837_v20 = vrot.slane %v8586_v59, 5  ;;  %v7325_v46 = vld [vmem:[%s7591_s26 + $0x3c] sm:$0xff]   ;;  %v8835_v1 = vld [vmem:[%s7591_s26 + $0x98] sm:$0x1] }
 0x134   : > { %v8801_v9 = vsel %vm7976_vm7, %v6126_v5, %v4823_v12  ;;  %v8815_v5 = vsel %vm7976_vm7, %v4825_v18, %v4826_v43  ;;  %v6129_v12 = vrot.slane %v6113_v8, 9  ;;  %v6115_v43 = vld [vmem:[%s7591_s26 + $0x9c] sm:$0xe]  ;;  %v6116_v59 = vld [vmem:[%s7591_s26 + $0xa8] sm:$0xe] }
 0x135   : > { %v8807_v44 = vsel %vm7976_vm7, %v6127_v55, %v4830_v2  ;;  %v4832_v6 = vrot.slane %v4830_v2, 4  ;;  %6911 = vmatmul.mubr.msk.bf16.vlgmr.msra.gmra.mrb[0].mxu0 %vm748_vm3, %v8519_v15  ;;  %v4844_v55 = vrot.slane %v8632_v62, 5  ;;  %v6114_v2 = vld [vmem:[%s7591_s26 + $0x90] sm:$0xe]  ;;  %v8831_v33 = vsel %vm7976_vm7, %v6128_v58, %v4837_v20 }
 0x136   : > { %6943 = vmatpush3.bf16.msra.mxu0 %v8509_v14  ;;  %6914 = vmatprep.mubr.msk.bf16.mxu0 %vm748_vm3, %v8552_v3  ;;  %v4839_v62 = vrot.slane %v4837_v20, 4  ;;  %v8838_v14 = vld [vmem:[%s7591_s26 + $0xa0] sm:$0xf]  ;;  %v6130_v58 = vrot.slane %v6114_v2, 9  ;;  %v4851_v20 = vrot.slane %v8674_v13, 5  ;;  %v4854_v3 = vrot.slane %v8835_v1, 5 }
 0x137   : > { %v8827_v15 = vsel %vm7976_vm7, %v4832_v6, %v4833_v21  ;;  %v8844_v8 = vsel %vm7976_vm7, %v6129_v12, %v4844_v55  ;;  %v4846_v18 = vrot.slane %v4844_v55, 4  ;;  %v4847_v21 = vrot.slane %v8655_v45, 5  ;;  %v8857_v12 = vld [vmem:[%s7591_s26 + $0xa4] sm:$0x1]  ;;  %v6117_v13 = vld [vmem:[%s7591_s26 + $0xb4] sm:$0xe] }
 0x138   : > { %9554 = vst [vmem:[#allocation24_spill] sm:$0xff] %v8844_v8  ;;  %v8850_v6 = vsel %vm7976_vm7, %v4839_v62, %v4840_v28  ;;  %v6131_v28 = vrot.slane %v6115_v43, 9  ;;  %v4858_v55 = vrot.slane %v8838_v14, 5  ;;  %v8868_v2 = vld [vmem:[%s7591_s26 + $0xac] sm:$0xf]  ;;  %v8877_v45 = vsel %vm7976_vm7, %v6130_v58, %v4851_v20 }
 0x139   : > { %v8871_v62 = vld [vmem:[%s7591_s26 + $0xb8] sm:$0xf]  ;;  %9556 = vst [vmem:[#allocation26_spill] sm:$0xff] %v8877_v45  ;;  %v4861_v43 = vrot.slane %v8857_v12, 5  ;;  %v6132_v11 = vrot.slane %v6116_v59, 9  ;;  %v6133_v57 = vrot.slane %v6117_v13, 9  ;;  %v9580_v4 = vcombine.low %v8801_v9, %v8815_v5 }
 0x13a   : > { %6745 = vmatmul.mubr.msk.bf16.gmra.mrb[4].mxu1 %vm748_vm3, %v7324_v10  ;;  %v8863_v10 = vsel %vm7976_vm7, %v4846_v18, %v4847_v21  ;;  %v4853_v18 = vrot.slane %v4851_v20, 4  ;;  %v8881_v21 = vld [vmem:[%s7591_s26 + $0xb0] sm:$0x1]  ;;  %v8885_v35 = vsel %vm7976_vm7, %v6131_v28, %v4858_v55  ;;  %v4860_v48 = vrot.slane %v4858_v55, 4  ;;  %v7327_v59 = vld [vmem:[%s7591_s26 + $0x54] sm:$0xff]  }
 0x13b   : > { %6748 = vmatprep.mubr.msk.bf16.mxu1 %vm748_vm3, %v7325_v46  ;;  %9555 = vst [vmem:[#allocation25_spill] sm:$0xff] %v8863_v10  ;;  %9557 = vst [vmem:[#allocation27_spill] sm:$0xff] %v8885_v35  ;;  %v4865_v46 = vrot.slane %v8868_v2, 5  ;;  %v4868_v20 = vrot.slane %v8881_v21, 5  ;;  %v4872_v60 = vrot.slane %v8871_v62, 5  ;;  %v9586_v9 = vld [vmem:[#allocation18_spill] sm:$0xff] }
 0x13c   : > { %v8891_v58 = vsel %vm7976_vm7, %v4853_v18, %v4854_v3  ;;  %v6056_v28 = vld [vmem:[%s7591_s26 + $0x9c] sm:$0xf]  ;;  %v8907_v3 = vsel %vm7976_vm7, %v4860_v48, %v4861_v43  ;;  %v8920_v10 = vld [vmem:[%s7591_s26 + $0xc8] sm:$0x1] }
 0x13d   : > { %9558 = vst [vmem:[#allocation28_spill] sm:$0xff] %v8891_v58  ;;  %6915 = vmatmul.mubr.msk.bf16.gmra.mrb[4].mxu0 %vm748_vm3, %v8620_v29  ;;  %v8901_v55 = vld [vmem:[%s7591_s26 + $0xbc] sm:$0x1]  ;;  %9559 = vst [vmem:[#allocation29_spill] sm:$0xff] %v8907_v3  ;;  %v8911_v13 = vsel %vm7976_vm7, %v6132_v11, %v4865_v46  ;;  %v4867_v18 = vrot.slane %v4865_v46, 4  ;;  %v8926_v48 = vsel %vm7976_vm7, %v6133_v57, %v4872_v60  ;;  %v4874_v11 = vrot.slane %v4872_v60, 4 }
 0x13e   : > { %9560 = vst [vmem:[#allocation30_spill] sm:$0xff] %v8911_v13  ;;  %6918 = vmatprep.mubr.msk.bf16.mxu0 %vm748_vm3, %v8678_v39  ;;  %v8917_v29 = vld [vmem:[%s7591_s26 + $0xc4] sm:$0xf]  ;;  %9561 = vst [vmem:[#allocation31_spill] sm:$0xff] %v8926_v48  ;;  %v4875_v43 = vrot.slane %v8901_v55, 5  ;;  %v6134_v58 = vrot.slane %v6118_v32, 9 }
 0x13f   : > { %v8930_v46 = vld [vmem:[%s7591_s26 + $0xd0] sm:$0xf]  ;;  %v8934_v39 = vsel %vm7976_vm7, %v4867_v18, %v4868_v20  ;;  %v4879_v45 = vrot.slane %v8917_v29, 5  ;;  %v4882_v8 = vrot.slane %v8920_v10, 5  ;;  %v6135_v3 = vrot.slane %v6119_v53, 9  ;;  %v9587_v5 = vld [vmem:[#allocation24_spill] sm:$0xff] }
 0x140   : > { %9562 = vst [vmem:[#allocation32_spill] sm:$0xff] %v8934_v39  ;;  %v8946_v60 = vsel %vm7976_vm7, %v4874_v11, %v4875_v43  ;;  %v4886_v20 = vrot.slane %v8930_v46, 5  ;;  %v6059_v32 = vld [vmem:[%s7591_s26 + $0xa8] sm:$0xf]  ;;  %v4889_v57 = vrot.slane %v8940_v25, 5  ;;  %v4302_v11 = vshrl.u32 %v6056_v28, 16 }
 0x141   : > { %9563 = vst [vmem:[#allocation33_spill] sm:$0xff] %v8946_v60  ;;  %v4881_v35 = vrot.slane %v4879_v45, 4  ;;  %v4305_v43 = vshll.u32 %v6056_v28, 16  ;;  %v4311_v18 = vshll.u32 %v8838_v14, 16  ;;  %v7328_v60 = vld [vmem:[%s7591_s26 + $0x60] sm:$0xff]   ;;  %v4326_v48 = vshrl.u32 %v6059_v32, 16 }
 0x142   : > { %6749 = vmatmul.mubr.msk.bf16.gmra.mrb[8].mxu1 %vm748_vm3, %v7326_v34  ;;  %v8955_v34 = vsel %vm7976_vm7, %v6134_v58, %v4879_v45  ;;  %v8960_v53 = vsel %vm7976_vm7, %v6135_v3, %v4886_v20  ;;  %v4888_v39 = vrot.slane %v4886_v20, 4  ;;  %v4315_v58 = vshrl.u32 %v8838_v14, 16 }
 0x143   : > { %6752 = vmatprep.mubr.msk.bf16.mxu1 %vm748_vm3, %v7327_v59  ;;  %v9564_v59 = vor.u32 %v8693_v56, %v8691_v24  ;;  %v8969_v45 = vsel %vm7976_vm7, %v4881_v35, %v4882_v8  ;;  %v4329_v28 = vshll.u32 %v6059_v32, 16  ;;  %v7329_v56 = vld [vmem:[%s7591_s26 + $0x6c] sm:$0xff]   ;;  %v4297_v14 = vshll.u32 %v8835_v1, 16 }
 0x144   : > { %v6151_v3 = vcombine.low %v8955_v34, %v8969_v45  ;;  %v8976_v20 = vsel %vm7976_vm7, %v4888_v39, %v4889_v57  ;;  %v4339_v35 = vshrl.u32 %v8868_v2, 16  ;;  %v4284_v39 = vor.u32 %v8726_v17, %v8720_v54 }
 0x145   : > { %v4271_v13 = vrot.slane %v9564_v59, 4  ;;  %6919 = vmatmul.mubr.msk.bf16.gmra.mrb[8].mxu0 %vm748_vm3, %v8682_v38  ;;  %v4335_v59 = vshll.u32 %v8868_v2, 16  ;;  %v6152_v8 = vcombine.low %v8960_v53, %v8976_v20  ;;  %v4294_v57 = vor.u32 %v8738_v23, %v8733_v30 }
 0x146   : > { %6922 = vmatprep.mubr.msk.bf16.mxu0 %vm748_vm3, %v8689_v61  ;;  %v4304_v38 = vrot.slane %v4302_v11, 4  ;;  %v4307_v32 = vrot.slane %v4305_v43, 5  ;;  %v9565_v1 = vsel %vm7603_vm4, %v8667_v7, %v8669_v63  ;;  %v9566_v2 = vsel %vm7603_vm4, %v8665_v27, %v8611_v49 }
 0x147   : > { %v6079_v61 = vcombine.low %v9566_v2, %v9565_v1  ;;  %v4266_v54 = vsel %vm7603_vm4, %v8716_v19, %v8691_v24  ;;  %v4276_v17 = vsel %vm7603_vm4, %v4271_v13, %v8718_v47  ;;  %v9010_v23 = vrot.slane %v4311_v18, 5  ;;  %v6065_v1 = vld [vmem:[%s7591_s26 + $0xc0] sm:$0xf] }
 0x148   : > { %v4317_v7 = vrot.slane %v4315_v58, 4  ;;  %v4328_v63 = vrot.slane %v4326_v48, 4  ;;  %v4331_v11 = vrot.slane %v4329_v28, 5  ;;  %v9567_v49 = vsel %vm7603_vm4, %v8684_v26, %v8686_v37  ;;  %v6062_v48 = vld [vmem:[%s7591_s26 + $0xb4] sm:$0xf]  ;;  %v7330_v26 = vld [vmem:[%s7591_s26 + $0x78] sm:$0xff]  }
 0x149   : > { %v9568_v27 = vsel %vm7603_vm4, %v8671_v51, %v8618_v40  ;;  %v4299_v19 = vrot.slane %v4297_v14, 5  ;;  %v9023_v47 = vrot.slane %v4335_v59, 5  ;;  %v4341_v13 = vrot.slane %v4339_v35, 4  ;;  %v7331_v14 = vld [vmem:[%s7591_s26 + $0x84] sm:$0xff]  }
 0x14a   : > { %6753 = vmatmul.mubr.msk.bf16.gmra.mrb[12].mxu1 %vm748_vm3, %v7328_v60  ;;  %v6080_v24 = vcombine.low %v9568_v27, %v9567_v49  ;;  %v4285_v60 = vrot.slane %v4284_v39, 4  ;;  %v4295_v18 = vrot.slane %v4294_v57, 4  ;;  %v4308_v43 = vor.u32 %v4307_v32, %v4304_v38 }
 0x14b   : > { %6756 = vmatprep.mubr.msk.bf16.mxu1 %vm748_vm3, %v7329_v56  ;;  %v4321_v58 = vshll.u32 %v8857_v12, 16  ;;  %v6081_v28 = vcombine.low %v4266_v54, %v4276_v17  ;;  %v4318_v37 = vor.u32 %v4317_v7, %v9010_v23  ;;  %v4332_v56 = vor.u32 %v4331_v11, %v4328_v63 }
 0x14c   : > { %v4345_v40 = vshll.u32 %v8881_v21, 16  ;;  %v4350_v51 = vshrl.u32 %v6062_v48, 16  ;;  %v4342_v59 = vor.u32 %v4341_v13, %v9023_v47  ;;  %v4353_v35 = vshll.u32 %v6062_v48, 16 }
 0x14d   : > { %6923 = vmatmul.mubr.msk.bf16.gmra.mrb[12].mxu0 %vm748_vm3, %v6079_v61  ;;  %v4359_v39 = vshll.u32 %v8871_v62, 16  ;;  %v4363_v57 = vshrl.u32 %v8871_v62, 16  ;;  %v4290_v12 = vsel %vm7603_vm4, %v4285_v60, %v8733_v30  ;;  %v4300_v21 = vsel %vm7603_vm4, %v4295_v18, %v4299_v19  ;;  %v6068_v18 = vld [vmem:[%s7591_s26 + $0xcc] sm:$0xf] }
 0x14e   : > { %6926 = vmatprep.mubr.msk.bf16.mxu0 %vm748_vm3, %v6080_v24  ;;  %v4309_v38 = vrot.slane %v4308_v43, 4  ;;  %v4323_v32 = vrot.slane %v4321_v58, 5  ;;  %v4374_v2 = vshrl.u32 %v6065_v1, 16  ;;  %v4377_v61 = vshll.u32 %v6065_v1, 16  ;;  %v7332_v43 = vld [vmem:[%s7591_s26 + $0x90] sm:$0xff]  }
 0x14f   : > { %v4383_v54 = vshll.u32 %v8917_v29, 16  ;;  %v4387_v17 = vshrl.u32 %v8917_v29, 16  ;;  %v4319_v62 = vrot.slane %v4318_v37, 4  ;;  %v4333_v7 = vrot.slane %v4332_v56, 4  ;;  %v7333_v56 = vld [vmem:[%s7591_s26 + $0x9c] sm:$0xff]  }
 0x150   : > { %v4347_v63 = vrot.slane %v4345_v40, 5  ;;  %v4352_v11 = vrot.slane %v4350_v51, 4  ;;  %v4343_v30 = vrot.slane %v4342_v59, 4  ;;  %v4355_v49 = vrot.slane %v4353_v35, 5 }
 0x151   : > { %v4361_v27 = vrot.slane %v4359_v39, 5  ;;  %v4365_v24 = vrot.slane %v4363_v57, 4  ;;  %v6082_v19 = vcombine.low %v4290_v12, %v4300_v21  ;;  %v4376_v13 = vrot.slane %v4374_v2, 4 }
 0x152   : > { %6757 = vmatmul.mubr.msk.bf16.gmra.mrb[16].mxu1 %vm748_vm3, %v7330_v26  ;;  %v4379_v48 = vrot.slane %v4377_v61, 5  ;;  %v4385_v60 = vrot.slane %v4383_v54, 5  ;;  %v4389_v29 = vrot.slane %v4387_v17, 4  ;;  %v4314_v58 = vsel %vm7603_vm4, %v4309_v38, %v9010_v23 }
 0x153   : > { %6760 = vmatprep.mubr.msk.bf16.mxu1 %vm748_vm3, %v7331_v14  ;;  %v4324_v26 = vsel %vm7603_vm4, %v4319_v62, %v4323_v32  ;;  %v4369_v37 = vshll.u32 %v8901_v55, 16  ;;  %v4338_v40 = vsel %vm7603_vm4, %v4333_v7, %v9023_v47  ;;  %v4348_v51 = vsel %vm7603_vm4, %v4343_v30, %v4347_v63 }
 0x154   : > { %v4356_v1 = vor.u32 %v4355_v49, %v4352_v11  ;;  %v4366_v14 = vor.u32 %v4365_v24, %v4361_v27  ;;  %v4398_v23 = vshrl.u32 %v6068_v18, 16  ;;  %v4401_v59 = vshll.u32 %v6068_v18, 16  ;;  %v7335_v11 = vld [vmem:[%s7591_s26 + $0xb4] sm:$0xff]  }
 0x155   : > { %6927 = vmatmul.mubr.msk.bf16.gmra.mrb[16].mxu0 %vm748_vm3, %v6081_v28  ;;  %v4407_v35 = vshll.u32 %v8930_v46, 16  ;;  %v4411_v55 = vshrl.u32 %v8930_v46, 16  ;;  %v4380_v39 = vor.u32 %v4379_v48, %v4376_v13  ;;  %v4390_v28 = vor.u32 %v4389_v29, %v4385_v60  ;;  %v7378_v29 = vld [vmem:[%s7591_s26 + $0x1c] sm:$0xf]  ;;  %v6104_v18 = vld [vmem:[%s7591_s26 + $0x18] sm:$0xe] }
 0x156   : > { %6930 = vmatprep.mubr.msk.bf16.mxu0 %vm748_vm3, %v6082_v19  ;;  %v4393_v57 = vshll.u32 %v8920_v10, 16  ;;  %v6083_v47 = vcombine.low %v4314_v58, %v4324_v26  ;;  %v6084_v12 = vcombine.low %v4338_v40, %v4348_v51  ;;  %v4357_v21 = vrot.slane %v4356_v1, 4  ;;  %v7334_v10 = vld [vmem:[%s7591_s26 + $0xa8] sm:$0xff]   ;;  %v7379_v40 = vld [vmem:[%s7591_s26 + $0x20] sm:$0x1] }
 0x157   : > { %v4367_v38 = vrot.slane %v4366_v14, 4  ;;  %v4371_v32 = vrot.slane %v4369_v37, 5  ;;  %v4400_v2 = vrot.slane %v4398_v23, 4  ;;  %v4403_v61 = vrot.slane %v4401_v59, 5  ;;  %v7336_v1 = vld [vmem:[%s7591_s26 + $0xc0] sm:$0xff]  }
 0x158   : > { %v4409_v54 = vrot.slane %v4407_v35, 5  ;;  %v4413_v46 = vrot.slane %v4411_v55, 4  ;;  %v4381_v17 = vrot.slane %v4380_v39, 4  ;;  %v4391_v62 = vrot.slane %v4390_v28, 4  ;;  %v7380_v59 = vld [vmem:[%s7591_s26 + $0x28] sm:$0xf] }
 0x159   : > { %v4395_v7 = vrot.slane %v4393_v57, 5  ;;  %v4362_v63 = vsel %vm7603_vm4, %v4357_v21, %v4361_v27  ;;  %v4372_v30 = vsel %vm7603_vm4, %v4367_v38, %v4371_v32  ;;  %v4404_v49 = vor.u32 %v4403_v61, %v4400_v2  ;;  %v6105_v28 = vld [vmem:[%s7591_s26 + $0x24] sm:$0xe]  ;;  %s9257_s26 = sand.u32 1, %s7468_s22  }
 0x15a   : > { %6761 = vmatmul.mubr.msk.bf16.gmra.mrb[20].mxu1 %vm748_vm3, %v7332_v43  ;;  %v4414_v24 = vor.u32 %v4413_v46, %v4409_v54  ;;  %v4417_v19 = vshll.u32 %v8940_v25, 16  ;;  %v4386_v13 = vsel %vm7603_vm4, %v4381_v17, %v4385_v60  ;;  %v4781_v27 = vrot.slane %v7378_v29, 5  ;;  %v9571_v17 = vld [vmem:[#allocation10_spill] sm:$0xff]  ;;  %s5549_s28 = sshll.u32 %s9257_s26, 7  ;;  %s5422_s17 = scalar_lea.sflag [#allocation5], %s9257_s26 }
 0x15b   : > { %6764 = vmatprep.mubr.msk.bf16.mxu1 %vm748_vm3, %v7333_v56  ;;  %v4396_v48 = vsel %vm7603_vm4, %v4391_v62, %v4395_v7  ;;  %v6085_v43 = vcombine.low %v4362_v63, %v4372_v30  ;;  %v4405_v26 = vrot.slane %v4404_v49, 4  ;;  %v6120_v56 = vrot.slane %v6104_v18, 9  ;;  %v9573_v7 = vld [vmem:[#allocation11_spill] sm:$0xff]  ;;  %v9588_v30 = vld [vmem:[#allocation25_spill] sm:$0xff]  ;;  %v9598_v29 = vld [vmem:[#allocation30_spill] sm:$0xff]  ;;  %s9271_s10 = scalar_lea.vmem [#allocation4], %s5549_s28 }
 0x15c   : > { %v6086_v58 = vcombine.low %v4386_v13, %v4396_v48  ;;  %v4415_v25 = vrot.slane %v4414_v24, 4  ;;  %v4419_v37 = vrot.slane %v4417_v19, 5  ;;  %v4783_v60 = vrot.slane %v4781_v27, 4  ;;  %v9590_v24 = vld [vmem:[#allocation26_spill] sm:$0xff]  ;;  %v9593_v19 = vld [vmem:[#allocation19_spill] sm:$0xff]  ;;  %v9596_v13 = vld [vmem:[#allocation29_spill] sm:$0xff] }
 0x15d   : > { %6931 = vmatmul.mubr.msk.bf16.gmra.mrb[20].mxu0 %vm748_vm3, %v6083_v47  ;;  %v4784_v51 = vrot.slane %v7379_v40, 5  ;;  %v4410_v14 = vsel %vm7603_vm4, %v4405_v26, %v4409_v54  ;;  %v4788_v35 = vrot.slane %v7380_v59, 5  ;;  %v4782_v55 = vsel %vm7976_vm7, %v6120_v56, %v4781_v27  ;;  %v9569_v47 = vld [vmem:[#allocation8_spill] sm:$0xff]  ;;  %v9570_v54 = vld [vmem:[#allocation9_spill] sm:$0xff]  ;;  %v9603_v26 = vld [vmem:[#allocation31_spill] sm:$0xff]  ;;  %s9288_s11 = scalar_lea.vmem [#allocation2], %s5549_s28 }
 0x15e   : > { %6934 = vmatprep.mubr.msk.bf16.mxu0 %vm748_vm3, %v6084_v12  ;;  %v4420_v23 = vsel %vm7603_vm4, %v4415_v25, %v4419_v37  ;;  %v6121_v21 = vrot.slane %v6105_v28, 9  ;;  %v4791_v32 = vrot.slane %v7381_v31, 5  ;;  %v9572_v62 = vcombine.low %v8742_v22, %v8756_v41  ;;  %v9578_v22 = vld [vmem:[#allocation14_spill] sm:$0xff]  ;;  %v9599_v27 = vld [vmem:[#allocation32_spill] sm:$0xff]  ;;  %v9604_v25 = vld [vmem:[#allocation33_spill] sm:$0xff]  ;;  %s5451_s13 = sshll.u32 %s9271_s10, 4  ;;  %s9393_s13 = int_to_ptr.vmem [resolvable:$true] %s5451_s13 }
 0x15f   : > { %v4785_v39 = vsel %vm7976_vm7, %v4783_v60, %v4784_v51  ;;  %v6087_v57 = vcombine.low %v4410_v14, %v4420_v23  ;;  %v4790_v38 = vrot.slane %v4788_v35, 4  ;;  %v9576_v63 = vcombine.low %v8769_v50, %v8784_v0  ;;  %v9582_v50 = vld [vmem:[#allocation16_spill] sm:$0xff]  ;;  %v9606_v56 = vld [vmem:[#allocation23_spill] sm:$0xff]  ;;  %s7382_s18 = scalar_lea.vmem %s9393_s13, 2048  ;;  %s7388_s28 = scalar_lea.vmem %s7387_s20, 4096 }
 0x160   : > { %v6137_v12 = vcombine.low %v4782_v55, %v4785_v39  ;;  %v4789_v2 = vsel %vm7976_vm7, %v6121_v21, %v4788_v35  ;;  %v9579_v41 = vcombine.low %v8777_v36, %v8793_v52  ;;  %v9583_v0 = vcombine.low %v8807_v44, %v8827_v15  ;;  %v9585_v52 = vld [vmem:[#allocation17_spill] sm:$0xff]  ;;  %v9591_v44 = vld [vmem:[#allocation28_spill] sm:$0xff]  ;;  %p7383_p11 = scmp.ne.s32.totalorder %s9393_s13, %s7382_s18  ;;  %p7389_p0 = scmp.lt.s32.totalorder %s9393_s13, %s7387_s20 }
 0x161   : > { %v4792_v61 = vsel %vm7976_vm7, %v4790_v38, %v4791_v32  ;;  %v9584_v36 = vcombine.low %v8831_v33, %v8850_v6  ;;  %v9589_v49 = vcombine.low %v9587_v5, %v9588_v30  ;;  %v9592_v15 = vcombine.low %v9590_v24, %v9591_v44  ;;  %v9594_v33 = vld [vmem:[#allocation20_spill] sm:$0xff]  ;;  %v9595_v6 = vld [vmem:[#allocation27_spill] sm:$0xff]  ;;  %p7390_p1 = scmp.lt.s32.totalorder %s7388_s28, %s7382_s18 }
 0x162   : > { %6765 = vmatmul.mubr.msk.bf16.gmra.mrb[24].mxu1 %vm748_vm3, %v7334_v10  ;;  %v6138_v46 = vcombine.low %v4789_v2, %v4792_v61  ;;  %v9574_v10 = vld [vmem:[#allocation12_spill] sm:$0xff]  ;;  %v9597_v48 = vcombine.low %v9595_v6, %v9596_v13  ;;  %v9600_v18 = vcombine.low %v9598_v29, %v9599_v27  ;;  %v9605_v37 = vcombine.low %v9603_v26, %v9604_v25  ;;  %p7384_p12 = pnand %p7383_p11, %p7555_p5 }
 0x163   : > { %6768 = vmatprep.mubr.msk.bf16.mxu1 %vm748_vm3, %v7335_v11  ;;  %v9577_v11 = vld [vmem:[#allocation13_spill] sm:$0xff]  ;;  %p7391_p2 = por %p7390_p1, %p7389_p0 }
 0x164   : > { %p7385_p13 = pneg %p7384_p12 }
 0x165   : > { %6935 = vmatmul.mubr.msk.bf16.gmra.mrb[24].mxu0 %vm748_vm3, %v6085_v43  ;;  %v9601_v43 = vld [vmem:[#allocation21_spill] sm:$0xff] }
 0x166   : > { %6938 = vmatprep.mubr.msk.bf16.mxu0 %vm748_vm3, %v6086_v58  ;;  %v9602_v58 = vld [vmem:[#allocation22_spill] sm:$0xff]  ;;  %p7392_p3 = pnand %p7391_p2, %p7385_p13 }
 0x16a   : > { %6769 = vmatmul.mubr.msk.bf16.gmra.mrb[28].mxu1 %vm748_vm3, %v7336_v1 }
 0x16b   : > { %6808 = vmatprep.mubr.msk.bf16.mxu1 %vm748_vm3, %v9569_v47 }
 0x16d   : > { %6939 = vmatmul.mubr.msk.bf16.gmra.mrb[28].mxu0 %vm748_vm3, %v6087_v57 }
 0x16e   : > { %6944 = vmatprep.mubr.msk.bf16.mxu0 %vm748_vm3, %v6137_v12 }
 0x172   : > { %6809 = vmatmul.mubr.msk.bf16.vlgmr.msra.gmra.mrb[32].mxu1 %vm748_vm3, %v9570_v54 }
 0x173   : > { %6812 = vmatprep.mubr.msk.bf16.mxu1 %vm748_vm3, %v9571_v17 }
 0x175   : > { %6945 = vmatmul.mubr.msk.bf16.vlgmr.msra.gmra.mrb[0].mxu0 %vm748_vm3, %v6138_v46 }
 0x176   : > { %6948 = vmatprep.mubr.msk.bf16.mxu0 %vm748_vm3, %v9572_v62 }
 0x17a   : > { %6813 = vmatmul.mubr.msk.bf16.gmra.mrb[36].mxu1 %vm748_vm3, %v9573_v7 }
 0x17b   : > { %6816 = vmatprep.mubr.msk.bf16.mxu1 %vm748_vm3, %v9574_v10 }
 0x17d   : > { %6949 = vmatmul.mubr.msk.bf16.gmra.mrb[4].mxu0 %vm748_vm3, %v9575_v42  ;;  %v9254_v42 = vld [vmem:[%s9493_s4] ss:$0 sm:$0xff] }
 0x17e   : > { %6952 = vmatprep.mubr.msk.bf16.mxu0 %vm748_vm3, %v9576_v63 }
 0x182   : > { %6817 = vmatmul.mubr.msk.bf16.gmra.mrb[40].mxu1 %vm748_vm3, %v9577_v11 }
 0x183   : > { %6820 = vmatprep.mubr.msk.bf16.mxu1 %vm748_vm3, %v9578_v22 }
 0x185   : > { %6953 = vmatmul.mubr.msk.bf16.gmra.mrb[8].mxu0 %vm748_vm3, %v9579_v41 }
 0x186   : > { %6956 = vmatprep.mubr.msk.bf16.mxu0 %vm748_vm3, %v9580_v4 }
 0x18a   : > { %6821 = vmatmul.mubr.msk.bf16.gmra.mrb[44].mxu1 %vm748_vm3, %v9581_v16 }
 0x18b   : > { %6824 = vmatprep.mubr.msk.bf16.mxu1 %vm748_vm3, %v9582_v50 }
 0x18d   : > { %6957 = vmatmul.mubr.msk.bf16.gmra.mrb[12].mxu0 %vm748_vm3, %v9583_v0 }
 0x18e   : > { %6960 = vmatprep.mubr.msk.bf16.mxu0 %vm748_vm3, %v9584_v36 }
 0x192   : > { %6825 = vmatmul.mubr.msk.bf16.gmra.mrb[48].mxu1 %vm748_vm3, %v9585_v52  ;;  %v9267_v52 = vld [vmem:[%s9491_s2] ss:$0 sm:$0xff] }
 0x193   : > { %6828 = vmatprep.mubr.msk.bf16.mxu1 %vm748_vm3, %v9586_v9 }
 0x195   : > { %6961 = vmatmul.mubr.msk.bf16.gmra.mrb[16].mxu0 %vm748_vm3, %v9589_v49 }
 0x196   : > { %6964 = vmatprep.mubr.msk.bf16.mxu0 %vm748_vm3, %v9592_v15 }
 0x19a   : > { %6829 = vmatmul.mubr.msk.bf16.gmra.mrb[52].mxu1 %vm748_vm3, %v9593_v19 }
 0x19b   : > { %6832 = vmatprep.mubr.msk.bf16.mxu1 %vm748_vm3, %v9594_v33 }
 0x19d   : > { %6965 = vmatmul.mubr.msk.bf16.gmra.mrb[20].mxu0 %vm748_vm3, %v9597_v48 }
 0x19e   : > { %6968 = vmatprep.mubr.msk.bf16.mxu0 %vm748_vm3, %v9600_v18 }
 0x1a2   : > { %6833 = vmatmul.mubr.msk.bf16.gmra.mrb[56].mxu1 %vm748_vm3, %v9601_v43 }
 0x1a3   : > { %6836 = vmatprep.mubr.msk.bf16.mxu1 %vm748_vm3, %v9602_v58 }
 0x1a5   : > { %6969 = vmatmul.mubr.msk.bf16.gmra.mrb[24].mxu0 %vm748_vm3, %v9605_v37 }
 0x1a6   : > { %6972 = vmatprep.mubr.msk.bf16.mxu0 %vm748_vm3, %v6151_v3 }
 0x1aa   : > { %6837 = vmatmul.mubr.msk.bf16.gmra.mrb[60].mxu1 %vm748_vm3, %v9606_v56 }
 0x1ad   : > { %6973 = vmatmul.mubr.msk.bf16.gmra.mrb[28].mxu0 %vm748_vm3, %v6152_v8 }
 0x205   : > { %v6742_v60 = vpop.f32.mrb[0].mxu1 }
 0x206   : > { %v1911_v40 = vpop.f32.mrb[1].mxu1 }
 0x207   : > { %v6743_v51 = vpop.f32.mrb[2].mxu1 }
 0x208   : > { %v1914_v1 = vpop.f32.mrb[3].mxu1 }
 0x20d   : > { %v9195_v14 = vpop.f32.mrb[4].mxu1 }
 0x20e   : > { %v9197_v23 = vpop.f32.mrb[5].mxu1 }
 0x20f   : > { %v9199_v59 = vpop.f32.mrb[6].mxu1 }
 0x210   : > { %v9201_v34 = vpop.f32.mrb[7].mxu1 }
 0x215   : > { %v9203_v45 = vpop.f32.mrb[8].mxu1 }
 0x216   : > { %v9205_v3 = vpop.f32.mrb[9].mxu1 }
 0x217   : > { %v9207_v35 = vpop.f32.mrb[10].mxu1 }
 0x218   : > { %v9209_v53 = vpop.f32.mrb[11].mxu1 }
 0x21d   : > { %v9211_v20 = vpop.f32.mrb[12].mxu1 }
 0x21e   : > { %v9213_v8 = vpop.f32.mrb[13].mxu1 }
 0x21f   : > { %v9215_v55 = vpop.f32.mrb[14].mxu1 }
 0x220   : > { %v9217_v39 = vpop.f32.mrb[15].mxu1 }
 0x225   : > { %v9219_v28 = vpop.f32.mrb[16].mxu1 }
 0x226   : > { %v9221_v57 = vpop.f32.mrb[17].mxu1 }
 0x227   : > { %v9223_v47 = vpop.f32.mrb[18].mxu1 }
 0x228   : > { %v9225_v12 = vpop.f32.mrb[19].mxu1 }
 0x22d   : > { %v9227_v21 = vpop.f32.mrb[20].mxu1 }
 0x22e   : > { %v9229_v38 = vpop.f32.mrb[21].mxu1 }
 0x22f   : > { %v9231_v31 = vpop.f32.mrb[22].mxu1 }
 0x230   : > { %v9233_v32 = vpop.f32.mrb[23].mxu1 }
 0x235   : > { %v9235_v2 = vpop.f32.mrb[24].mxu1 }
 0x236   : > { %v9237_v61 = vpop.f32.mrb[25].mxu1 }
 0x237   : > { %v9239_v54 = vpop.f32.mrb[26].mxu1 }
 0x238   : > { %v9241_v46 = vpop.f32.mrb[27].mxu1 }
 0x23d   : > { %v9243_v17 = vpop.f32.mrb[28].mxu1 }
 0x23e   : > { %v9245_v62 = vpop.f32.mrb[29].mxu1 }
 0x23f   : > { %v9247_v7 = vpop.f32.mrb[30].mxu1 }
 0x240   : > { %v9249_v10 = vpop.f32.mrb[31].mxu1 }
 0x245   : > { %v6810_v63 = vpop.f32.mrb[32].mxu1 }
 0x246   : > { %v2850_v11 = vadd.f32 %v6810_v63, %v9254_v42  ;;  %v2841_v22 = vpop.f32.mrb[33].mxu1 }
 0x247   : > { %v2842_v41 = vadd.f32 %v9254_v42, %v2841_v22  ;;  %v6811_v4 = vpop.f32.mrb[34].mxu1 }
 0x248   : > { %v2853_v16 = vadd.f32 %v6811_v4, %v9254_v42  ;;  %v2844_v50 = vpop.f32.mrb[35].mxu1  ;;  %v6946_v36 = vpop.f32.mrb[0].mxu0 }
 0x249   : > { %v2845_v0 = vadd.f32 %v9254_v42, %v2844_v50  ;;  %v6976_v5 = vadd.f32 %v6946_v36, %v6742_v60  ;;  %v5026_v30 = vpop.f32.mrb[1].mxu0 }
 0x24a   : > { %v6284_v9 = vpack.c.bf16 %v2853_v16, %v2850_v11  ;;  %v6977_v24 = vadd.f32 %v5026_v30, %v1911_v40  ;;  %v6947_v44 = vpop.f32.mrb[2].mxu0 }
 0x24b   : > { %v6279_v49 = vpack.c.bf16 %v2845_v0, %v2842_v41  ;;  %v5194_v15 = vadd.f32 %v6976_v5, %v9267_v52  ;;  %v6978_v19 = vadd.f32 %v6947_v44, %v6743_v51  ;;  %v5029_v33 = vpop.f32.mrb[3].mxu0 }
 0x24c   : > { %6436 = vst [vmem:[%s9271_s10 + $0x8] sm:$0xff] %v6284_v9   ;;  %v5192_v13 = vadd.f32 %v6977_v24, %v9267_v52  ;;  %v6979_v48 = vadd.f32 %v5029_v33, %v1914_v1 }
 0x24d   : > { %6280 = vst [vmem:[%s9271_s10] sm:$0xff] %v6279_v49   ;;  %v6814_v6 = vpop.f32.mrb[36].mxu1  ;;  %v5195_v18 = vadd.f32 %v6978_v19, %v9267_v52  ;;  %v5226_v56 = vmax.f32 %v5194_v15, 0.0 }
 0x24e   : > { %v2866_v29 = vadd.f32 %v6814_v6, %v9254_v42  ;;  %v2857_v27 = vpop.f32.mrb[37].mxu1  ;;  %v5193_v26 = vadd.f32 %v6979_v48, %v9267_v52  ;;  %v5224_v51 = vmax.f32 %v5192_v13, 0.0 }
 0x24f   : > { %v2858_v43 = vadd.f32 %v9254_v42, %v2857_v27  ;;  %v6815_v58 = vpop.f32.mrb[38].mxu1  ;;  %v5227_v60 = vmax.f32 %v5195_v18, 0.0 }
 0x250   : > { %v2869_v25 = vadd.f32 %v6815_v58, %v9254_v42  ;;  %v2860_v37 = vpop.f32.mrb[39].mxu1  ;;  %v5225_v1 = vmax.f32 %v5193_v26, 0.0  ;;  %v6950_v63 = vpop.f32.mrb[4].mxu0 }
 0x251   : > { %v2861_v40 = vadd.f32 %v9254_v42, %v2860_v37  ;;  %v6364_v22 = vpack.c.bf16 %v5227_v60, %v5226_v56  ;;  %v6980_v41 = vadd.f32 %v6950_v63, %v9195_v14  ;;  %v5042_v4 = vpop.f32.mrb[5].mxu0 }
 0x252   : > { %v6294_v11 = vpack.c.bf16 %v2869_v25, %v2866_v29  ;;  %v6359_v50 = vpack.c.bf16 %v5225_v1, %v5224_v51  ;;  %v6981_v0 = vadd.f32 %v5042_v4, %v9197_v23  ;;  %v6951_v36 = vpop.f32.mrb[6].mxu0 }
 0x253   : > { %v6289_v16 = vpack.c.bf16 %v2861_v40, %v2858_v43  ;;  %6451 = vst [vmem:[%s9288_s11 + $0x8] sm:$0xff] %v6364_v22   ;;  %v5198_v9 = vadd.f32 %v6980_v41, %v9267_v52  ;;  %v6982_v5 = vadd.f32 %v6951_v36, %v9199_v59  ;;  %v5045_v30 = vpop.f32.mrb[7].mxu0 }
 0x254   : > { %6438 = vst [vmem:[%s9271_s10 + $0x18] sm:$0xff] %v6294_v11   ;;  %6360 = vst [vmem:[%s9288_s11] sm:$0xff] %v6359_v50   ;;  %v5196_v49 = vadd.f32 %v6981_v0, %v9267_v52  ;;  %v6983_v23 = vadd.f32 %v5045_v30, %v9201_v34 }
 0x255   : > { %6437 = vst [vmem:[%s9271_s10 + $0x10] sm:$0xff] %v6289_v16   ;;  %v6818_v14 = vpop.f32.mrb[40].mxu1  ;;  %v5199_v15 = vadd.f32 %v6982_v5, %v9267_v52  ;;  %v5230_v48 = vmax.f32 %v5198_v9, 0.0 }
 0x256   : > { %v2882_v24 = vadd.f32 %v6818_v14, %v9254_v42  ;;  %v2873_v44 = vpop.f32.mrb[41].mxu1  ;;  %v5197_v6 = vadd.f32 %v6983_v23, %v9267_v52  ;;  %v5228_v34 = vmax.f32 %v5196_v49, 0.0 }
 0x257   : > { %v2874_v19 = vadd.f32 %v9254_v42, %v2873_v44  ;;  %v6819_v33 = vpop.f32.mrb[42].mxu1  ;;  %v5231_v29 = vmax.f32 %v5199_v15, 0.0 }
 0x258   : > { %v2885_v59 = vadd.f32 %v6819_v33, %v9254_v42  ;;  %v2876_v13 = vpop.f32.mrb[43].mxu1  ;;  %v5229_v18 = vmax.f32 %v5197_v6, 0.0  ;;  %v6954_v43 = vpop.f32.mrb[8].mxu0 }
 0x259   : > { %v2877_v27 = vadd.f32 %v9254_v42, %v2876_v13  ;;  %v6374_v26 = vpack.c.bf16 %v5231_v29, %v5230_v48  ;;  %v6984_v25 = vadd.f32 %v6954_v43, %v9203_v45  ;;  %v5058_v37 = vpop.f32.mrb[9].mxu0 }
 0x25a   : > { %v6304_v58 = vpack.c.bf16 %v2885_v59, %v2882_v24  ;;  %v6369_v60 = vpack.c.bf16 %v5229_v18, %v5228_v34  ;;  %v6985_v40 = vadd.f32 %v5058_v37, %v9205_v3  ;;  %v6955_v51 = vpop.f32.mrb[10].mxu0 }
 0x25b   : > { %v6299_v56 = vpack.c.bf16 %v2877_v27, %v2874_v19  ;;  %6453 = vst [vmem:[%s9288_s11 + $0x18] sm:$0xff] %v6374_v26   ;;  %v5202_v1 = vadd.f32 %v6984_v25, %v9267_v52  ;;  %v6986_v63 = vadd.f32 %v6955_v51, %v9207_v35  ;;  %v5061_v11 = vpop.f32.mrb[11].mxu0 }
 0x25c   : > { %6440 = vst [vmem:[%s9271_s10 + $0x28] sm:$0xff] %v6304_v58   ;;  %6452 = vst [vmem:[%s9288_s11 + $0x10] sm:$0xff] %v6369_v60   ;;  %v5200_v41 = vadd.f32 %v6985_v40, %v9267_v52  ;;  %v6987_v45 = vadd.f32 %v5061_v11, %v9209_v53 }
 0x25d   : > { %6439 = vst [vmem:[%s9271_s10 + $0x20] sm:$0xff] %v6299_v56   ;;  %v6822_v22 = vpop.f32.mrb[44].mxu1  ;;  %v5203_v3 = vadd.f32 %v6986_v63, %v9267_v52  ;;  %v5234_v5 = vmax.f32 %v5202_v1, 0.0 }
 0x25e   : > { %v2898_v4 = vadd.f32 %v6822_v22, %v9254_v42  ;;  %v2889_v16 = vpop.f32.mrb[45].mxu1  ;;  %v5201_v36 = vadd.f32 %v6987_v45, %v9267_v52  ;;  %v5232_v53 = vmax.f32 %v5200_v41, 0.0 }
 0x25f   : > { %v2890_v50 = vadd.f32 %v9254_v42, %v2889_v16  ;;  %v6823_v0 = vpop.f32.mrb[46].mxu1  ;;  %v5235_v30 = vmax.f32 %v5203_v3, 0.0 }
 0x260   : > { %v2901_v35 = vadd.f32 %v6823_v0, %v9254_v42  ;;  %v2892_v9 = vpop.f32.mrb[47].mxu1  ;;  %v5233_v49 = vmax.f32 %v5201_v36, 0.0  ;;  %v6958_v23 = vpop.f32.mrb[12].mxu0 }
 0x261   : > { %v2893_v14 = vadd.f32 %v9254_v42, %v2892_v9  ;;  %v6384_v44 = vpack.c.bf16 %v5235_v30, %v5234_v5  ;;  %v6988_v15 = vadd.f32 %v6958_v23, %v9211_v20  ;;  %v5074_v19 = vpop.f32.mrb[13].mxu0 }
 0x262   : > { %v6314_v24 = vpack.c.bf16 %v2901_v35, %v2898_v4  ;;  %v6379_v6 = vpack.c.bf16 %v5233_v49, %v5232_v53  ;;  %v6989_v59 = vadd.f32 %v5074_v19, %v9213_v8  ;;  %v6959_v13 = vpop.f32.mrb[14].mxu0 }
 0x263   : > { %v6309_v33 = vpack.c.bf16 %v2893_v14, %v2890_v50  ;;  %6455 = vst [vmem:[%s9288_s11 + $0x28] sm:$0xff] %v6384_v44   ;;  %v5206_v48 = vadd.f32 %v6988_v15, %v9267_v52  ;;  %v6990_v29 = vadd.f32 %v6959_v13, %v9215_v55  ;;  %v5077_v27 = vpop.f32.mrb[15].mxu0 }
 0x264   : > { %6442 = vst [vmem:[%s9271_s10 + $0x38] sm:$0xff] %v6314_v24   ;;  %6454 = vst [vmem:[%s9288_s11 + $0x20] sm:$0xff] %v6379_v6   ;;  %v5204_v18 = vadd.f32 %v6989_v59, %v9267_v52  ;;  %v6991_v20 = vadd.f32 %v5077_v27, %v9217_v39 }
 0x265   : > { %6441 = vst [vmem:[%s9271_s10 + $0x30] sm:$0xff] %v6309_v33   ;;  %v6826_v34 = vpop.f32.mrb[48].mxu1  ;;  %v5207_v8 = vadd.f32 %v6990_v29, %v9267_v52  ;;  %v5238_v60 = vmax.f32 %v5206_v48, 0.0 }
 0x266   : > { %v2914_v43 = vadd.f32 %v6826_v34, %v9254_v42  ;;  %v2905_v58 = vpop.f32.mrb[49].mxu1  ;;  %v5205_v37 = vadd.f32 %v6991_v20, %v9267_v52  ;;  %v5236_v39 = vmax.f32 %v5204_v18, 0.0 }
 0x267   : > { %v2906_v26 = vadd.f32 %v9254_v42, %v2905_v58  ;;  %v6827_v25 = vpop.f32.mrb[50].mxu1  ;;  %v5239_v40 = vmax.f32 %v5207_v8, 0.0 }
 0x268   : > { %v2917_v55 = vadd.f32 %v6827_v25, %v9254_v42  ;;  %v2908_v56 = vpop.f32.mrb[51].mxu1  ;;  %v5237_v1 = vmax.f32 %v5205_v37, 0.0  ;;  %v6962_v63 = vpop.f32.mrb[16].mxu0 }
 0x269   : > { %v2909_v51 = vadd.f32 %v9254_v42, %v2908_v56  ;;  %v6394_v22 = vpack.c.bf16 %v5239_v40, %v5238_v60  ;;  %v6992_v41 = vadd.f32 %v6962_v63, %v9219_v28  ;;  %v5090_v45 = vpop.f32.mrb[17].mxu0 }
 0x26a   : > { %v6324_v11 = vpack.c.bf16 %v2917_v55, %v2914_v43  ;;  %v6389_v16 = vpack.c.bf16 %v5237_v1, %v5236_v39  ;;  %v6993_v3 = vadd.f32 %v5090_v45, %v9221_v57  ;;  %v6963_v50 = vpop.f32.mrb[18].mxu0 }
 0x26b   : > { %v6319_v4 = vpack.c.bf16 %v2909_v51, %v2906_v26  ;;  %6457 = vst [vmem:[%s9288_s11 + $0x38] sm:$0xff] %v6394_v22   ;;  %v5210_v0 = vadd.f32 %v6992_v41, %v9267_v52  ;;  %v6994_v36 = vadd.f32 %v6963_v50, %v9223_v47  ;;  %v5093_v35 = vpop.f32.mrb[19].mxu0 }
 0x26c   : > { %6444 = vst [vmem:[%s9271_s10 + $0x48] sm:$0xff] %v6324_v11   ;;  %6456 = vst [vmem:[%s9288_s11 + $0x30] sm:$0xff] %v6389_v16   ;;  %v5208_v5 = vadd.f32 %v6993_v3, %v9267_v52  ;;  %v6995_v28 = vadd.f32 %v5093_v35, %v9225_v12 }
 0x26d   : > { %6443 = vst [vmem:[%s9271_s10 + $0x40] sm:$0xff] %v6319_v4   ;;  %v6830_v9 = vpop.f32.mrb[52].mxu1  ;;  %v5211_v57 = vadd.f32 %v6994_v36, %v9267_v52  ;;  %v5242_v44 = vmax.f32 %v5210_v0, 0.0 }
 0x26e   : > { %v2930_v30 = vadd.f32 %v6830_v9, %v9254_v42  ;;  %v2921_v14 = vpop.f32.mrb[53].mxu1  ;;  %v5209_v23 = vadd.f32 %v6995_v28, %v9267_v52  ;;  %v5240_v12 = vmax.f32 %v5208_v5, 0.0 }
 0x26f   : > { %v2922_v53 = vadd.f32 %v9254_v42, %v2921_v14  ;;  %v6831_v49 = vpop.f32.mrb[54].mxu1  ;;  %v5243_v15 = vmax.f32 %v5211_v57, 0.0 }
 0x270   : > { %v2933_v47 = vadd.f32 %v6831_v49, %v9254_v42  ;;  %v2924_v24 = vpop.f32.mrb[55].mxu1  ;;  %v5241_v33 = vmax.f32 %v5209_v23, 0.0  ;;  %v6966_v6 = vpop.f32.mrb[20].mxu0 }
 0x271   : > { %v2925_v19 = vadd.f32 %v9254_v42, %v2924_v24  ;;  %v6404_v13 = vpack.c.bf16 %v5243_v15, %v5242_v44  ;;  %v6996_v48 = vadd.f32 %v6966_v6, %v9227_v21  ;;  %v5106_v29 = vpop.f32.mrb[21].mxu0 }
 0x272   : > { %v6334_v59 = vpack.c.bf16 %v2933_v47, %v2930_v30  ;;  %v6399_v34 = vpack.c.bf16 %v5241_v33, %v5240_v12  ;;  %v6997_v18 = vadd.f32 %v5106_v29, %v9229_v38  ;;  %v6967_v20 = vpop.f32.mrb[22].mxu0 }
 0x273   : > { %v6329_v27 = vpack.c.bf16 %v2925_v19, %v2922_v53  ;;  %6459 = vst [vmem:[%s9288_s11 + $0x48] sm:$0xff] %v6404_v13   ;;  %v5214_v43 = vadd.f32 %v6996_v48, %v9267_v52  ;;  %v6998_v58 = vadd.f32 %v6967_v20, %v9231_v31  ;;  %v5109_v8 = vpop.f32.mrb[23].mxu0 }
 0x274   : > { %6446 = vst [vmem:[%s9271_s10 + $0x58] sm:$0xff] %v6334_v59   ;;  %6458 = vst [vmem:[%s9288_s11 + $0x40] sm:$0xff] %v6399_v34   ;;  %v5212_v25 = vadd.f32 %v6997_v18, %v9267_v52  ;;  %v6999_v21 = vadd.f32 %v5109_v8, %v9233_v32 }
 0x275   : > { %6445 = vst [vmem:[%s9271_s10 + $0x50] sm:$0xff] %v6329_v27   ;;  %v6834_v26 = vpop.f32.mrb[56].mxu1  ;;  %v5215_v38 = vadd.f32 %v6998_v58, %v9267_v52  ;;  %v5246_v39 = vmax.f32 %v5214_v43, 0.0 }
 0x276   : > { %v2946_v37 = vadd.f32 %v6834_v26, %v9254_v42  ;;  %v2937_v55 = vpop.f32.mrb[57].mxu1  ;;  %v5213_v40 = vadd.f32 %v6999_v21, %v9267_v52  ;;  %v5244_v32 = vmax.f32 %v5212_v25, 0.0 }
 0x277   : > { %v2938_v56 = vadd.f32 %v9254_v42, %v2937_v55  ;;  %v6835_v60 = vpop.f32.mrb[58].mxu1  ;;  %v5247_v1 = vmax.f32 %v5215_v38, 0.0 }
 0x278   : > { %v2949_v31 = vadd.f32 %v6835_v60, %v9254_v42  ;;  %v2940_v51 = vpop.f32.mrb[59].mxu1  ;;  %v5245_v11 = vmax.f32 %v5213_v40, 0.0  ;;  %v6970_v22 = vpop.f32.mrb[24].mxu0 }
 0x279   : > { %v2941_v63 = vadd.f32 %v9254_v42, %v2940_v51  ;;  %v6414_v45 = vpack.c.bf16 %v5247_v1, %v5246_v39  ;;  %v7000_v4 = vadd.f32 %v6970_v22, %v9235_v2  ;;  %v5122_v16 = vpop.f32.mrb[25].mxu0 }
 0x27a   : > { %v6344_v41 = vpack.c.bf16 %v2949_v31, %v2946_v37  ;;  %v6409_v50 = vpack.c.bf16 %v5245_v11, %v5244_v32  ;;  %v7001_v0 = vadd.f32 %v5122_v16, %v9237_v61  ;;  %v6971_v36 = vpop.f32.mrb[26].mxu0 }
 0x27b   : > { %v6339_v3 = vpack.c.bf16 %v2941_v63, %v2938_v56  ;;  %6461 = vst [vmem:[%s9288_s11 + $0x58] sm:$0xff] %v6414_v45   ;;  %v5218_v35 = vadd.f32 %v7000_v4, %v9267_v52  ;;  %v7002_v9 = vadd.f32 %v6971_v36, %v9239_v54  ;;  %v5125_v5 = vpop.f32.mrb[27].mxu0 }
 0x27c   : > { %6448 = vst [vmem:[%s9271_s10 + $0x68] sm:$0xff] %v6344_v41   ;;  %6460 = vst [vmem:[%s9288_s11 + $0x50] sm:$0xff] %v6409_v50   ;;  %v5216_v2 = vadd.f32 %v7001_v0, %v9267_v52  ;;  %v7003_v30 = vadd.f32 %v5125_v5, %v9241_v46 }
 0x27d   : > { %6447 = vst [vmem:[%s9271_s10 + $0x60] sm:$0xff] %v6339_v3   ;;  %v6838_v28 = vpop.f32.mrb[60].mxu1  ;;  %v5219_v57 = vadd.f32 %v7002_v9, %v9267_v52  ;;  %v5250_v24 = vmax.f32 %v5218_v35, 0.0 }
 0x27e   : > { %v2962_v14 = vadd.f32 %v6838_v28, %v9254_v42  ;;  %v2953_v61 = vpop.f32.mrb[61].mxu1  ;;  %v5217_v23 = vadd.f32 %v7003_v30, %v9267_v52  ;;  %v5248_v15 = vmax.f32 %v5216_v2, 0.0 }
 0x27f   : > { %v2954_v53 = vadd.f32 %v9254_v42, %v2953_v61  ;;  %v6839_v49 = vpop.f32.mrb[62].mxu1  ;;  %v5251_v44 = vmax.f32 %v5219_v57, 0.0 }
 0x280   : > { %v2965_v54 = vadd.f32 %v6839_v49, %v9254_v42  ;;  %v2956_v47 = vpop.f32.mrb[63].mxu1  ;;  %v5249_v19 = vmax.f32 %v5217_v23, 0.0  ;;  %v6974_v12 = vpop.f32.mrb[28].mxu0 }
 0x281   : > { %v2957_v46 = vadd.f32 %v9254_v42, %v2956_v47  ;;  %v6424_v6 = vpack.c.bf16 %v5251_v44, %v5250_v24  ;;  %v7004_v59 = vadd.f32 %v6974_v12, %v9243_v17  ;;  %v5138_v13 = vpop.f32.mrb[29].mxu0 }
 0x282   : > { %v6354_v33 = vpack.c.bf16 %v2965_v54, %v2962_v14  ;;  %v6419_v42 = vpack.c.bf16 %v5249_v19, %v5248_v15  ;;  %v7005_v29 = vadd.f32 %v5138_v13, %v9245_v62  ;;  %v6975_v27 = vpop.f32.mrb[30].mxu0 }
 0x283   : > { %v6349_v48 = vpack.c.bf16 %v2957_v46, %v2954_v53  ;;  %6463 = vst [vmem:[%s9288_s11 + $0x68] sm:$0xff] %v6424_v6   ;;  %v5222_v17 = vadd.f32 %v7004_v59, %v9267_v52  ;;  %v7006_v34 = vadd.f32 %v6975_v27, %v9247_v7  ;;  %v5141_v18 = vpop.f32.mrb[31].mxu0 }
 0x284   : > { %6450 = vst [vmem:[%s9271_s10 + $0x78] sm:$0xff] %v6354_v33   ;;  %6462 = vst [vmem:[%s9288_s11 + $0x60] sm:$0xff] %v6419_v42   ;;  %v5220_v20 = vadd.f32 %v7005_v29, %v9267_v52  ;;  %v7007_v43 = vadd.f32 %v5141_v18, %v9249_v10 }
 0x285   : > { %6449 = vst [vmem:[%s9271_s10 + $0x70] sm:$0xff] %v6349_v48  }
 0x286   : > { %7395 = shalt.err (!%p7392_p3)
}
 0x287   : > { %s7396_s29 = scalar_lea.hbm %s9391_s16, 2048  ;;  %s7400_s14 = scalar_lea.hbm %s9495_s6, 4096 }
 0x288   : > { %p7397_p4 = scmp.ne.s32.totalorder %s9391_s16, %s7396_s29  ;;  %p7401_p9 = scmp.lt.u32.totalorder %s9391_s16, %s9495_s6 }
 0x289   : > { %p7402_p10 = scmp.lt.u32.totalorder %s7400_s14, %s7396_s29  ;;  %p7404_p12 = scmp.lt.u32.totalorder %s7396_s29, %s9391_s16 }
 0x28a   : > { %p7398_p7 = pnand %p7397_p4, %p7555_p5 }
 0x28b   : > { %p7403_p11 = por %p7402_p10, %p7401_p9 }
 0x28c   : > { %p7399_p8 = pneg %p7398_p7 }
 0x28d   : > { %p7405_p13 = por %p7404_p12, %p7403_p11 }
 0x28f   : > { %p7406_p0 = pnand %p7405_p13, %p7399_p8 }
 0x291   : > { %7409 = shalt.err (!%p7406_p0)
}
 0x292   : > { %s7479_s18 = smov 64   ;;  %s7480_s20 = smov 4   ;;  %v5223_v62 = vadd.f32 %v7006_v34, %v9267_v52  ;;  %v5221_v7 = vadd.f32 %v7007_v43, %v9267_v52  ;;  %v5254_v10 = vmax.f32 %v5222_v17, 0.0  ;;  %v5252_v8 = vmax.f32 %v5220_v20, 0.0 }
 0x293   : > { %7244 = dma.vmem_to_hbm [thread:$0]  (%p7555_p5), %s9393_s13, 2048, %s9391_s16, %s5422_s17, %s7479_s18, %s7479_s18, %s7480_s20  }
 0x294   : > { %v5255_v58 = vmax.f32 %v5223_v62, 0.0  ;;  %s5435_s28 = sshll.u32 %s9288_s11, 4  ;;  %v5253_v26 = vmax.f32 %v5221_v7, 0.0  ;;  %s9439_s10 = scalar_lea.hbm %s9494_s5, %s6274_s12  ;;  %s9441_s28 = int_to_ptr.vmem [resolvable:$true] %s5435_s28 }
 0x295   : > { %s5417_s13 = scalar_lea.sflag [#allocation3], %s9257_s26  ;;  %s7410_s16 = scalar_lea.vmem %s9441_s28, 2048 }
 0x296   : > { %v6434_v25 = vpack.c.bf16 %v5255_v58, %v5254_v10  ;;  %v6429_v21 = vpack.c.bf16 %v5253_v26, %v5252_v8  ;;  %p7411_p1 = scmp.ne.s32.totalorder %s9441_s28, %s7410_s16  ;;  %s7481_s17 = smov [#allocation2]  }
 0x297   : > { %s7414_s25 = sshll.u32 %s7481_s17, 4  ;;  %s7415_s25 = int_to_ptr.vmem [resolvable:$false] %s7414_s25 }
 0x298   : > { %6465 = vst [vmem:[%s9288_s11 + $0x78] sm:$0xff] %v6434_v25   ;;  %6464 = vst [vmem:[%s9288_s11 + $0x70] sm:$0xff] %v6429_v21   ;;  %p7412_p2 = pnand %p7411_p1, %p7555_p5  ;;  %s7416_s14 = scalar_lea.vmem %s7415_s25, 4096 }
 0x299   : > { %p7417_p4 = scmp.lt.s32.totalorder %s9441_s28, %s7415_s25  ;;  %p7418_p7 = scmp.lt.s32.totalorder %s7416_s14, %s7410_s16 }
 0x29a   : > { %p7413_p3 = pneg %p7412_p2 }
 0x29b   : > { %p7419_p8 = por %p7418_p7, %p7417_p4 }
 0x29d   : > { %p7420_p9 = pnand %p7419_p8, %p7413_p3 }
 0x29f   : > { %7423 = shalt.err (!%p7420_p9)
}
 0x2a0   : > { %s7424_s11 = scalar_lea.hbm %s9439_s10, 2048  ;;  %s7428_s19 = scalar_lea.hbm %s9494_s5, 4096 }
 0x2a1   : > { %p7425_p10 = scmp.ne.s32.totalorder %s9439_s10, %s7424_s11  ;;  %p7429_p13 = scmp.lt.u32.totalorder %s9439_s10, %s9494_s5 }
 0x2a2   : > { %p7430_p0 = scmp.lt.u32.totalorder %s7428_s19, %s7424_s11  ;;  %p7432_p2 = scmp.lt.u32.totalorder %s7424_s11, %s9439_s10 }
 0x2a3   : > { %p7426_p11 = pnand %p7425_p10, %p7555_p5 }
 0x2a4   : > { %p7431_p1 = por %p7430_p0, %p7429_p13 }
 0x2a5   : > { %p7427_p12 = pneg %p7426_p11 }
 0x2a6   : > { %p7433_p3 = por %p7432_p2, %p7431_p1 }
 0x2a8   : > { %p7434_p4 = pnand %p7433_p3, %p7427_p12 }
 0x2aa   : > { %7437 = shalt.err (!%p7434_p4)
}
 0x2ab   : > { %7243 = dma.vmem_to_hbm [thread:$0]  (%p7555_p5), %s9441_s28, 2048, %s9439_s10, %s5417_s13, %s7479_s18, %s7479_s18, %s7480_s20  }
 0x2ac PF: > { %p7254_p7 = scmp.ge.s32.totalorder %s7476_s24, 2  ;;  %s5466_s16 = sand.u32 1, %s7464_s21  }
 0x2ad   : > { %s5467_s17 = scalar_lea.sflag [#allocation3], %s5466_s16 }
 0x2ae   : > { %p7248_p8 = pnand %p7254_p7, %p7559_p6 }
 0x2b0   : > { %7455 = dma.done.wait (!%p7248_p8), %s5467_s17, 2048  }
 0x2b1   : > { %7457 = vsyncadd (!%p7248_p8), %s5467_s17, 4294965248  ;;  %s5476_s7 = scalar_lea.sflag [#allocation5], %s5466_s16 }
 0x2b2   : > { %7459 = dma.done.wait (!%p7248_p8), %s5476_s7, 2048  }
 0x2b3   : > { %7461 = vsyncadd (!%p7248_p8), %s5476_s7, 4294965248  ;;  %p20_p5 = scmp.ge.s32.totalorder %s7542_s27, 4   ;;  %s9607_s21 = smov %s7468_s22 }
 0x2b4   : > { %s9608_s22 = smov %s7472_s23  ;;  %s9609_s23 = smov %s7553_s30 }
 0x2b5   : > { %s9610_s24 = smov %s7542_s27  ;;  %22 = sbr.rel (!%p20_p5) target bundleno = 5 (0x5), region = 102 }
 0x2bc   :  { %5481 = vsyncpa [#allocation3], 1 }
 0x2bd   :  { %5483 = vsyncpa [#allocation3 + $0x1], 1 }
 0x2be   :  { %5484 = vsyncpa [#allocation5], 1 }
 0x2bf   :  { %5486 = vsyncpa [#allocation5 + $0x1], 1 }

</bundles_post_ra>
